<compile_context>
chip_gen: v5e
topology: v5e:2x2
jax: 0.10.0
libtpu: 0.0.40
codegen_flags: <defaults>
</compile_context>

<pallas_src>
import jax
import jax.numpy as jnp
from jax.experimental import pallas as pl
from jax.experimental.pallas import tpu as pltpu

# ---- Hyperparameters (scaled down from the reference:
#      n_embd 384->96, n_layer 6->2, block_size 256->32, vocab 65) ----
N_EMBD = 96
N_HEAD = 6
HEAD_SIZE = N_EMBD // N_HEAD          # 16
N_LAYER = 2
BLOCK_SIZE = 32
VOCAB_SIZE = 65
VOCAB_PAD = 128                       # lane-dense LM-head output; sliced in wrapper
FF_DIM = 4 * N_EMBD                   # 384
EPS = 1e-5                            # torch.nn.LayerNorm default

# ---- Slab layout (all offsets are static Python ints, sublane-aligned) ----
W96_ROWS = N_LAYER * 8 * N_EMBD                      # per layer: wk,wq,wv,wproj (4*96) + w2 (384)
W384_ROWS = (N_LAYER + 1) * N_EMBD                   # per layer: w1 (96 rows) + wlm_pad (96 rows)
WTE_ROWS_PAD = ((VOCAB_SIZE + 7) // 8) * 8           # 72
WPE_OFF = WTE_ROWS_PAD                               # 72
LPAR_OFF = WPE_OFF + BLOCK_SIZE                      # 104   (8 f32 param rows per layer)
FPAR_OFF = LPAR_OFF + 8 * N_LAYER                    # 120   (g_f, b_f, blm_pad)
FSLAB_ROWS = ((FPAR_OFF + 3 + 7) // 8) * 8           # 128


def _layernorm(h, g, b):
    mu = jnp.mean(h, axis=-1, keepdims=True)
    var = jnp.mean((h - mu) ** 2, axis=-1, keepdims=True)
    return (h - mu) * jax.lax.rsqrt(var + EPS) * g + b


def minigpt_kernel(idx_ref, w96_ref, w384_ref, fs_ref, o_ref):
    """One grid step = one sample.
    idx_ref: (T, 1) int32; w96_ref: (W96_ROWS, 96) bf16; w384_ref: (W384_ROWS, 384) bf16;
    fs_ref: (FSLAB_ROWS, 384) f32; o_ref: (T, VOCAB_PAD) f32."""
    T = idx_ref.shape[0]
    C = N_EMBD

    # ---- token + position embedding (exact gather via one-hot f32 matmul) ----
    idx_col = idx_ref[...]                                               # (T, 1) int32
    onehot = (idx_col == jax.lax.broadcasted_iota(
        jnp.int32, (T, WTE_ROWS_PAD), 1)).astype(jnp.float32)            # (T, 72)
    wte = fs_ref[0:WTE_ROWS_PAD, 0:C]                                    # (72, C) f32 (pad rows = 0)
    wpe = fs_ref[WPE_OFF:WPE_OFF + T, 0:C]                               # (T, C) f32
    x = jnp.dot(onehot, wte, preferred_element_type=jnp.float32) + wpe   # (T, C) f32, VMEM-resident

    # ---- precomputed additive causal mask bias (0 where row >= col, else -1e30) ----
    row = jax.lax.broadcasted_iota(jnp.int32, (T, T), 0)
    col = jax.lax.broadcasted_iota(jnp.int32, (T, T), 1)
    mask_bias = jnp.where(row >= col, 0.0, -1e30).astype(jnp.float32)    # (T, T)

    for li in range(N_LAYER):
        # -------- carve this layer's weights out of the slabs (static slices) --------
        r0 = li * 8 * C
        wk = w96_ref[r0 + 0 * C:r0 + 1 * C, :]        # (C, C) bf16, n_embd**-0.5 pre-folded
        wq = w96_ref[r0 + 1 * C:r0 + 2 * C, :]
        wv = w96_ref[r0 + 2 * C:r0 + 3 * C, :]
        wproj = w96_ref[r0 + 3 * C:r0 + 4 * C, :]
        w2 = w96_ref[r0 + 4 * C:r0 + 8 * C, :]        # (FF_DIM, C) bf16
        w1 = w384_ref[li * C:(li + 1) * C, :]         # (C, FF_DIM) bf16

        p0 = LPAR_OFF + li * 8
        g1 = fs_ref[p0 + 0:p0 + 1, 0:C]
        b1 = fs_ref[p0 + 1:p0 + 2, 0:C]
        bproj = fs_ref[p0 + 2:p0 + 3, 0:C]
        g2 = fs_ref[p0 + 3:p0 + 4, 0:C]
        b2 = fs_ref[p0 + 4:p0 + 5, 0:C]
        fb1 = fs_ref[p0 + 5:p0 + 6, :]                # (1, FF_DIM)
        fb2 = fs_ref[p0 + 6:p0 + 7, 0:C]

        # -------- multi-head attention (pre-LN) --------
        h = _layernorm(x, g1, b1).astype(jnp.bfloat16)                   # (T, C)
        # dense QKV matmuls (full 96-deep contraction), immediate bf16 cast
        k = jnp.dot(h, wk, preferred_element_type=jnp.float32).astype(jnp.bfloat16)
        q = jnp.dot(h, wq, preferred_element_type=jnp.float32).astype(jnp.bfloat16)
        v = jnp.dot(h, wv, preferred_element_type=jnp.float32).astype(jnp.bfloat16)

        heads = []
        for hh in range(N_HEAD):
            sl = slice(hh * HEAD_SIZE, (hh + 1) * HEAD_SIZE)
            # reference quirk: scores = K @ Q^T, scaled by n_embd**-0.5 (folded into wk)
            s = jnp.einsum('id,jd->ij', k[:, sl], q[:, sl],
                           preferred_element_type=jnp.float32)           # (T, T) f32
            s = s + mask_bias
            s = s - jnp.max(s, axis=-1, keepdims=True)
            p = jnp.exp(s)
            p = p * pl.reciprocal(jnp.sum(p, axis=-1, keepdims=True), approx=True)
            # TODO(synk): attention dropout omitted (identity in eval-mode forward).
            heads.append(jnp.dot(p.astype(jnp.bfloat16), v[:, sl],
                                 preferred_element_type=jnp.float32))     # (T, HS)
        attn = jnp.concatenate(heads, axis=-1).astype(jnp.bfloat16)       # (T, C)
        # single dense output projection (no per-head sum)
        x = x + jnp.dot(attn, wproj, preferred_element_type=jnp.float32) + bproj
        # TODO(synk): residual / FFN dropout omitted (identity in eval-mode forward).

        # -------- feed-forward (pre-LN) --------
        h2 = _layernorm(x, g2, b2).astype(jnp.bfloat16)
        ff = jnp.dot(h2, w1, preferred_element_type=jnp.float32) + fb1
        ff = jnp.maximum(ff, 0.0).astype(jnp.bfloat16)
        ff = jnp.dot(ff, w2, preferred_element_type=jnp.float32) + fb2
        x = x + ff

    # ---- final LayerNorm + LM head (lane-dense: vocab padded to 128) ----
    g_f = fs_ref[FPAR_OFF + 0:FPAR_OFF + 1, 0:C]
    b_f = fs_ref[FPAR_OFF + 1:FPAR_OFF + 2, 0:C]
    blm = fs_ref[FPAR_OFF + 2:FPAR_OFF + 3, 0:VOCAB_PAD]
    wlm = w384_ref[N_LAYER * C:(N_LAYER + 1) * C, 0:VOCAB_PAD]            # (C, 128) bf16
    hf = _layernorm(x, g_f, b_f).astype(jnp.bfloat16)
    o_ref[...] = jnp.dot(hf, wlm, preferred_element_type=jnp.float32) + blm


def _prep_weights(params):
    """Pack all parameters into 3 contiguous DMA slabs:
    w96 (bf16, width 96): wk(scaled), wq, wv, wproj, w2 per layer;
    w384 (bf16, width 384): w1 per layer + padded LM-head weight;
    fslab (f32, width 384): wte, wpe, LayerNorm params and biases."""
    scale = N_EMBD ** -0.5                     # reference quirk: n_embd, not head_size

    w96_parts, w384_parts = [], []
    for blk in params['blocks']:
        w96_parts += [blk['wk'] * scale, blk['wq'], blk['wv'], blk['wproj'], blk['w2']]
        w384_parts.append(blk['w1'])
    wlm_pad = jnp.zeros((N_EMBD, FF_DIM), jnp.float32).at[:, :VOCAB_SIZE].set(params['wlm'])
    w384_parts.append(wlm_pad)
    w96 = jnp.concatenate(w96_parts, axis=0).astype(jnp.bfloat16)         # (W96_ROWS, 96)
    w384 = jnp.concatenate(w384_parts, axis=0).astype(jnp.bfloat16)       # (W384_ROWS, 384)

    fs = jnp.zeros((FSLAB_ROWS, FF_DIM), jnp.float32)
    fs = fs.at[0:VOCAB_SIZE, 0:N_EMBD].set(params['wte'])
    fs = fs.at[WPE_OFF:WPE_OFF + BLOCK_SIZE, 0:N_EMBD].set(params['wpe'])
    for li, blk in enumerate(params['blocks']):
        r = LPAR_OFF + li * 8
        fs = fs.at[r + 0, 0:N_EMBD].set(blk['g1'][0])
        fs = fs.at[r + 1, 0:N_EMBD].set(blk['b1'][0])
        fs = fs.at[r + 2, 0:N_EMBD].set(blk['bproj'][0])
        fs = fs.at[r + 3, 0:N_EMBD].set(blk['g2'][0])
        fs = fs.at[r + 4, 0:N_EMBD].set(blk['b2'][0])
        fs = fs.at[r + 5, :].set(blk['fb1'][0])
        fs = fs.at[r + 6, 0:N_EMBD].set(blk['fb2'][0])
    fs = fs.at[FPAR_OFF + 0, 0:N_EMBD].set(params['g_f'][0])
    fs = fs.at[FPAR_OFF + 1, 0:N_EMBD].set(params['b_f'][0])
    fs = fs.at[FPAR_OFF + 2, 0:VOCAB_SIZE].set(params['blm'][0])
    return w96, w384, fs


def init_params(key):
    def normal(k, shape):
        return 0.02 * jax.random.normal(k, shape, dtype=jnp.float32)

    keys = iter(jax.random.split(key, 64))
    params = {
        'wte': normal(next(keys), (VOCAB_SIZE, N_EMBD)),
        'wpe': normal(next(keys), (BLOCK_SIZE, N_EMBD)),
        'blocks': [],
        'g_f': jnp.ones((1, N_EMBD), jnp.float32),
        'b_f': jnp.zeros((1, N_EMBD), jnp.float32),
        'wlm': normal(next(keys), (N_EMBD, VOCAB_SIZE)),
        'blm': jnp.zeros((1, VOCAB_SIZE), jnp.float32),
    }
    for _ in range(N_LAYER):
        params['blocks'].append({
            'g1': jnp.ones((1, N_EMBD), jnp.float32),
            'b1': jnp.zeros((1, N_EMBD), jnp.float32),
            'wk': normal(next(keys), (N_EMBD, N_EMBD)),
            'wq': normal(next(keys), (N_EMBD, N_EMBD)),
            'wv': normal(next(keys), (N_EMBD, N_EMBD)),
            'wproj': normal(next(keys), (N_EMBD, N_EMBD)),
            'bproj': jnp.zeros((1, N_EMBD), jnp.float32),
            'g2': jnp.ones((1, N_EMBD), jnp.float32),
            'b2': jnp.zeros((1, N_EMBD), jnp.float32),
            'w1': normal(next(keys), (N_EMBD, FF_DIM)),
            'fb1': jnp.zeros((1, FF_DIM), jnp.float32),
            'w2': normal(next(keys), (FF_DIM, N_EMBD)),
            'fb2': jnp.zeros((1, N_EMBD), jnp.float32),
        })
    return params


def minigpt_forward(idx, params, targets=None):
    B, T = idx.shape
    w96, w384, fslab = _prep_weights(params)
    idx_flat = idx.reshape(B * T, 1).astype(jnp.int32)

    logits_flat = pl.pallas_call(
        minigpt_kernel,
        out_shape=jax.ShapeDtypeStruct((B * T, VOCAB_PAD), jnp.float32),
        grid=(B,),
        in_specs=[
            pl.BlockSpec((T, 1), lambda b: (b, 0)),                       # per-sample token ids
            pl.BlockSpec((W96_ROWS, N_EMBD), lambda b: (0, 0)),           # bf16 weight slab (resident)
            pl.BlockSpec((W384_ROWS, FF_DIM), lambda b: (0, 0)),          # bf16 weight slab (resident)
            pl.BlockSpec((FSLAB_ROWS, FF_DIM), lambda b: (0, 0)),         # f32 param slab (resident)
        ],
        out_specs=pl.BlockSpec((T, VOCAB_PAD), lambda b: (b, 0)),
        compiler_params=pltpu.CompilerParams(
            dimension_semantics=("parallel",)),                           # both TCs on v7x
    )(idx_flat, w96, w384, fslab)

    logits = logits_flat[:, :VOCAB_SIZE].reshape(B, T, VOCAB_SIZE)
    loss = None                                   # targets=None path of the reference
    return logits, loss


if __name__ == "__main__":
    key = jax.random.PRNGKey(0)
    pkey, ikey = jax.random.split(key)
    params = init_params(pkey)

    B, T = 2, BLOCK_SIZE
    idx = jax.random.randint(ikey, (B, T), 0, VOCAB_SIZE, dtype=jnp.int32)

    forward = jax.jit(minigpt_forward)
    logits, loss = forward(idx, params)
    jax.block_until_ready(logits)
    assert logits.shape == (B, T, VOCAB_SIZE) and logits.dtype == jnp.float32
    print("KERNEL_OK")
</pallas_src>

<mosaic_0001>
module attributes {stable_mosaic.version = 11 : i64} {
  func.func @minigpt_kernel(%arg0: i32, %arg1: memref<32x1xi32, #tpu.memory_space<vmem>>, %arg2: memref<1536x96xbf16, #tpu.memory_space<vmem>>, %arg3: memref<288x384xbf16, #tpu.memory_space<vmem>>, %arg4: memref<128x384xf32, #tpu.memory_space<vmem>>, %arg5: memref<32x128xf32, #tpu.memory_space<vmem>>) attributes {dimension_semantics = [#tpu.dimension_semantics<parallel>], iteration_bounds = array<i64: 2>, scalar_prefetch = 0 : i64, scratch_operands = 0 : i64, tpu.core_type = #tpu.core_type<tc>, window_params = [{transform_indices = @transform_0, window_bounds = array<i64: 32, 1>}, {pipeline_mode = #tpu.pipeline_mode<synchronous>, transform_indices = @transform_1, window_bounds = array<i64: 1536, 96>}, {pipeline_mode = #tpu.pipeline_mode<synchronous>, transform_indices = @transform_2, window_bounds = array<i64: 288, 384>}, {pipeline_mode = #tpu.pipeline_mode<synchronous>, transform_indices = @transform_3, window_bounds = array<i64: 128, 384>}, {transform_indices = @transform_4, window_bounds = array<i64: 32, 128>}]} {
    %c0 = arith.constant 0 : index
    %c0_0 = arith.constant 0 : index
    %0 = vector.load %arg1[%c0, %c0_0] : memref<32x1xi32, #tpu.memory_space<vmem>>, vector<32x1xi32>
    %1 = tpu.iota {dimensions = array<i32: 1>} : vector<32x72xi32>
    %2 = vector.broadcast %0 : vector<32x1xi32> to vector<32x72xi32>
    %3 = arith.cmpi eq, %2, %1 : vector<32x72xi32>
    %4 = arith.extui %3 : vector<32x72xi1> to vector<32x72xi32>
    %5 = arith.sitofp %4 : vector<32x72xi32> to vector<32x72xf32>
    %c0_1 = arith.constant 0 : index
    %c0_2 = arith.constant 0 : index
    %6 = vector.load %arg4[%c0_1, %c0_2] : memref<128x384xf32, #tpu.memory_space<vmem>>, vector<72x96xf32>
    %c72 = arith.constant 72 : index
    %c0_3 = arith.constant 0 : index
    %7 = vector.load %arg4[%c72, %c0_3] : memref<128x384xf32, #tpu.memory_space<vmem>>, vector<32x96xf32>
    %cst = arith.constant dense<0.000000e+00> : vector<32x96xf32>
    %8 = tpu.matmul %5, %6, %cst {dimension_numbers = #tpu.dot_dimension_numbers<[1], [0], [0], [1], [0, 0, 1, 1], [], []>} : vector<32x72xf32>, vector<72x96xf32>, vector<32x96xf32> -> vector<32x96xf32>
    %9 = arith.addf %8, %7 : vector<32x96xf32>
    %10 = tpu.iota {dimensions = array<i32: 0>} : vector<32x32xi32>
    %11 = tpu.iota {dimensions = array<i32: 1>} : vector<32x32xi32>
    %12 = arith.cmpi sge, %10, %11 : vector<32x32xi32>
    %cst_4 = arith.constant 0.000000e+00 : f32
    %cst_5 = arith.constant -1.000000e+30 : f32
    %13 = vector.broadcast %cst_4 : f32 to vector<32x32xf32>
    %14 = vector.broadcast %cst_5 : f32 to vector<32x32xf32>
    %15 = arith.select %12, %13, %14 : vector<32x32xi1>, vector<32x32xf32>
    %c0_6 = arith.constant 0 : index
    %c0_7 = arith.constant 0 : index
    %16 = vector.load %arg2[%c0_6, %c0_7] : memref<1536x96xbf16, #tpu.memory_space<vmem>>, vector<96x96xbf16>
    %c96 = arith.constant 96 : index
    %c0_8 = arith.constant 0 : index
    %17 = vector.load %arg2[%c96, %c0_8] : memref<1536x96xbf16, #tpu.memory_space<vmem>>, vector<96x96xbf16>
    %c192 = arith.constant 192 : index
    %c0_9 = arith.constant 0 : index
    %18 = vector.load %arg2[%c192, %c0_9] : memref<1536x96xbf16, #tpu.memory_space<vmem>>, vector<96x96xbf16>
    %c288 = arith.constant 288 : index
    %c0_10 = arith.constant 0 : index
    %19 = vector.load %arg2[%c288, %c0_10] : memref<1536x96xbf16, #tpu.memory_space<vmem>>, vector<96x96xbf16>
    %c384 = arith.constant 384 : index
    %c0_11 = arith.constant 0 : index
    %20 = vector.load %arg2[%c384, %c0_11] : memref<1536x96xbf16, #tpu.memory_space<vmem>>, vector<384x96xbf16>
    %c0_12 = arith.constant 0 : index
    %c0_13 = arith.constant 0 : index
    %21 = vector.load %arg3[%c0_12, %c0_13] : memref<288x384xbf16, #tpu.memory_space<vmem>>, vector<96x384xbf16>
    %c104 = arith.constant 104 : index
    %c0_14 = arith.constant 0 : index
    %22 = vector.load %arg4[%c104, %c0_14] : memref<128x384xf32, #tpu.memory_space<vmem>>, vector<1x96xf32>
    %c105 = arith.constant 105 : index
    %c0_15 = arith.constant 0 : index
    %23 = vector.load %arg4[%c105, %c0_15] : memref<128x384xf32, #tpu.memory_space<vmem>>, vector<1x96xf32>
    %c106 = arith.constant 106 : index
    %c0_16 = arith.constant 0 : index
    %24 = vector.load %arg4[%c106, %c0_16] : memref<128x384xf32, #tpu.memory_space<vmem>>, vector<1x96xf32>
    %c107 = arith.constant 107 : index
    %c0_17 = arith.constant 0 : index
    %25 = vector.load %arg4[%c107, %c0_17] : memref<128x384xf32, #tpu.memory_space<vmem>>, vector<1x96xf32>
    %c108 = arith.constant 108 : index
    %c0_18 = arith.constant 0 : index
    %26 = vector.load %arg4[%c108, %c0_18] : memref<128x384xf32, #tpu.memory_space<vmem>>, vector<1x96xf32>
    %c109 = arith.constant 109 : index
    %c0_19 = arith.constant 0 : index
    %27 = vector.load %arg4[%c109, %c0_19] : memref<128x384xf32, #tpu.memory_space<vmem>>, vector<1x384xf32>
    %c110 = arith.constant 110 : index
    %c0_20 = arith.constant 0 : index
    %28 = vector.load %arg4[%c110, %c0_20] : memref<128x384xf32, #tpu.memory_space<vmem>>, vector<1x96xf32>
    %cst_21 = arith.constant dense<0.000000e+00> : vector<32xf32>
    %29 = vector.multi_reduction <add>, %9, %cst_21 [1] : vector<32x96xf32> to vector<32xf32>
    %30 = vector.shape_cast %29 : vector<32xf32> to vector<32x1xf32>
    %cst_22 = arith.constant 9.600000e+01 : f32
    %31 = vector.broadcast %cst_22 : f32 to vector<32x1xf32>
    %32 = arith.divf %30, %31 : vector<32x1xf32>
    %33 = vector.broadcast %32 : vector<32x1xf32> to vector<32x96xf32>
    %34 = arith.subf %9, %33 : vector<32x96xf32>
    %35 = arith.mulf %34, %34 : vector<32x96xf32>
    %cst_23 = arith.constant dense<0.000000e+00> : vector<32xf32>
    %36 = vector.multi_reduction <add>, %35, %cst_23 [1] : vector<32x96xf32> to vector<32xf32>
    %37 = vector.shape_cast %36 : vector<32xf32> to vector<32x1xf32>
    %cst_24 = arith.constant 9.600000e+01 : f32
    %38 = vector.broadcast %cst_24 : f32 to vector<32x1xf32>
    %39 = arith.divf %37, %38 : vector<32x1xf32>
    %40 = vector.broadcast %32 : vector<32x1xf32> to vector<32x96xf32>
    %41 = arith.subf %9, %40 : vector<32x96xf32>
    %cst_25 = arith.constant 9.99999974E-6 : f32
    %42 = vector.broadcast %cst_25 : f32 to vector<32x1xf32>
    %43 = arith.addf %39, %42 : vector<32x1xf32>
    %44 = math.rsqrt %43 : vector<32x1xf32>
    %45 = vector.broadcast %44 : vector<32x1xf32> to vector<32x96xf32>
    %46 = arith.mulf %41, %45 : vector<32x96xf32>
    %47 = vector.broadcast %22 : vector<1x96xf32> to vector<32x96xf32>
    %48 = arith.mulf %46, %47 : vector<32x96xf32>
    %49 = vector.broadcast %23 : vector<1x96xf32> to vector<32x96xf32>
    %50 = arith.addf %48, %49 : vector<32x96xf32>
    %51 = arith.truncf %50 : vector<32x96xf32> to vector<32x96xbf16>
    %cst_26 = arith.constant dense<0.000000e+00> : vector<32x96xf32>
    %52 = tpu.matmul %51, %16, %cst_26 {dimension_numbers = #tpu.dot_dimension_numbers<[1], [0], [0], [1], [0, 0, 1, 1], [], []>} : vector<32x96xbf16>, vector<96x96xbf16>, vector<32x96xf32> -> vector<32x96xf32>
    %53 = arith.truncf %52 : vector<32x96xf32> to vector<32x96xbf16>
    %cst_27 = arith.constant dense<0.000000e+00> : vector<32x96xf32>
    %54 = tpu.matmul %51, %17, %cst_27 {dimension_numbers = #tpu.dot_dimension_numbers<[1], [0], [0], [1], [0, 0, 1, 1], [], []>} : vector<32x96xbf16>, vector<96x96xbf16>, vector<32x96xf32> -> vector<32x96xf32>
    %55 = arith.truncf %54 : vector<32x96xf32> to vector<32x96xbf16>
    %cst_28 = arith.constant dense<0.000000e+00> : vector<32x96xf32>
    %56 = tpu.matmul %51, %18, %cst_28 {dimension_numbers = #tpu.dot_dimension_numbers<[1], [0], [0], [1], [0, 0, 1, 1], [], []>} : vector<32x96xbf16>, vector<96x96xbf16>, vector<32x96xf32> -> vector<32x96xf32>
    %57 = arith.truncf %56 : vector<32x96xf32> to vector<32x96xbf16>
    %58 = vector.extract_strided_slice %53 {offsets = [0, 0], sizes = [32, 16], strides = [1, 1]} : vector<32x96xbf16> to vector<32x16xbf16>
    %59 = vector.extract_strided_slice %55 {offsets = [0, 0], sizes = [32, 16], strides = [1, 1]} : vector<32x96xbf16> to vector<32x16xbf16>
    "tpu.trace_start"() <{level = 10 : i32, message = "id,jd->ij"}> : () -> ()
    %cst_29 = arith.constant dense<0.000000e+00> : vector<32x32xf32>
    %60 = tpu.matmul %58, %59, %cst_29 {dimension_numbers = #tpu.dot_dimension_numbers<[1], [1], [0], [0], [0, 0, 1, 0], [], []>} : vector<32x16xbf16>, vector<32x16xbf16>, vector<32x32xf32> -> vector<32x32xf32>
    "tpu.trace_stop"() : () -> ()
    %61 = arith.addf %60, %15 : vector<32x32xf32>
    %cst_30 = arith.constant dense<0xFF800000> : vector<32xf32>
    %62 = vector.multi_reduction <maximumf>, %61, %cst_30 [1] : vector<32x32xf32> to vector<32xf32>
    %63 = vector.shape_cast %62 : vector<32xf32> to vector<32x1xf32>
    %64 = vector.broadcast %63 : vector<32x1xf32> to vector<32x32xf32>
    %65 = arith.subf %61, %64 : vector<32x32xf32>
    %66 = math.exp %65 : vector<32x32xf32>
    %cst_31 = arith.constant dense<0.000000e+00> : vector<32xf32>
    %67 = vector.multi_reduction <add>, %66, %cst_31 [1] : vector<32x32xf32> to vector<32xf32>
    %68 = vector.shape_cast %67 : vector<32xf32> to vector<32x1xf32>
    %69 = tpu.reciprocal %68 {approx = true} : vector<32x1xf32> -> vector<32x1xf32>
    %70 = vector.broadcast %69 : vector<32x1xf32> to vector<32x32xf32>
    %71 = arith.mulf %66, %70 : vector<32x32xf32>
    %72 = arith.truncf %71 : vector<32x32xf32> to vector<32x32xbf16>
    %73 = vector.extract_strided_slice %57 {offsets = [0, 0], sizes = [32, 16], strides = [1, 1]} : vector<32x96xbf16> to vector<32x16xbf16>
    %cst_32 = arith.constant dense<0.000000e+00> : vector<32x16xf32>
    %74 = tpu.matmul %72, %73, %cst_32 {dimension_numbers = #tpu.dot_dimension_numbers<[1], [0], [0], [1], [0, 0, 1, 1], [], []>} : vector<32x32xbf16>, vector<32x16xbf16>, vector<32x16xf32> -> vector<32x16xf32>
    %75 = vector.extract_strided_slice %53 {offsets = [0, 16], sizes = [32, 16], strides = [1, 1]} : vector<32x96xbf16> to vector<32x16xbf16>
    %76 = vector.extract_strided_slice %55 {offsets = [0, 16], sizes = [32, 16], strides = [1, 1]} : vector<32x96xbf16> to vector<32x16xbf16>
    "tpu.trace_start"() <{level = 10 : i32, message = "id,jd->ij"}> : () -> ()
    %cst_33 = arith.constant dense<0.000000e+00> : vector<32x32xf32>
    %77 = tpu.matmul %75, %76, %cst_33 {dimension_numbers = #tpu.dot_dimension_numbers<[1], [1], [0], [0], [0, 0, 1, 0], [], []>} : vector<32x16xbf16>, vector<32x16xbf16>, vector<32x32xf32> -> vector<32x32xf32>
    "tpu.trace_stop"() : () -> ()
    %78 = arith.addf %77, %15 : vector<32x32xf32>
    %cst_34 = arith.constant dense<0xFF800000> : vector<32xf32>
    %79 = vector.multi_reduction <maximumf>, %78, %cst_34 [1] : vector<32x32xf32> to vector<32xf32>
    %80 = vector.shape_cast %79 : vector<32xf32> to vector<32x1xf32>
    %81 = vector.broadcast %80 : vector<32x1xf32> to vector<32x32xf32>
    %82 = arith.subf %78, %81 : vector<32x32xf32>
    %83 = math.exp %82 : vector<32x32xf32>
    %cst_35 = arith.constant dense<0.000000e+00> : vector<32xf32>
    %84 = vector.multi_reduction <add>, %83, %cst_35 [1] : vector<32x32xf32> to vector<32xf32>
    %85 = vector.shape_cast %84 : vector<32xf32> to vector<32x1xf32>
    %86 = tpu.reciprocal %85 {approx = true} : vector<32x1xf32> -> vector<32x1xf32>
    %87 = vector.broadcast %86 : vector<32x1xf32> to vector<32x32xf32>
    %88 = arith.mulf %83, %87 : vector<32x32xf32>
    %89 = arith.truncf %88 : vector<32x32xf32> to vector<32x32xbf16>
    %90 = vector.extract_strided_slice %57 {offsets = [0, 16], sizes = [32, 16], strides = [1, 1]} : vector<32x96xbf16> to vector<32x16xbf16>
    %cst_36 = arith.constant dense<0.000000e+00> : vector<32x16xf32>
    %91 = tpu.matmul %89, %90, %cst_36 {dimension_numbers = #tpu.dot_dimension_numbers<[1], [0], [0], [1], [0, 0, 1, 1], [], []>} : vector<32x32xbf16>, vector<32x16xbf16>, vector<32x16xf32> -> vector<32x16xf32>
    %92 = vector.extract_strided_slice %53 {offsets = [0, 32], sizes = [32, 16], strides = [1, 1]} : vector<32x96xbf16> to vector<32x16xbf16>
    %93 = vector.extract_strided_slice %55 {offsets = [0, 32], sizes = [32, 16], strides = [1, 1]} : vector<32x96xbf16> to vector<32x16xbf16>
    "tpu.trace_start"() <{level = 10 : i32, message = "id,jd->ij"}> : () -> ()
    %cst_37 = arith.constant dense<0.000000e+00> : vector<32x32xf32>
    %94 = tpu.matmul %92, %93, %cst_37 {dimension_numbers = #tpu.dot_dimension_numbers<[1], [1], [0], [0], [0, 0, 1, 0], [], []>} : vector<32x16xbf16>, vector<32x16xbf16>, vector<32x32xf32> -> vector<32x32xf32>
    "tpu.trace_stop"() : () -> ()
    %95 = arith.addf %94, %15 : vector<32x32xf32>
    %cst_38 = arith.constant dense<0xFF800000> : vector<32xf32>
    %96 = vector.multi_reduction <maximumf>, %95, %cst_38 [1] : vector<32x32xf32> to vector<32xf32>
    %97 = vector.shape_cast %96 : vector<32xf32> to vector<32x1xf32>
    %98 = vector.broadcast %97 : vector<32x1xf32> to vector<32x32xf32>
    %99 = arith.subf %95, %98 : vector<32x32xf32>
    %100 = math.exp %99 : vector<32x32xf32>
    %cst_39 = arith.constant dense<0.000000e+00> : vector<32xf32>
    %101 = vector.multi_reduction <add>, %100, %cst_39 [1] : vector<32x32xf32> to vector<32xf32>
    %102 = vector.shape_cast %101 : vector<32xf32> to vector<32x1xf32>
    %103 = tpu.reciprocal %102 {approx = true} : vector<32x1xf32> -> vector<32x1xf32>
    %104 = vector.broadcast %103 : vector<32x1xf32> to vector<32x32xf32>
    %105 = arith.mulf %100, %104 : vector<32x32xf32>
    %106 = arith.truncf %105 : vector<32x32xf32> to vector<32x32xbf16>
    %107 = vector.extract_strided_slice %57 {offsets = [0, 32], sizes = [32, 16], strides = [1, 1]} : vector<32x96xbf16> to vector<32x16xbf16>
    %cst_40 = arith.constant dense<0.000000e+00> : vector<32x16xf32>
    %108 = tpu.matmul %106, %107, %cst_40 {dimension_numbers = #tpu.dot_dimension_numbers<[1], [0], [0], [1], [0, 0, 1, 1], [], []>} : vector<32x32xbf16>, vector<32x16xbf16>, vector<32x16xf32> -> vector<32x16xf32>
    %109 = vector.extract_strided_slice %53 {offsets = [0, 48], sizes = [32, 16], strides = [1, 1]} : vector<32x96xbf16> to vector<32x16xbf16>
    %110 = vector.extract_strided_slice %55 {offsets = [0, 48], sizes = [32, 16], strides = [1, 1]} : vector<32x96xbf16> to vector<32x16xbf16>
    "tpu.trace_start"() <{level = 10 : i32, message = "id,jd->ij"}> : () -> ()
    %cst_41 = arith.constant dense<0.000000e+00> : vector<32x32xf32>
    %111 = tpu.matmul %109, %110, %cst_41 {dimension_numbers = #tpu.dot_dimension_numbers<[1], [1], [0], [0], [0, 0, 1, 0], [], []>} : vector<32x16xbf16>, vector<32x16xbf16>, vector<32x32xf32> -> vector<32x32xf32>
    "tpu.trace_stop"() : () -> ()
    %112 = arith.addf %111, %15 : vector<32x32xf32>
    %cst_42 = arith.constant dense<0xFF800000> : vector<32xf32>
    %113 = vector.multi_reduction <maximumf>, %112, %cst_42 [1] : vector<32x32xf32> to vector<32xf32>
    %114 = vector.shape_cast %113 : vector<32xf32> to vector<32x1xf32>
    %115 = vector.broadcast %114 : vector<32x1xf32> to vector<32x32xf32>
    %116 = arith.subf %112, %115 : vector<32x32xf32>
    %117 = math.exp %116 : vector<32x32xf32>
    %cst_43 = arith.constant dense<0.000000e+00> : vector<32xf32>
    %118 = vector.multi_reduction <add>, %117, %cst_43 [1] : vector<32x32xf32> to vector<32xf32>
    %119 = vector.shape_cast %118 : vector<32xf32> to vector<32x1xf32>
    %120 = tpu.reciprocal %119 {approx = true} : vector<32x1xf32> -> vector<32x1xf32>
    %121 = vector.broadcast %120 : vector<32x1xf32> to vector<32x32xf32>
    %122 = arith.mulf %117, %121 : vector<32x32xf32>
    %123 = arith.truncf %122 : vector<32x32xf32> to vector<32x32xbf16>
    %124 = vector.extract_strided_slice %57 {offsets = [0, 48], sizes = [32, 16], strides = [1, 1]} : vector<32x96xbf16> to vector<32x16xbf16>
    %cst_44 = arith.constant dense<0.000000e+00> : vector<32x16xf32>
    %125 = tpu.matmul %123, %124, %cst_44 {dimension_numbers = #tpu.dot_dimension_numbers<[1], [0], [0], [1], [0, 0, 1, 1], [], []>} : vector<32x32xbf16>, vector<32x16xbf16>, vector<32x16xf32> -> vector<32x16xf32>
    %126 = vector.extract_strided_slice %53 {offsets = [0, 64], sizes = [32, 16], strides = [1, 1]} : vector<32x96xbf16> to vector<32x16xbf16>
    %127 = vector.extract_strided_slice %55 {offsets = [0, 64], sizes = [32, 16], strides = [1, 1]} : vector<32x96xbf16> to vector<32x16xbf16>
    "tpu.trace_start"() <{level = 10 : i32, message = "id,jd->ij"}> : () -> ()
    %cst_45 = arith.constant dense<0.000000e+00> : vector<32x32xf32>
    %128 = tpu.matmul %126, %127, %cst_45 {dimension_numbers = #tpu.dot_dimension_numbers<[1], [1], [0], [0], [0, 0, 1, 0], [], []>} : vector<32x16xbf16>, vector<32x16xbf16>, vector<32x32xf32> -> vector<32x32xf32>
    "tpu.trace_stop"() : () -> ()
    %129 = arith.addf %128, %15 : vector<32x32xf32>
    %cst_46 = arith.constant dense<0xFF800000> : vector<32xf32>
    %130 = vector.multi_reduction <maximumf>, %129, %cst_46 [1] : vector<32x32xf32> to vector<32xf32>
    %131 = vector.shape_cast %130 : vector<32xf32> to vector<32x1xf32>
    %132 = vector.broadcast %131 : vector<32x1xf32> to vector<32x32xf32>
    %133 = arith.subf %129, %132 : vector<32x32xf32>
    %134 = math.exp %133 : vector<32x32xf32>
    %cst_47 = arith.constant dense<0.000000e+00> : vector<32xf32>
    %135 = vector.multi_reduction <add>, %134, %cst_47 [1] : vector<32x32xf32> to vector<32xf32>
    %136 = vector.shape_cast %135 : vector<32xf32> to vector<32x1xf32>
    %137 = tpu.reciprocal %136 {approx = true} : vector<32x1xf32> -> vector<32x1xf32>
    %138 = vector.broadcast %137 : vector<32x1xf32> to vector<32x32xf32>
    %139 = arith.mulf %134, %138 : vector<32x32xf32>
    %140 = arith.truncf %139 : vector<32x32xf32> to vector<32x32xbf16>
    %141 = vector.extract_strided_slice %57 {offsets = [0, 64], sizes = [32, 16], strides = [1, 1]} : vector<32x96xbf16> to vector<32x16xbf16>
    %cst_48 = arith.constant dense<0.000000e+00> : vector<32x16xf32>
    %142 = tpu.matmul %140, %141, %cst_48 {dimension_numbers = #tpu.dot_dimension_numbers<[1], [0], [0], [1], [0, 0, 1, 1], [], []>} : vector<32x32xbf16>, vector<32x16xbf16>, vector<32x16xf32> -> vector<32x16xf32>
    %143 = vector.extract_strided_slice %53 {offsets = [0, 80], sizes = [32, 16], strides = [1, 1]} : vector<32x96xbf16> to vector<32x16xbf16>
    %144 = vector.extract_strided_slice %55 {offsets = [0, 80], sizes = [32, 16], strides = [1, 1]} : vector<32x96xbf16> to vector<32x16xbf16>
    "tpu.trace_start"() <{level = 10 : i32, message = "id,jd->ij"}> : () -> ()
    %cst_49 = arith.constant dense<0.000000e+00> : vector<32x32xf32>
    %145 = tpu.matmul %143, %144, %cst_49 {dimension_numbers = #tpu.dot_dimension_numbers<[1], [1], [0], [0], [0, 0, 1, 0], [], []>} : vector<32x16xbf16>, vector<32x16xbf16>, vector<32x32xf32> -> vector<32x32xf32>
    "tpu.trace_stop"() : () -> ()
    %146 = arith.addf %145, %15 : vector<32x32xf32>
    %cst_50 = arith.constant dense<0xFF800000> : vector<32xf32>
    %147 = vector.multi_reduction <maximumf>, %146, %cst_50 [1] : vector<32x32xf32> to vector<32xf32>
    %148 = vector.shape_cast %147 : vector<32xf32> to vector<32x1xf32>
    %149 = vector.broadcast %148 : vector<32x1xf32> to vector<32x32xf32>
    %150 = arith.subf %146, %149 : vector<32x32xf32>
    %151 = math.exp %150 : vector<32x32xf32>
    %cst_51 = arith.constant dense<0.000000e+00> : vector<32xf32>
    %152 = vector.multi_reduction <add>, %151, %cst_51 [1] : vector<32x32xf32> to vector<32xf32>
    %153 = vector.shape_cast %152 : vector<32xf32> to vector<32x1xf32>
    %154 = tpu.reciprocal %153 {approx = true} : vector<32x1xf32> -> vector<32x1xf32>
    %155 = vector.broadcast %154 : vector<32x1xf32> to vector<32x32xf32>
    %156 = arith.mulf %151, %155 : vector<32x32xf32>
    %157 = arith.truncf %156 : vector<32x32xf32> to vector<32x32xbf16>
    %158 = vector.extract_strided_slice %57 {offsets = [0, 80], sizes = [32, 16], strides = [1, 1]} : vector<32x96xbf16> to vector<32x16xbf16>
    %cst_52 = arith.constant dense<0.000000e+00> : vector<32x16xf32>
    %159 = tpu.matmul %157, %158, %cst_52 {dimension_numbers = #tpu.dot_dimension_numbers<[1], [0], [0], [1], [0, 0, 1, 1], [], []>} : vector<32x32xbf16>, vector<32x16xbf16>, vector<32x16xf32> -> vector<32x16xf32>
    %160 = tpu.concatenate %74, %91, %108, %125, %142, %159 in 1 : vector<32x16xf32>, vector<32x16xf32>, vector<32x16xf32>, vector<32x16xf32>, vector<32x16xf32>, vector<32x16xf32> -> vector<32x96xf32>
    %161 = arith.truncf %160 : vector<32x96xf32> to vector<32x96xbf16>
    %cst_53 = arith.constant dense<0.000000e+00> : vector<32x96xf32>
    %162 = tpu.matmul %161, %19, %cst_53 {dimension_numbers = #tpu.dot_dimension_numbers<[1], [0], [0], [1], [0, 0, 1, 1], [], []>} : vector<32x96xbf16>, vector<96x96xbf16>, vector<32x96xf32> -> vector<32x96xf32>
    %163 = arith.addf %9, %162 : vector<32x96xf32>
    %164 = vector.broadcast %24 : vector<1x96xf32> to vector<32x96xf32>
    %165 = arith.addf %163, %164 : vector<32x96xf32>
    %cst_54 = arith.constant dense<0.000000e+00> : vector<32xf32>
    %166 = vector.multi_reduction <add>, %165, %cst_54 [1] : vector<32x96xf32> to vector<32xf32>
    %167 = vector.shape_cast %166 : vector<32xf32> to vector<32x1xf32>
    %cst_55 = arith.constant 9.600000e+01 : f32
    %168 = vector.broadcast %cst_55 : f32 to vector<32x1xf32>
    %169 = arith.divf %167, %168 : vector<32x1xf32>
    %170 = vector.broadcast %169 : vector<32x1xf32> to vector<32x96xf32>
    %171 = arith.subf %165, %170 : vector<32x96xf32>
    %172 = arith.mulf %171, %171 : vector<32x96xf32>
    %cst_56 = arith.constant dense<0.000000e+00> : vector<32xf32>
    %173 = vector.multi_reduction <add>, %172, %cst_56 [1] : vector<32x96xf32> to vector<32xf32>
    %174 = vector.shape_cast %173 : vector<32xf32> to vector<32x1xf32>
    %cst_57 = arith.constant 9.600000e+01 : f32
    %175 = vector.broadcast %cst_57 : f32 to vector<32x1xf32>
    %176 = arith.divf %174, %175 : vector<32x1xf32>
    %177 = vector.broadcast %169 : vector<32x1xf32> to vector<32x96xf32>
    %178 = arith.subf %165, %177 : vector<32x96xf32>
    %cst_58 = arith.constant 9.99999974E-6 : f32
    %179 = vector.broadcast %cst_58 : f32 to vector<32x1xf32>
    %180 = arith.addf %176, %179 : vector<32x1xf32>
    %181 = math.rsqrt %180 : vector<32x1xf32>
    %182 = vector.broadcast %181 : vector<32x1xf32> to vector<32x96xf32>
    %183 = arith.mulf %178, %182 : vector<32x96xf32>
    %184 = vector.broadcast %25 : vector<1x96xf32> to vector<32x96xf32>
    %185 = arith.mulf %183, %184 : vector<32x96xf32>
    %186 = vector.broadcast %26 : vector<1x96xf32> to vector<32x96xf32>
    %187 = arith.addf %185, %186 : vector<32x96xf32>
    %188 = arith.truncf %187 : vector<32x96xf32> to vector<32x96xbf16>
    %cst_59 = arith.constant dense<0.000000e+00> : vector<32x384xf32>
    %189 = tpu.matmul %188, %21, %cst_59 {dimension_numbers = #tpu.dot_dimension_numbers<[1], [0], [0], [1], [0, 0, 1, 1], [], []>} : vector<32x96xbf16>, vector<96x384xbf16>, vector<32x384xf32> -> vector<32x384xf32>
    %190 = vector.broadcast %27 : vector<1x384xf32> to vector<32x384xf32>
    %191 = arith.addf %189, %190 : vector<32x384xf32>
    %cst_60 = arith.constant 0.000000e+00 : f32
    %192 = vector.broadcast %cst_60 : f32 to vector<32x384xf32>
    %193 = arith.maximumf %191, %192 : vector<32x384xf32>
    %194 = arith.truncf %193 : vector<32x384xf32> to vector<32x384xbf16>
    %cst_61 = arith.constant dense<0.000000e+00> : vector<32x96xf32>
    %195 = tpu.matmul %194, %20, %cst_61 {dimension_numbers = #tpu.dot_dimension_numbers<[1], [0], [0], [1], [0, 0, 1, 1], [], []>} : vector<32x384xbf16>, vector<384x96xbf16>, vector<32x96xf32> -> vector<32x96xf32>
    %196 = vector.broadcast %28 : vector<1x96xf32> to vector<32x96xf32>
    %197 = arith.addf %195, %196 : vector<32x96xf32>
    %198 = arith.addf %165, %197 : vector<32x96xf32>
    %c768 = arith.constant 768 : index
    %c0_62 = arith.constant 0 : index
    %199 = vector.load %arg2[%c768, %c0_62] : memref<1536x96xbf16, #tpu.memory_space<vmem>>, vector<96x96xbf16>
    %c864 = arith.constant 864 : index
    %c0_63 = arith.constant 0 : index
    %200 = vector.load %arg2[%c864, %c0_63] : memref<1536x96xbf16, #tpu.memory_space<vmem>>, vector<96x96xbf16>
    %c960 = arith.constant 960 : index
    %c0_64 = arith.constant 0 : index
    %201 = vector.load %arg2[%c960, %c0_64] : memref<1536x96xbf16, #tpu.memory_space<vmem>>, vector<96x96xbf16>
    %c1056 = arith.constant 1056 : index
    %c0_65 = arith.constant 0 : index
    %202 = vector.load %arg2[%c1056, %c0_65] : memref<1536x96xbf16, #tpu.memory_space<vmem>>, vector<96x96xbf16>
    %c1152 = arith.constant 1152 : index
    %c0_66 = arith.constant 0 : index
    %203 = vector.load %arg2[%c1152, %c0_66] : memref<1536x96xbf16, #tpu.memory_space<vmem>>, vector<384x96xbf16>
    %c96_67 = arith.constant 96 : index
    %c0_68 = arith.constant 0 : index
    %204 = vector.load %arg3[%c96_67, %c0_68] : memref<288x384xbf16, #tpu.memory_space<vmem>>, vector<96x384xbf16>
    %c112 = arith.constant 112 : index
    %c0_69 = arith.constant 0 : index
    %205 = vector.load %arg4[%c112, %c0_69] : memref<128x384xf32, #tpu.memory_space<vmem>>, vector<1x96xf32>
    %c113 = arith.constant 113 : index
    %c0_70 = arith.constant 0 : index
    %206 = vector.load %arg4[%c113, %c0_70] : memref<128x384xf32, #tpu.memory_space<vmem>>, vector<1x96xf32>
    %c114 = arith.constant 114 : index
    %c0_71 = arith.constant 0 : index
    %207 = vector.load %arg4[%c114, %c0_71] : memref<128x384xf32, #tpu.memory_space<vmem>>, vector<1x96xf32>
    %c115 = arith.constant 115 : index
    %c0_72 = arith.constant 0 : index
    %208 = vector.load %arg4[%c115, %c0_72] : memref<128x384xf32, #tpu.memory_space<vmem>>, vector<1x96xf32>
    %c116 = arith.constant 116 : index
    %c0_73 = arith.constant 0 : index
    %209 = vector.load %arg4[%c116, %c0_73] : memref<128x384xf32, #tpu.memory_space<vmem>>, vector<1x96xf32>
    %c117 = arith.constant 117 : index
    %c0_74 = arith.constant 0 : index
    %210 = vector.load %arg4[%c117, %c0_74] : memref<128x384xf32, #tpu.memory_space<vmem>>, vector<1x384xf32>
    %c118 = arith.constant 118 : index
    %c0_75 = arith.constant 0 : index
    %211 = vector.load %arg4[%c118, %c0_75] : memref<128x384xf32, #tpu.memory_space<vmem>>, vector<1x96xf32>
    %cst_76 = arith.constant dense<0.000000e+00> : vector<32xf32>
    %212 = vector.multi_reduction <add>, %198, %cst_76 [1] : vector<32x96xf32> to vector<32xf32>
    %213 = vector.shape_cast %212 : vector<32xf32> to vector<32x1xf32>
    %cst_77 = arith.constant 9.600000e+01 : f32
    %214 = vector.broadcast %cst_77 : f32 to vector<32x1xf32>
    %215 = arith.divf %213, %214 : vector<32x1xf32>
    %216 = vector.broadcast %215 : vector<32x1xf32> to vector<32x96xf32>
    %217 = arith.subf %198, %216 : vector<32x96xf32>
    %218 = arith.mulf %217, %217 : vector<32x96xf32>
    %cst_78 = arith.constant dense<0.000000e+00> : vector<32xf32>
    %219 = vector.multi_reduction <add>, %218, %cst_78 [1] : vector<32x96xf32> to vector<32xf32>
    %220 = vector.shape_cast %219 : vector<32xf32> to vector<32x1xf32>
    %cst_79 = arith.constant 9.600000e+01 : f32
    %221 = vector.broadcast %cst_79 : f32 to vector<32x1xf32>
    %222 = arith.divf %220, %221 : vector<32x1xf32>
    %223 = vector.broadcast %215 : vector<32x1xf32> to vector<32x96xf32>
    %224 = arith.subf %198, %223 : vector<32x96xf32>
    %cst_80 = arith.constant 9.99999974E-6 : f32
    %225 = vector.broadcast %cst_80 : f32 to vector<32x1xf32>
    %226 = arith.addf %222, %225 : vector<32x1xf32>
    %227 = math.rsqrt %226 : vector<32x1xf32>
    %228 = vector.broadcast %227 : vector<32x1xf32> to vector<32x96xf32>
    %229 = arith.mulf %224, %228 : vector<32x96xf32>
    %230 = vector.broadcast %205 : vector<1x96xf32> to vector<32x96xf32>
    %231 = arith.mulf %229, %230 : vector<32x96xf32>
    %232 = vector.broadcast %206 : vector<1x96xf32> to vector<32x96xf32>
    %233 = arith.addf %231, %232 : vector<32x96xf32>
    %234 = arith.truncf %233 : vector<32x96xf32> to vector<32x96xbf16>
    %cst_81 = arith.constant dense<0.000000e+00> : vector<32x96xf32>
    %235 = tpu.matmul %234, %199, %cst_81 {dimension_numbers = #tpu.dot_dimension_numbers<[1], [0], [0], [1], [0, 0, 1, 1], [], []>} : vector<32x96xbf16>, vector<96x96xbf16>, vector<32x96xf32> -> vector<32x96xf32>
    %236 = arith.truncf %235 : vector<32x96xf32> to vector<32x96xbf16>
    %cst_82 = arith.constant dense<0.000000e+00> : vector<32x96xf32>
    %237 = tpu.matmul %234, %200, %cst_82 {dimension_numbers = #tpu.dot_dimension_numbers<[1], [0], [0], [1], [0, 0, 1, 1], [], []>} : vector<32x96xbf16>, vector<96x96xbf16>, vector<32x96xf32> -> vector<32x96xf32>
    %238 = arith.truncf %237 : vector<32x96xf32> to vector<32x96xbf16>
    %cst_83 = arith.constant dense<0.000000e+00> : vector<32x96xf32>
    %239 = tpu.matmul %234, %201, %cst_83 {dimension_numbers = #tpu.dot_dimension_numbers<[1], [0], [0], [1], [0, 0, 1, 1], [], []>} : vector<32x96xbf16>, vector<96x96xbf16>, vector<32x96xf32> -> vector<32x96xf32>
    %240 = arith.truncf %239 : vector<32x96xf32> to vector<32x96xbf16>
    %241 = vector.extract_strided_slice %236 {offsets = [0, 0], sizes = [32, 16], strides = [1, 1]} : vector<32x96xbf16> to vector<32x16xbf16>
    %242 = vector.extract_strided_slice %238 {offsets = [0, 0], sizes = [32, 16], strides = [1, 1]} : vector<32x96xbf16> to vector<32x16xbf16>
    "tpu.trace_start"() <{level = 10 : i32, message = "id,jd->ij"}> : () -> ()
    %cst_84 = arith.constant dense<0.000000e+00> : vector<32x32xf32>
    %243 = tpu.matmul %241, %242, %cst_84 {dimension_numbers = #tpu.dot_dimension_numbers<[1], [1], [0], [0], [0, 0, 1, 0], [], []>} : vector<32x16xbf16>, vector<32x16xbf16>, vector<32x32xf32> -> vector<32x32xf32>
    "tpu.trace_stop"() : () -> ()
    %244 = arith.addf %243, %15 : vector<32x32xf32>
    %cst_85 = arith.constant dense<0xFF800000> : vector<32xf32>
    %245 = vector.multi_reduction <maximumf>, %244, %cst_85 [1] : vector<32x32xf32> to vector<32xf32>
    %246 = vector.shape_cast %245 : vector<32xf32> to vector<32x1xf32>
    %247 = vector.broadcast %246 : vector<32x1xf32> to vector<32x32xf32>
    %248 = arith.subf %244, %247 : vector<32x32xf32>
    %249 = math.exp %248 : vector<32x32xf32>
    %cst_86 = arith.constant dense<0.000000e+00> : vector<32xf32>
    %250 = vector.multi_reduction <add>, %249, %cst_86 [1] : vector<32x32xf32> to vector<32xf32>
    %251 = vector.shape_cast %250 : vector<32xf32> to vector<32x1xf32>
    %252 = tpu.reciprocal %251 {approx = true} : vector<32x1xf32> -> vector<32x1xf32>
    %253 = vector.broadcast %252 : vector<32x1xf32> to vector<32x32xf32>
    %254 = arith.mulf %249, %253 : vector<32x32xf32>
    %255 = arith.truncf %254 : vector<32x32xf32> to vector<32x32xbf16>
    %256 = vector.extract_strided_slice %240 {offsets = [0, 0], sizes = [32, 16], strides = [1, 1]} : vector<32x96xbf16> to vector<32x16xbf16>
    %cst_87 = arith.constant dense<0.000000e+00> : vector<32x16xf32>
    %257 = tpu.matmul %255, %256, %cst_87 {dimension_numbers = #tpu.dot_dimension_numbers<[1], [0], [0], [1], [0, 0, 1, 1], [], []>} : vector<32x32xbf16>, vector<32x16xbf16>, vector<32x16xf32> -> vector<32x16xf32>
    %258 = vector.extract_strided_slice %236 {offsets = [0, 16], sizes = [32, 16], strides = [1, 1]} : vector<32x96xbf16> to vector<32x16xbf16>
    %259 = vector.extract_strided_slice %238 {offsets = [0, 16], sizes = [32, 16], strides = [1, 1]} : vector<32x96xbf16> to vector<32x16xbf16>
    "tpu.trace_start"() <{level = 10 : i32, message = "id,jd->ij"}> : () -> ()
    %cst_88 = arith.constant dense<0.000000e+00> : vector<32x32xf32>
    %260 = tpu.matmul %258, %259, %cst_88 {dimension_numbers = #tpu.dot_dimension_numbers<[1], [1], [0], [0], [0, 0, 1, 0], [], []>} : vector<32x16xbf16>, vector<32x16xbf16>, vector<32x32xf32> -> vector<32x32xf32>
    "tpu.trace_stop"() : () -> ()
    %261 = arith.addf %260, %15 : vector<32x32xf32>
    %cst_89 = arith.constant dense<0xFF800000> : vector<32xf32>
    %262 = vector.multi_reduction <maximumf>, %261, %cst_89 [1] : vector<32x32xf32> to vector<32xf32>
    %263 = vector.shape_cast %262 : vector<32xf32> to vector<32x1xf32>
    %264 = vector.broadcast %263 : vector<32x1xf32> to vector<32x32xf32>
    %265 = arith.subf %261, %264 : vector<32x32xf32>
    %266 = math.exp %265 : vector<32x32xf32>
    %cst_90 = arith.constant dense<0.000000e+00> : vector<32xf32>
    %267 = vector.multi_reduction <add>, %266, %cst_90 [1] : vector<32x32xf32> to vector<32xf32>
    %268 = vector.shape_cast %267 : vector<32xf32> to vector<32x1xf32>
    %269 = tpu.reciprocal %268 {approx = true} : vector<32x1xf32> -> vector<32x1xf32>
    %270 = vector.broadcast %269 : vector<32x1xf32> to vector<32x32xf32>
    %271 = arith.mulf %266, %270 : vector<32x32xf32>
    %272 = arith.truncf %271 : vector<32x32xf32> to vector<32x32xbf16>
    %273 = vector.extract_strided_slice %240 {offsets = [0, 16], sizes = [32, 16], strides = [1, 1]} : vector<32x96xbf16> to vector<32x16xbf16>
    %cst_91 = arith.constant dense<0.000000e+00> : vector<32x16xf32>
    %274 = tpu.matmul %272, %273, %cst_91 {dimension_numbers = #tpu.dot_dimension_numbers<[1], [0], [0], [1], [0, 0, 1, 1], [], []>} : vector<32x32xbf16>, vector<32x16xbf16>, vector<32x16xf32> -> vector<32x16xf32>
    %275 = vector.extract_strided_slice %236 {offsets = [0, 32], sizes = [32, 16], strides = [1, 1]} : vector<32x96xbf16> to vector<32x16xbf16>
    %276 = vector.extract_strided_slice %238 {offsets = [0, 32], sizes = [32, 16], strides = [1, 1]} : vector<32x96xbf16> to vector<32x16xbf16>
    "tpu.trace_start"() <{level = 10 : i32, message = "id,jd->ij"}> : () -> ()
    %cst_92 = arith.constant dense<0.000000e+00> : vector<32x32xf32>
    %277 = tpu.matmul %275, %276, %cst_92 {dimension_numbers = #tpu.dot_dimension_numbers<[1], [1], [0], [0], [0, 0, 1, 0], [], []>} : vector<32x16xbf16>, vector<32x16xbf16>, vector<32x32xf32> -> vector<32x32xf32>
    "tpu.trace_stop"() : () -> ()
    %278 = arith.addf %277, %15 : vector<32x32xf32>
    %cst_93 = arith.constant dense<0xFF800000> : vector<32xf32>
    %279 = vector.multi_reduction <maximumf>, %278, %cst_93 [1] : vector<32x32xf32> to vector<32xf32>
    %280 = vector.shape_cast %279 : vector<32xf32> to vector<32x1xf32>
    %281 = vector.broadcast %280 : vector<32x1xf32> to vector<32x32xf32>
    %282 = arith.subf %278, %281 : vector<32x32xf32>
    %283 = math.exp %282 : vector<32x32xf32>
    %cst_94 = arith.constant dense<0.000000e+00> : vector<32xf32>
    %284 = vector.multi_reduction <add>, %283, %cst_94 [1] : vector<32x32xf32> to vector<32xf32>
    %285 = vector.shape_cast %284 : vector<32xf32> to vector<32x1xf32>
    %286 = tpu.reciprocal %285 {approx = true} : vector<32x1xf32> -> vector<32x1xf32>
    %287 = vector.broadcast %286 : vector<32x1xf32> to vector<32x32xf32>
    %288 = arith.mulf %283, %287 : vector<32x32xf32>
    %289 = arith.truncf %288 : vector<32x32xf32> to vector<32x32xbf16>
    %290 = vector.extract_strided_slice %240 {offsets = [0, 32], sizes = [32, 16], strides = [1, 1]} : vector<32x96xbf16> to vector<32x16xbf16>
    %cst_95 = arith.constant dense<0.000000e+00> : vector<32x16xf32>
    %291 = tpu.matmul %289, %290, %cst_95 {dimension_numbers = #tpu.dot_dimension_numbers<[1], [0], [0], [1], [0, 0, 1, 1], [], []>} : vector<32x32xbf16>, vector<32x16xbf16>, vector<32x16xf32> -> vector<32x16xf32>
    %292 = vector.extract_strided_slice %236 {offsets = [0, 48], sizes = [32, 16], strides = [1, 1]} : vector<32x96xbf16> to vector<32x16xbf16>
    %293 = vector.extract_strided_slice %238 {offsets = [0, 48], sizes = [32, 16], strides = [1, 1]} : vector<32x96xbf16> to vector<32x16xbf16>
    "tpu.trace_start"() <{level = 10 : i32, message = "id,jd->ij"}> : () -> ()
    %cst_96 = arith.constant dense<0.000000e+00> : vector<32x32xf32>
    %294 = tpu.matmul %292, %293, %cst_96 {dimension_numbers = #tpu.dot_dimension_numbers<[1], [1], [0], [0], [0, 0, 1, 0], [], []>} : vector<32x16xbf16>, vector<32x16xbf16>, vector<32x32xf32> -> vector<32x32xf32>
    "tpu.trace_stop"() : () -> ()
    %295 = arith.addf %294, %15 : vector<32x32xf32>
    %cst_97 = arith.constant dense<0xFF800000> : vector<32xf32>
    %296 = vector.multi_reduction <maximumf>, %295, %cst_97 [1] : vector<32x32xf32> to vector<32xf32>
    %297 = vector.shape_cast %296 : vector<32xf32> to vector<32x1xf32>
    %298 = vector.broadcast %297 : vector<32x1xf32> to vector<32x32xf32>
    %299 = arith.subf %295, %298 : vector<32x32xf32>
    %300 = math.exp %299 : vector<32x32xf32>
    %cst_98 = arith.constant dense<0.000000e+00> : vector<32xf32>
    %301 = vector.multi_reduction <add>, %300, %cst_98 [1] : vector<32x32xf32> to vector<32xf32>
    %302 = vector.shape_cast %301 : vector<32xf32> to vector<32x1xf32>
    %303 = tpu.reciprocal %302 {approx = true} : vector<32x1xf32> -> vector<32x1xf32>
    %304 = vector.broadcast %303 : vector<32x1xf32> to vector<32x32xf32>
    %305 = arith.mulf %300, %304 : vector<32x32xf32>
    %306 = arith.truncf %305 : vector<32x32xf32> to vector<32x32xbf16>
    %307 = vector.extract_strided_slice %240 {offsets = [0, 48], sizes = [32, 16], strides = [1, 1]} : vector<32x96xbf16> to vector<32x16xbf16>
    %cst_99 = arith.constant dense<0.000000e+00> : vector<32x16xf32>
    %308 = tpu.matmul %306, %307, %cst_99 {dimension_numbers = #tpu.dot_dimension_numbers<[1], [0], [0], [1], [0, 0, 1, 1], [], []>} : vector<32x32xbf16>, vector<32x16xbf16>, vector<32x16xf32> -> vector<32x16xf32>
    %309 = vector.extract_strided_slice %236 {offsets = [0, 64], sizes = [32, 16], strides = [1, 1]} : vector<32x96xbf16> to vector<32x16xbf16>
    %310 = vector.extract_strided_slice %238 {offsets = [0, 64], sizes = [32, 16], strides = [1, 1]} : vector<32x96xbf16> to vector<32x16xbf16>
    "tpu.trace_start"() <{level = 10 : i32, message = "id,jd->ij"}> : () -> ()
    %cst_100 = arith.constant dense<0.000000e+00> : vector<32x32xf32>
    %311 = tpu.matmul %309, %310, %cst_100 {dimension_numbers = #tpu.dot_dimension_numbers<[1], [1], [0], [0], [0, 0, 1, 0], [], []>} : vector<32x16xbf16>, vector<32x16xbf16>, vector<32x32xf32> -> vector<32x32xf32>
    "tpu.trace_stop"() : () -> ()
    %312 = arith.addf %311, %15 : vector<32x32xf32>
    %cst_101 = arith.constant dense<0xFF800000> : vector<32xf32>
    %313 = vector.multi_reduction <maximumf>, %312, %cst_101 [1] : vector<32x32xf32> to vector<32xf32>
    %314 = vector.shape_cast %313 : vector<32xf32> to vector<32x1xf32>
    %315 = vector.broadcast %314 : vector<32x1xf32> to vector<32x32xf32>
    %316 = arith.subf %312, %315 : vector<32x32xf32>
    %317 = math.exp %316 : vector<32x32xf32>
    %cst_102 = arith.constant dense<0.000000e+00> : vector<32xf32>
    %318 = vector.multi_reduction <add>, %317, %cst_102 [1] : vector<32x32xf32> to vector<32xf32>
    %319 = vector.shape_cast %318 : vector<32xf32> to vector<32x1xf32>
    %320 = tpu.reciprocal %319 {approx = true} : vector<32x1xf32> -> vector<32x1xf32>
    %321 = vector.broadcast %320 : vector<32x1xf32> to vector<32x32xf32>
    %322 = arith.mulf %317, %321 : vector<32x32xf32>
    %323 = arith.truncf %322 : vector<32x32xf32> to vector<32x32xbf16>
    %324 = vector.extract_strided_slice %240 {offsets = [0, 64], sizes = [32, 16], strides = [1, 1]} : vector<32x96xbf16> to vector<32x16xbf16>
    %cst_103 = arith.constant dense<0.000000e+00> : vector<32x16xf32>
    %325 = tpu.matmul %323, %324, %cst_103 {dimension_numbers = #tpu.dot_dimension_numbers<[1], [0], [0], [1], [0, 0, 1, 1], [], []>} : vector<32x32xbf16>, vector<32x16xbf16>, vector<32x16xf32> -> vector<32x16xf32>
    %326 = vector.extract_strided_slice %236 {offsets = [0, 80], sizes = [32, 16], strides = [1, 1]} : vector<32x96xbf16> to vector<32x16xbf16>
    %327 = vector.extract_strided_slice %238 {offsets = [0, 80], sizes = [32, 16], strides = [1, 1]} : vector<32x96xbf16> to vector<32x16xbf16>
    "tpu.trace_start"() <{level = 10 : i32, message = "id,jd->ij"}> : () -> ()
    %cst_104 = arith.constant dense<0.000000e+00> : vector<32x32xf32>
    %328 = tpu.matmul %326, %327, %cst_104 {dimension_numbers = #tpu.dot_dimension_numbers<[1], [1], [0], [0], [0, 0, 1, 0], [], []>} : vector<32x16xbf16>, vector<32x16xbf16>, vector<32x32xf32> -> vector<32x32xf32>
    "tpu.trace_stop"() : () -> ()
    %329 = arith.addf %328, %15 : vector<32x32xf32>
    %cst_105 = arith.constant dense<0xFF800000> : vector<32xf32>
    %330 = vector.multi_reduction <maximumf>, %329, %cst_105 [1] : vector<32x32xf32> to vector<32xf32>
    %331 = vector.shape_cast %330 : vector<32xf32> to vector<32x1xf32>
    %332 = vector.broadcast %331 : vector<32x1xf32> to vector<32x32xf32>
    %333 = arith.subf %329, %332 : vector<32x32xf32>
    %334 = math.exp %333 : vector<32x32xf32>
    %cst_106 = arith.constant dense<0.000000e+00> : vector<32xf32>
    %335 = vector.multi_reduction <add>, %334, %cst_106 [1] : vector<32x32xf32> to vector<32xf32>
    %336 = vector.shape_cast %335 : vector<32xf32> to vector<32x1xf32>
    %337 = tpu.reciprocal %336 {approx = true} : vector<32x1xf32> -> vector<32x1xf32>
    %338 = vector.broadcast %337 : vector<32x1xf32> to vector<32x32xf32>
    %339 = arith.mulf %334, %338 : vector<32x32xf32>
    %340 = arith.truncf %339 : vector<32x32xf32> to vector<32x32xbf16>
    %341 = vector.extract_strided_slice %240 {offsets = [0, 80], sizes = [32, 16], strides = [1, 1]} : vector<32x96xbf16> to vector<32x16xbf16>
    %cst_107 = arith.constant dense<0.000000e+00> : vector<32x16xf32>
    %342 = tpu.matmul %340, %341, %cst_107 {dimension_numbers = #tpu.dot_dimension_numbers<[1], [0], [0], [1], [0, 0, 1, 1], [], []>} : vector<32x32xbf16>, vector<32x16xbf16>, vector<32x16xf32> -> vector<32x16xf32>
    %343 = tpu.concatenate %257, %274, %291, %308, %325, %342 in 1 : vector<32x16xf32>, vector<32x16xf32>, vector<32x16xf32>, vector<32x16xf32>, vector<32x16xf32>, vector<32x16xf32> -> vector<32x96xf32>
    %344 = arith.truncf %343 : vector<32x96xf32> to vector<32x96xbf16>
    %cst_108 = arith.constant dense<0.000000e+00> : vector<32x96xf32>
    %345 = tpu.matmul %344, %202, %cst_108 {dimension_numbers = #tpu.dot_dimension_numbers<[1], [0], [0], [1], [0, 0, 1, 1], [], []>} : vector<32x96xbf16>, vector<96x96xbf16>, vector<32x96xf32> -> vector<32x96xf32>
    %346 = arith.addf %198, %345 : vector<32x96xf32>
    %347 = vector.broadcast %207 : vector<1x96xf32> to vector<32x96xf32>
    %348 = arith.addf %346, %347 : vector<32x96xf32>
    %cst_109 = arith.constant dense<0.000000e+00> : vector<32xf32>
    %349 = vector.multi_reduction <add>, %348, %cst_109 [1] : vector<32x96xf32> to vector<32xf32>
    %350 = vector.shape_cast %349 : vector<32xf32> to vector<32x1xf32>
    %cst_110 = arith.constant 9.600000e+01 : f32
    %351 = vector.broadcast %cst_110 : f32 to vector<32x1xf32>
    %352 = arith.divf %350, %351 : vector<32x1xf32>
    %353 = vector.broadcast %352 : vector<32x1xf32> to vector<32x96xf32>
    %354 = arith.subf %348, %353 : vector<32x96xf32>
    %355 = arith.mulf %354, %354 : vector<32x96xf32>
    %cst_111 = arith.constant dense<0.000000e+00> : vector<32xf32>
    %356 = vector.multi_reduction <add>, %355, %cst_111 [1] : vector<32x96xf32> to vector<32xf32>
    %357 = vector.shape_cast %356 : vector<32xf32> to vector<32x1xf32>
    %cst_112 = arith.constant 9.600000e+01 : f32
    %358 = vector.broadcast %cst_112 : f32 to vector<32x1xf32>
    %359 = arith.divf %357, %358 : vector<32x1xf32>
    %360 = vector.broadcast %352 : vector<32x1xf32> to vector<32x96xf32>
    %361 = arith.subf %348, %360 : vector<32x96xf32>
    %cst_113 = arith.constant 9.99999974E-6 : f32
    %362 = vector.broadcast %cst_113 : f32 to vector<32x1xf32>
    %363 = arith.addf %359, %362 : vector<32x1xf32>
    %364 = math.rsqrt %363 : vector<32x1xf32>
    %365 = vector.broadcast %364 : vector<32x1xf32> to vector<32x96xf32>
    %366 = arith.mulf %361, %365 : vector<32x96xf32>
    %367 = vector.broadcast %208 : vector<1x96xf32> to vector<32x96xf32>
    %368 = arith.mulf %366, %367 : vector<32x96xf32>
    %369 = vector.broadcast %209 : vector<1x96xf32> to vector<32x96xf32>
    %370 = arith.addf %368, %369 : vector<32x96xf32>
    %371 = arith.truncf %370 : vector<32x96xf32> to vector<32x96xbf16>
    %cst_114 = arith.constant dense<0.000000e+00> : vector<32x384xf32>
    %372 = tpu.matmul %371, %204, %cst_114 {dimension_numbers = #tpu.dot_dimension_numbers<[1], [0], [0], [1], [0, 0, 1, 1], [], []>} : vector<32x96xbf16>, vector<96x384xbf16>, vector<32x384xf32> -> vector<32x384xf32>
    %373 = vector.broadcast %210 : vector<1x384xf32> to vector<32x384xf32>
    %374 = arith.addf %372, %373 : vector<32x384xf32>
    %cst_115 = arith.constant 0.000000e+00 : f32
    %375 = vector.broadcast %cst_115 : f32 to vector<32x384xf32>
    %376 = arith.maximumf %374, %375 : vector<32x384xf32>
    %377 = arith.truncf %376 : vector<32x384xf32> to vector<32x384xbf16>
    %cst_116 = arith.constant dense<0.000000e+00> : vector<32x96xf32>
    %378 = tpu.matmul %377, %203, %cst_116 {dimension_numbers = #tpu.dot_dimension_numbers<[1], [0], [0], [1], [0, 0, 1, 1], [], []>} : vector<32x384xbf16>, vector<384x96xbf16>, vector<32x96xf32> -> vector<32x96xf32>
    %379 = vector.broadcast %211 : vector<1x96xf32> to vector<32x96xf32>
    %380 = arith.addf %378, %379 : vector<32x96xf32>
    %381 = arith.addf %348, %380 : vector<32x96xf32>
    %c120 = arith.constant 120 : index
    %c0_117 = arith.constant 0 : index
    %382 = vector.load %arg4[%c120, %c0_117] : memref<128x384xf32, #tpu.memory_space<vmem>>, vector<1x96xf32>
    %c121 = arith.constant 121 : index
    %c0_118 = arith.constant 0 : index
    %383 = vector.load %arg4[%c121, %c0_118] : memref<128x384xf32, #tpu.memory_space<vmem>>, vector<1x96xf32>
    %c122 = arith.constant 122 : index
    %c0_119 = arith.constant 0 : index
    %384 = vector.load %arg4[%c122, %c0_119] : memref<128x384xf32, #tpu.memory_space<vmem>>, vector<1x128xf32>
    %c192_120 = arith.constant 192 : index
    %c0_121 = arith.constant 0 : index
    %385 = vector.load %arg3[%c192_120, %c0_121] : memref<288x384xbf16, #tpu.memory_space<vmem>>, vector<96x128xbf16>
    %cst_122 = arith.constant dense<0.000000e+00> : vector<32xf32>
    %386 = vector.multi_reduction <add>, %381, %cst_122 [1] : vector<32x96xf32> to vector<32xf32>
    %387 = vector.shape_cast %386 : vector<32xf32> to vector<32x1xf32>
    %cst_123 = arith.constant 9.600000e+01 : f32
    %388 = vector.broadcast %cst_123 : f32 to vector<32x1xf32>
    %389 = arith.divf %387, %388 : vector<32x1xf32>
    %390 = vector.broadcast %389 : vector<32x1xf32> to vector<32x96xf32>
    %391 = arith.subf %381, %390 : vector<32x96xf32>
    %392 = arith.mulf %391, %391 : vector<32x96xf32>
    %cst_124 = arith.constant dense<0.000000e+00> : vector<32xf32>
    %393 = vector.multi_reduction <add>, %392, %cst_124 [1] : vector<32x96xf32> to vector<32xf32>
    %394 = vector.shape_cast %393 : vector<32xf32> to vector<32x1xf32>
    %cst_125 = arith.constant 9.600000e+01 : f32
    %395 = vector.broadcast %cst_125 : f32 to vector<32x1xf32>
    %396 = arith.divf %394, %395 : vector<32x1xf32>
    %397 = vector.broadcast %389 : vector<32x1xf32> to vector<32x96xf32>
    %398 = arith.subf %381, %397 : vector<32x96xf32>
    %cst_126 = arith.constant 9.99999974E-6 : f32
    %399 = vector.broadcast %cst_126 : f32 to vector<32x1xf32>
    %400 = arith.addf %396, %399 : vector<32x1xf32>
    %401 = math.rsqrt %400 : vector<32x1xf32>
    %402 = vector.broadcast %401 : vector<32x1xf32> to vector<32x96xf32>
    %403 = arith.mulf %398, %402 : vector<32x96xf32>
    %404 = vector.broadcast %382 : vector<1x96xf32> to vector<32x96xf32>
    %405 = arith.mulf %403, %404 : vector<32x96xf32>
    %406 = vector.broadcast %383 : vector<1x96xf32> to vector<32x96xf32>
    %407 = arith.addf %405, %406 : vector<32x96xf32>
    %408 = arith.truncf %407 : vector<32x96xf32> to vector<32x96xbf16>
    %cst_127 = arith.constant dense<0.000000e+00> : vector<32x128xf32>
    %409 = tpu.matmul %408, %385, %cst_127 {dimension_numbers = #tpu.dot_dimension_numbers<[1], [0], [0], [1], [0, 0, 1, 1], [], []>} : vector<32x96xbf16>, vector<96x128xbf16>, vector<32x128xf32> -> vector<32x128xf32>
    %410 = vector.broadcast %384 : vector<1x128xf32> to vector<32x128xf32>
    %411 = arith.addf %409, %410 : vector<32x128xf32>
    %c0_128 = arith.constant 0 : index
    %c0_129 = arith.constant 0 : index
    %412 = vector.load %arg5[%c0_128, %c0_129] : memref<32x128xf32, #tpu.memory_space<vmem>>, vector<32x128xf32>
    tpu.vector_store %arg5[%c0_128, %c0_129], %411 {strides = array<i32>} : memref<32x128xf32, #tpu.memory_space<vmem>>, vector<32x128xf32>,
    return
  }
  func.func @transform_0(%arg0: i32) -> (i32, i32) {
    %c0_i32 = arith.constant 0 : i32
    %c0_i32_0 = arith.constant 0 : i32
    return %arg0, %c0_i32 : i32, i32
  }
  func.func @transform_1(%arg0: i32) -> (i32, i32) {
    %c0_i32 = arith.constant 0 : i32
    %c0_i32_0 = arith.constant 0 : i32
    %c0_i32_1 = arith.constant 0 : i32
    return %c0_i32, %c0_i32_0 : i32, i32
  }
  func.func @transform_2(%arg0: i32) -> (i32, i32) {
    %c0_i32 = arith.constant 0 : i32
    %c0_i32_0 = arith.constant 0 : i32
    %c0_i32_1 = arith.constant 0 : i32
    return %c0_i32, %c0_i32_0 : i32, i32
  }
  func.func @transform_3(%arg0: i32) -> (i32, i32) {
    %c0_i32 = arith.constant 0 : i32
    %c0_i32_0 = arith.constant 0 : i32
    %c0_i32_1 = arith.constant 0 : i32
    return %c0_i32, %c0_i32_0 : i32, i32
  }
  func.func @transform_4(%arg0: i32) -> (i32, i32) {
    %c0_i32 = arith.constant 0 : i32
    %c0_i32_0 = arith.constant 0 : i32
    return %arg0, %c0_i32 : i32, i32
  }
}

</mosaic_0001>

<bundles_post_ra>
// kernel: minigpt_forward.1
= control target key start
LH: loop header
LB: loop body
LE: loop exit
PB: predicated region body
PF: predicated region fallthrough
CT: control target
= control target key end

     0   :  { %9 = vsyncpa [#allocation3], 0  ;;  %s7264_s0 = inlined_call_operand.vmem [shape: s32[64,1], index: 0, kind: input, shape index: {}]   ;;  %s7265_s1 = inlined_call_operand.vmem [shape: bf16[1536,96], index: 1, kind: input, shape index: {}]   ;;  %s7266_s2 = inlined_call_operand.vmem [shape: bf16[288,384], index: 2, kind: input, shape index: {}]   ;;  %s7267_s3 = inlined_call_operand.vmem [shape: f32[128,384], index: 3, kind: input, shape index: {}]   ;;  %s7268_s4 = inlined_call_operand.hbm [shape: f32[64,128], index: 4, kind: output, shape index: {}]  }
   0x1   :  { %11 = vsyncpa [#allocation3 + $0x1], 0  ;;  %s5414_s15 = smov 0   ;;  %s5416_s16 = smov 0  }
   0x2   :  { %s5418_s17 = smov 0   ;;  %s5420_s18 = smov 0  }
   0x3 LB: > { %s5435_s19 = sadd.s32 4294967295, %s5374_s18   ;;  %s4129_s20 = sadd.s32 4294967294, %s5374_s18   ;;  %s5374_s18 = sphi %s5420_s18, %s7277_s18   ;;  %s5370_s17 = sphi %s5418_s17, %s7276_s17   ;;  %s5366_s16 = sphi %s5416_s16, %s7275_s16   ;;  %s5362_s15 = sphi %s5414_s15, %s7274_s15  }
   0x4   : > { %s5439_s21 = sadd.s32 1, %s5374_s18   ;;  %s113_s22 = sadd.s32 1, %s5370_s17 }
   0x5   : > { %s110_s23 = ssub.s32 %s5374_s18, %s5439_s21  ;;  %p123_p0 = scmp.ne.s32.totalorder %s5370_s17, %s5366_s16 }
   0x6   : > { %p111_p1 = scmp.eq.s32.totalorder %s110_s23, 0  ;;  %p124_p2 = scmp.eq.s32.totalorder %s5435_s19, 1 }
   0x7   : > { %p129_p3 = scmp.ne.s32.totalorder %s5366_s16, %s5362_s15  ;;  %p130_p4 = scmp.eq.s32.totalorder %s4129_s20, 1 }
   0x8   : > { %s5450_s24 = scalar_select %p111_p1, %s5370_s17, %s113_s22  }
   0x9   : > { %p5452_p5 = por %p124_p2, %p123_p0  ;;  %p5456_p6 = por %p130_p4, %p129_p3 }
   0xa   : > { %p4132_p7 = scmp.ge.s32.totalorder %s5374_s18, 1  ;;  %p166_p8 = scmp.lt.s32.totalorder %s5374_s18, 3 }
   0xc   : > { %p167_p9 = pnand %p4132_p7, %p166_p8 }
   0xd   : > { %s4134_s27 = sshll.u32 (!%p167_p9), %s5435_s19, 2  ;;  %s5379_s30 = smov (!%p167_p9), 112  }
   0xe   : > { %170 = sbr.rel (%p167_p9) target bundleno = 5235 (0x1473), region = 36  ;;  %p193_p10 = scmp.lt.s32.totalorder (!%p167_p9), %s4134_s27, 7 }
   0xf   : > { %s5380_s5 = smov (!%p167_p9), 80   ;;  %s5381_s6 = smov (!%p167_p9), 96  }
  0x10   : > { %s5383_s7 = smov (!%p167_p9), 64   ;;  %s7269_s9 = smov (!%p167_p9), 32  }
  0x11   : > { %s5386_s10 = smov (!%p167_p9), 16   ;;  %s4919_s29 = sshll.u32 (!%p167_p9), %s5435_s19, 5 }
  0x12   : > { %s5332_s23 = scalar_lea.hbm (!%p167_p9), %s7268_s4, 64 }
  0x13   : > { %v238_v0 = vld [vmem:[%s7267_s3 + $0xc0] sm:$0xff]  ;;  %v5376_v1 = vmov 0   ;;  %v237_v2 = vld [vmem:[%s7267_s3 + $0xa8] sm:$0xff]  ;;  %s7279_s27 = smov (!%p193_p10, %s4134_s27), 7  ;;  %v236_v3 = vld [vmem:[%s7267_s3 + $0x90] sm:$0xff]  ;;  %v204_v14 = vlaneseq  ;;  %vm243_vm0 = vcmask 588800  }
  0x14   : > { %4976 = vset.pattern.permute.xlu0 %v5376_v1  ;;  %4977 = vset.pattern.permute.xlu1 %v5376_v1  ;;  %s4135_s8 = sshll.u32 %s7279_s27, 3  ;;  %v235_v4 = vld [vmem:[%s7267_s3 + $0x78] sm:$0xff]  ;;  %v234_v7 = vld [vmem:[%s7267_s3 + $0x60] sm:$0xff]  ;;  %v233_v8 = vld [vmem:[%s7267_s3 + $0x48] sm:$0xff]  ;;  %v5377_v17 = vmov 0.0   ;;  %vm426_vm5 = vcmask 785408  }
  0x15   : > { %263 = vmatpush.msra.mxu0 %v238_v0  ;;  %s196_s11 = scalar_lea.vmem %s7264_s0, %s4135_s8  ;;  %v232_v9 = vld [vmem:[%s7267_s3 + $0x30] sm:$0xff]  ;;  %v231_v12 = vld [vmem:[%s7267_s3 + $0x18] sm:$0xff]  ;;  %v230_v13 = vld [vmem:[%s7267_s3] sm:$0xff]  ;;  %v5494_v15 = vand.u32 127, %v204_v14  ;;  %v5378_v41 = vmov 96.0   ;;  %s5384_s8 = smov 48  }
  0x16   : > { %v200_v5 = vld [vmem:[%s196_s11] sm:$0xff]  ;;  %v202_v6 = vld [vmem:[%s196_s11 + $0x10] sm:$0xff]  ;;  %v201_v10 = vld [vmem:[%s196_s11 + $0x8] sm:$0xff]  ;;  %5078 = vrcp.f32 %v5378_v41 }
  0x17   : > { %264 = vmatpush.msra.mxu0 %v237_v2  ;;  %207 = vperm.xlu0 %4976, %v200_v5   ;;  %v203_v11 = vld [vmem:[%s196_s11 + $0x18] sm:$0xff]  ;;  %v240_v29 = vld [vmem:[%s7267_s3 + $0xf0] sm:$0xff]  ;;  %v241_v33 = vld [vmem:[%s7267_s3 + $0x108] sm:$0xff] }
  0x18   : > { %213 = vperm.xlu1 %4977, %v202_v6   ;;  %v239_v25 = vld [vmem:[%s7267_s3 + $0xd8] sm:$0xff]  ;;  %v242_v37 = vld [vmem:[%s7267_s3 + $0x120] sm:$0xff]  ;;  %v4798_v6 = vld [vmem:[%s7265_s1 + $0x88] sm:$0xff] }
  0x19   : > { %265 = vmatpush.msra.mxu0 %v236_v3  ;;  %v4792_v5 = vld [vmem:[%s7265_s1 + $0x58] sm:$0xff]  ;;  %694 = vmatpush.bf16.msra.mxu3 %v4798_v6 }
  0x1a   : > { %635 = vmatpush.bf16.msra.mxu2 %v4792_v5 }
  0x1b   : > { %266 = vmatpush.msra.mxu0 %v235_v4  ;;  %v4786_v4 = vld [vmem:[%s7265_s1 + $0x28] sm:$0xff] }
  0x1c   : > { %v5079_v42 = vpop.eup %5078  ;;  %576 = vmatpush.bf16.msra.mxu1 %v4786_v4 }
  0x1d   : > { %267 = vmatpush.msra.mxu0 %v234_v7  ;;  %v440_v43 = vmul.f32 96.0, %v5079_v42  ;;  %vm444_vm6 = vweird.f32 %v5079_v42  ;;  %v4785_v7 = vld [vmem:[%s7265_s1 + $0x20] sm:$0xff] }
  0x1f   : > { %268 = vmatpush.msra.mxu0 %v233_v8  ;;  %210 = vperm.xlu0 %4976, %v201_v10   ;;  %v441_v44 = vsub.f32 1.0, %v440_v43  ;;  %v4791_v8 = vld [vmem:[%s7265_s1 + $0x50] sm:$0xff]  ;;  %v4784_v10 = vld [vmem:[%s7265_s1 + $0x18] sm:$0xff] }
  0x20   : > { %216 = vperm.xlu1 %4977, %v203_v11   ;;  %577 = vmatpush.bf16.msra.mxu1 %v4785_v7  ;;  %v4790_v11 = vld [vmem:[%s7265_s1 + $0x48] sm:$0xff] }
  0x21   : > { %269 = vmatpush.msra.mxu0 %v232_v9  ;;  %v442_v45 = vmul.f32 %v5079_v42, %v441_v44  ;;  %v4797_v9 = vld [vmem:[%s7265_s1 + $0x80] sm:$0xff]  ;;  %636 = vmatpush.bf16.msra.mxu2 %v4791_v8 }
  0x22   : > { %695 = vmatpush.bf16.msra.mxu3 %v4797_v9 }
  0x23   : > { %270 = vmatpush.msra.mxu0 %v231_v12  ;;  %v443_v46 = vadd.f32 %v5079_v42, %v442_v45  ;;  %v4796_v12 = vld [vmem:[%s7265_s1 + $0x78] sm:$0xff] }
  0x24   : > { %578 = vmatpush.bf16.msra.mxu1 %v4784_v10 }
  0x25   : > { %271 = vmatpush.msra.mxu0 %v230_v13  ;;  %v5532_v47 = vsel %vm444_vm6, %v5079_v42, %v443_v46  ;;  %637 = vmatpush.bf16.msra.mxu2 %v4790_v11  ;;  %v4783_v13 = vld [vmem:[%s7265_s1 + $0x10] sm:$0xff] }
  0x26   : > { %696 = vmatpush.bf16.msra.mxu3 %v4796_v12 }
  0x28   : > { %579 = vmatpush.bf16.msra.mxu1 %v4783_v13 }
  0x89   : > { %v208_v16 = vpop.permute.xlu0 %207 }
  0x8a   : > { %vm218_vm1 = vcmp.eq.s32.totalorder %v208_v16, %v5494_v15  ;;  %v214_v20 = vpop.permute.xlu1 %213  ;;  %v4789_v16 = vld [vmem:[%s7265_s1 + $0x40] sm:$0xff] }
  0x8b   : > { %v4136_v18 = vsel %vm218_vm1, 1.0, %v5377_v17  ;;  %vm220_vm3 = vcmp.eq.s32.totalorder %v214_v20, %v5494_v15  ;;  %638 = vmatpush.bf16.msra.mxu2 %v4789_v16  ;;  %v4794_v20 = vld [vmem:[%s7265_s1 + $0x68] sm:$0xff] }
  0x8c   : > { %4140 = vmatmul.msk.f32.vlgmr.msra.gmra.mxu0 %vm243_vm0, %v4136_v18  ;;  %v4138_v22 = vsel %vm220_vm3, 1.0, %v5377_v17  ;;  %v4782_v18 = vld [vmem:[%s7265_s1 + $0x8] sm:$0xff]  ;;  %vm735_vm3 = vcmask 130048  }
  0x8d   : > { %580 = vmatpush.bf16.msra.mxu1 %v4782_v18 }
  0x91   : > { %v211_v19 = vpop.permute.xlu0 %210 }
  0x92   : > { %vm219_vm2 = vcmp.eq.s32.totalorder %v211_v19, %v5494_v15  ;;  %v217_v23 = vpop.permute.xlu1 %216  ;;  %v4788_v19 = vld [vmem:[%s7265_s1 + $0x38] sm:$0xff] }
  0x93   : > { %v4137_v21 = vsel %vm219_vm2, 1.0, %v5377_v17  ;;  %vm221_vm4 = vcmp.eq.s32.totalorder %v217_v23, %v5494_v15  ;;  %639 = vmatpush.bf16.msra.mxu2 %v4788_v19  ;;  %v4781_v23 = vld [vmem:[%s7265_s1] sm:$0xff] }
  0x94   : > { %4141 = vmatmul.msk.f32.gmra.mxu0 %vm243_vm0, %v4137_v21  ;;  %v4139_v24 = vsel %vm221_vm4, 1.0, %v5377_v17  ;;  %v4795_v17 = vld [vmem:[%s7265_s1 + $0x70] sm:$0xff]  ;;  %581 = vmatpush.bf16.msra.mxu1 %v4781_v23 }
  0x95   : > { %697 = vmatpush.bf16.msra.mxu3 %v4795_v17 }
  0x99   : > { %698 = vmatpush.bf16.msra.mxu3 %v4794_v20 }
  0x9c   : > { %4142 = vmatmul.msk.f32.gmra.mxu0 %vm243_vm0, %v4138_v22 }
  0xa4   : > { %4143 = vmatmul.msk.f32.gmra.mxu0 %vm243_vm0, %v4139_v24  ;;  %v4787_v24 = vld [vmem:[%s7265_s1 + $0x30] sm:$0xff] }
  0xa5   : > { %640 = vmatpush.bf16.msra.mxu2 %v4787_v24 }
 0x109   : > { %v273_v26 = vpop.f32.mrf.mxu0 }
 0x10a   : > { %v5507_v27 = vadd.f32 %v273_v26, %v239_v25  ;;  %v4793_v25 = vld [vmem:[%s7265_s1 + $0x60] sm:$0xff] }
 0x10b   : > { %699 = vmatpush.bf16.msra.mxu3 %v4793_v25 }
 0x10c   : > { %v427_v28 = vsel %vm426_vm5, %v5507_v27, 0.0 }
 0x10d   : > { %428 = vadd.xlane.f32.xlu2 %v427_v28 }
 0x111   : > { %v276_v30 = vpop.f32.mrf.mxu0 }
 0x112   : > { %v5514_v31 = vadd.f32 %v276_v30, %v240_v29 }
 0x114   : > { %v430_v32 = vsel %vm426_vm5, %v5514_v31, 0.0 }
 0x115   : > { %431 = vadd.xlane.f32.xlu2 %v430_v32 }
 0x119   : > { %v279_v34 = vpop.f32.mrf.mxu0 }
 0x11a   : > { %v5521_v35 = vadd.f32 %v279_v34, %v241_v33 }
 0x11c   : > { %v433_v36 = vsel %vm426_vm5, %v5521_v35, 0.0 }
 0x11d   : > { %434 = vadd.xlane.f32.xlu0 %v433_v36 }
 0x121   : > { %v282_v38 = vpop.f32.mrf.mxu0 }
 0x122   : > { %v5528_v39 = vadd.f32 %v282_v38, %v242_v37 }
 0x124   : > { %v436_v40 = vsel %vm426_vm5, %v5528_v39, 0.0 }
 0x125   : > { %437 = vadd.xlane.f32.xlu1 %v436_v40 }
 0x180   : > { %v429_v48 = vpop.xlane.xlu2 %428 }
 0x181   : > { %v446_v49 = vmul.f32 %v5532_v47, %v429_v48 }
 0x183   : > { %v5536_v50 = vsub.f32 %v5507_v27, %v446_v49 }
 0x185   : > { %v454_v51 = vmul.f32 %v5536_v50, %v5536_v50 }
 0x187   : > { %v458_v52 = vsel %vm426_vm5, %v454_v51, 0.0 }
 0x188   : > { %459 = vadd.xlane.f32.xlu2 %v458_v52  ;;  %v432_v53 = vpop.xlane.xlu2 %431 }
 0x189   : > { %v447_v54 = vmul.f32 %v5532_v47, %v432_v53 }
 0x18b   : > { %v5543_v55 = vsub.f32 %v5514_v31, %v447_v54 }
 0x18d   : > { %v455_v56 = vmul.f32 %v5543_v55, %v5543_v55 }
 0x18f   : > { %v461_v57 = vsel %vm426_vm5, %v455_v56, 0.0 }
 0x190   : > { %v435_v58 = vpop.xlane.xlu0 %434  ;;  %462 = vadd.xlane.f32.xlu2 %v461_v57 }
 0x191   : > { %v448_v59 = vmul.f32 %v5532_v47, %v435_v58 }
 0x193   : > { %v5550_v60 = vsub.f32 %v5521_v35, %v448_v59  ;;  %v418_v59 = vld [vmem:[%s7267_s3 + $0x138] ss:$0 sm:$0xff] }
 0x195   : > { %v456_v61 = vmul.f32 %v5550_v60, %v5550_v60 }
 0x197   : > { %v464_v62 = vsel %vm426_vm5, %v456_v61, 0.0 }
 0x198   : > { %v438_v63 = vpop.xlane.xlu1 %437  ;;  %465 = vadd.xlane.f32.xlu2 %v464_v62 }
 0x199   : > { %v449_v0 = vmul.f32 %v5532_v47, %v438_v63 }
 0x19b   : > { %v5557_v1 = vsub.f32 %v5528_v39, %v449_v0 }
 0x19d   : > { %v457_v2 = vmul.f32 %v5557_v1, %v5557_v1 }
 0x19f   : > { %v467_v3 = vsel %vm426_vm5, %v457_v2, 0.0 }
 0x1a0   : > { %468 = vadd.xlane.f32.xlu2 %v467_v3  ;;  %v419_v3 = vld [vmem:[%s7267_s3 + $0x139] ss:$0 sm:$0xff] }
 0x1fb   : > { %v460_v21 = vpop.xlane.xlu2 %459 }
 0x1fc   : > { %v470_v22 = vmul.f32 %v460_v21, %v5532_v47 }
 0x1fe   : > { %v474_v26 = vadd.f32 1e-05, %v470_v22 }
 0x200   : > { %5080 = vrsqrt.f32 %v474_v26  ;;  %vm484_vm8 = vweird.f32 %v474_v26 }
 0x203   : > { %v463_v28 = vpop.xlane.xlu2 %462 }
 0x204   : > { %v471_v29 = vmul.f32 %v463_v28, %v5532_v47 }
 0x206   : > { %v5081_v30 = vpop.eup %5080  ;;  %v475_v32 = vadd.f32 1e-05, %v471_v29 }
 0x207   : > { %v479_v33 = vmul.f32 %v5081_v30, %v474_v26  ;;  %vm485_vm7 = vweird.f32 %v5081_v30 }
 0x208   : > { %5082 = vrsqrt.f32 %v475_v32  ;;  %vm486_vm9 = vmor %vm484_vm8, %vm485_vm7  ;;  %vm494_vm11 = vweird.f32 %v475_v32  ;;  %vm767_vm8 = vcmask 261120  }
 0x209   : > { %v480_v34 = vmul.f32 %v5081_v30, %v479_v33 }
 0x20b   : > { %v481_v36 = vmul.f32 0.5, %v480_v34  ;;  %v466_v37 = vpop.xlane.xlu2 %465 }
 0x20c   : > { %v472_v38 = vmul.f32 %v466_v37, %v5532_v47 }
 0x20d   : > { %v482_v40 = vsub.f32 1.5, %v481_v36 }
 0x20e   : > { %v5083_v41 = vpop.eup %5082  ;;  %v476_v42 = vadd.f32 1e-05, %v472_v38 }
 0x20f   : > { %v483_v43 = vmul.f32 %v5081_v30, %v482_v40  ;;  %v489_v44 = vmul.f32 %v5083_v41, %v475_v32  ;;  %vm495_vm10 = vweird.f32 %v5083_v41 }
 0x210   : > { %5084 = vrsqrt.f32 %v476_v42  ;;  %vm496_vm12 = vmor %vm494_vm11, %vm495_vm10  ;;  %vm504_vm14 = vweird.f32 %v476_v42  ;;  %vm1519_vm10 = vcmask 392192   ;;  %vm1524_vm11 = vcmask 523264  }
 0x211   : > { %v490_v45 = vmul.f32 %v5083_v41, %v489_v44  ;;  %v487_v46 = vsel %vm486_vm9, %v5081_v30, %v483_v43 }
 0x212   : > { %v518_v56 = vmul.f32 %v487_v46, %v5536_v50 }
 0x213   : > { %v491_v48 = vmul.f32 0.5, %v490_v45  ;;  %v469_v49 = vpop.xlane.xlu2 %468 }
 0x214   : > { %v473_v51 = vmul.f32 %v469_v49, %v5532_v47  ;;  %v522_v0 = vmul.f32 %v518_v56, %v418_v59 }
 0x215   : > { %v492_v52 = vsub.f32 1.5, %v491_v48 }
 0x216   : > { %v5085_v53 = vpop.eup %5084  ;;  %v477_v54 = vadd.f32 1e-05, %v473_v51  ;;  %v526_v6 = vadd.f32 %v522_v0, %v419_v3 }
 0x217   : > { %v493_v57 = vmul.f32 %v5083_v41, %v492_v52  ;;  %v499_v58 = vmul.f32 %v5085_v53, %v476_v42  ;;  %vm505_vm13 = vweird.f32 %v5085_v53 }
 0x218   : > { %5086 = vrsqrt.f32 %v477_v54  ;;  %vm506_vm15 = vmor %vm504_vm14, %vm505_vm13  ;;  %vm514_vm1 = vweird.f32 %v477_v54 }
 0x219   : > { %v497_v61 = vsel %vm496_vm12, %v5083_v41, %v493_v57  ;;  %v500_v62 = vmul.f32 %v5085_v53, %v499_v58  ;;  %vm1529_vm12 = vcmask 654336  }
 0x21a   : > { %v519_v63 = vmul.f32 %v497_v61, %v5543_v55 }
 0x21b   : > { %v501_v2 = vmul.f32 0.5, %v500_v62 }
 0x21c   : > { %v523_v50 = vmul.f32 %v519_v63, %v418_v59 }
 0x21d   : > { %v502_v4 = vsub.f32 1.5, %v501_v2 }
 0x21e   : > { %v5087_v5 = vpop.eup %5086  ;;  %v527_v7 = vadd.f32 %v523_v50, %v419_v3 }
 0x21f   : > { %v503_v8 = vmul.f32 %v5085_v53, %v502_v4  ;;  %v509_v9 = vmul.f32 %v5087_v5, %v477_v54  ;;  %vm515_vm0 = vweird.f32 %v5087_v5 }
 0x220   : > { %v530_v10 = vpack.c.bf16 %v527_v7, %v526_v6  ;;  %vm516_vm2 = vmor %vm514_vm1, %vm515_vm0 }
 0x221   : > { %v510_v11 = vmul.f32 %v5087_v5, %v509_v9  ;;  %v507_v55 = vsel %vm506_vm15, %v5085_v53, %v503_v8 }
 0x222   : > { %4169 = vmatmul.msk.bf16.vlgmr.msra.gmra.mxu1 %vm426_vm5, %v530_v10  ;;  %4195 = vmatmul.msk.bf16.vlgmr.msra.gmra.mxu2 %vm426_vm5, %v530_v10  ;;  %v520_v16 = vmul.f32 %v507_v55, %v5550_v60  ;;  %v5382_v55 = vmov -1e+30  }
 0x223   : > { %v511_v12 = vmul.f32 0.5, %v510_v11  ;;  %4221 = vmatmul.msk.bf16.vlgmr.msra.gmra.mxu3 %vm426_vm5, %v530_v10  ;;  %v286_v11 = vshrl.u32 %v204_v14, 7 }
 0x224   : > { %v524_v20 = vmul.f32 %v520_v16, %v418_v59 }
 0x225   : > { %v512_v13 = vsub.f32 1.5, %v511_v12  ;;  %vm290_vm4 = vcmp.ge.s32.totalorder %v286_v11, %v5494_v15 }
 0x226   : > { %v528_v22 = vadd.f32 %v524_v20, %v419_v3  ;;  %v5674_v12 = vsel %vm290_vm4, 0.0, %v5382_v55 }
 0x227   : > { %v513_v17 = vmul.f32 %v5087_v5, %v512_v13 }
 0x229   : > { %v517_v18 = vsel %vm516_vm2, %v5087_v5, %v513_v17 }
 0x22a   : > { %v521_v19 = vmul.f32 %v517_v18, %v5557_v1 }
 0x22c   : > { %v525_v21 = vmul.f32 %v521_v19, %v418_v59  ;;  %v287_v19 = vadd.s32 8, %v286_v11 }
 0x22e   : > { %v529_v23 = vadd.f32 %v525_v21, %v419_v3  ;;  %vm291_vm6 = vcmp.ge.s32.totalorder %v287_v19, %v5494_v15 }
 0x230   : > { %v531_v24 = vpack.c.bf16 %v529_v23, %v528_v22  ;;  %v5684_v22 = vsel %vm291_vm6, 0.0, %v5382_v55 }
 0x232   : > { %4170 = vmatmul.msk.bf16.gmra.mxu1 %vm426_vm5, %v531_v24  ;;  %4196 = vmatmul.msk.bf16.gmra.mxu2 %vm426_vm5, %v531_v24 }
 0x233   : > { %4222 = vmatmul.msk.bf16.gmra.mxu3 %vm426_vm5, %v531_v24  ;;  %v288_v24 = vadd.s32 16, %v286_v11 }
 0x235   : > { %vm292_vm7 = vcmp.ge.s32.totalorder %v288_v24, %v5494_v15 }
 0x29f   : > { %v583_v25 = vpop.f32.mrf.mxu1 }
 0x2a0   : > { %v593_v60 = vpack.c.bf16 %v583_v25, %v583_v25  ;;  %v5688_v25 = vsel %vm292_vm7, 0.0, %v5382_v55 }
 0x2a2   : > { %v719_v32 = vunpack.c.l.b16 %v593_v60 }
 0x2a5   : > { %v642_v26 = vpop.f32.mrf.mxu2 }
 0x2a6   : > { %v701_v28 = vpop.f32.mrf.mxu3  ;;  %v652_v1 = vpack.c.bf16 %v642_v26, %v642_v26  ;;  %v289_v26 = vadd.s32 24, %v286_v11 }
 0x2a7   : > { %v585_v29 = vpop.f32.mrf.mxu1  ;;  %v711_v2 = vpack.c.bf16 %v701_v28, %v701_v28 }
 0x2a8   : > { %v594_v30 = vpack.c.bf16 %v585_v29, %v585_v29  ;;  %v729_v41 = vunpack.c.l.b16 %v652_v1  ;;  %vm293_vm9 = vcmp.ge.s32.totalorder %v289_v26, %v5494_v15 }
 0x2a9   : > { %v818_v8 = vunpack.c.l.b16 %v711_v2 }
 0x2aa   : > { %v720_v33 = vunpack.c.l.b16 %v594_v30  ;;  %v5693_v30 = vsel %vm293_vm9, 0.0, %v5382_v55 }
 0x2ac   : > { %v5636_v34 = vpack.c.b16 %v720_v33, %v719_v32 }
 0x2ad   : > { %v644_v36 = vpop.f32.mrf.mxu2 }
 0x2ae   : > { %v653_v37 = vpack.c.bf16 %v644_v36, %v644_v36  ;;  %v703_v38 = vpop.f32.mrf.mxu3  ;;  %851 = vrot.lane.b32.xlu1 %v5636_v34, %s5379_s30 }
 0x2af   : > { %v588_v40 = vpop.f32.mrf.mxu1  ;;  %v712_v61 = vpack.c.bf16 %v703_v38, %v703_v38 }
 0x2b0   : > { %v730_v42 = vunpack.c.l.b16 %v653_v37  ;;  %v595_v45 = vpack.c.bf16 %v588_v40, %v588_v40 }
 0x2b1   : > { %v819_v5 = vunpack.c.l.b16 %v712_v61 }
 0x2b2   : > { %v5640_v43 = vpack.c.b16 %v730_v42, %v729_v41  ;;  %v721_v51 = vunpack.c.l.b16 %v595_v45 }
 0x2b3   : > { %v5660_v9 = vpack.c.b16 %v819_v5, %v818_v8 }
 0x2b4   : > { %855 = vrot.lane.b32.xlu0 %v5640_v43, %s5379_s30  ;;  %v743_v10 = vsel %vm735_vm3, %v5640_v43, 0 }
 0x2b5   : > { %v647_v44 = vpop.f32.mrf.mxu2 }
 0x2b6   : > { %v706_v46 = vpop.f32.mrf.mxu3  ;;  %1087 = vrot.lane.b32.xlu1 %v5640_v43, %s5380_s5  ;;  %v654_v53 = vpack.c.bf16 %v647_v44, %v647_v44 }
 0x2b7   : > { %v590_v48 = vpop.f32.mrf.mxu1  ;;  %v713_v56 = vpack.c.bf16 %v706_v46, %v706_v46 }
 0x2b8   : > { %v596_v49 = vpack.c.bf16 %v590_v48, %v590_v48  ;;  %v731_v63 = vunpack.c.l.b16 %v654_v53 }
 0x2b9   : > { %v820_v3 = vunpack.c.l.b16 %v713_v56 }
 0x2ba   : > { %v722_v52 = vunpack.c.l.b16 %v596_v49 }
 0x2bc   : > { %v5646_v54 = vpack.c.b16 %v722_v52, %v721_v51 }
 0x2bd   : > { %v649_v57 = vpop.f32.mrf.mxu2 }
 0x2be   : > { %v655_v58 = vpack.c.bf16 %v649_v57, %v649_v57  ;;  %v708_v59 = vpop.f32.mrf.mxu3  ;;  %971 = vrot.lane.b32.xlu1 %v5640_v43, %s5381_s6  ;;  %853 = vrot.lane.b32.xlu0 %v5646_v54, %s5379_s30 }
 0x2bf   : > { %v714_v62 = vpack.c.bf16 %v708_v59, %v708_v59 }
 0x2c0   : > { %v732_v0 = vunpack.c.l.b16 %v655_v58 }
 0x2c1   : > { %v821_v50 = vunpack.c.l.b16 %v714_v62 }
 0x2c2   : > { %v5652_v4 = vpack.c.b16 %v732_v0, %v731_v63 }
 0x2c3   : > { %v5654_v6 = vpack.c.b16 %v821_v50, %v820_v3 }
 0x2c4   : > { %v746_v7 = vsel %vm735_vm3, %v5652_v4, 0 }
 0x2c5   : > { %838 = vmatpush.bf16.msrb.mxu1 %v5654_v6  ;;  %4922 = vmatpush.bf16.msrb.mxu2 %v5654_v6 }
 0x2c6   : > { %754 = vmatpush.bf16.xpose.msrb.mxu0 %v746_v7  ;;  %4920 = vmatpush.bf16.xpose.msrb.mxu3 %v746_v7 }
 0x2c7   : > { %973 = vrot.lane.b32.xlu0 %v5652_v4, %s5381_s6 }
 0x2c9   : > { %839 = vmatpush.bf16.msrb.mxu1 %v5660_v9  ;;  %4923 = vmatpush.bf16.msrb.mxu2 %v5660_v9 }
 0x2ce   : > { %755 = vmatpush.bf16.xpose.msrb.mxu0 %v743_v10  ;;  %4921 = vmatpush.bf16.xpose.msrb.mxu3 %v743_v10 }
 0x2d5   : > { %4223 = vmatmul.msk.bf16.vlgmr.msrb.gmra.mxu0 %vm735_vm3, %v5636_v34  ;;  %4224 = vmatmul.msk.bf16.vlgmr.msrb.gmra.mxu3 %vm735_vm3, %v5646_v54 }
 0x320   : > { %v5676_v16 = vpop.permute.xlu1 %851 }
 0x326   : > { %v856_v13 = vpop.permute.xlu0 %855 }
 0x327   : > { %v866_v57 = vsel %vm735_vm3, %v856_v13, 0 }
 0x328   : > { %v5680_v18 = vpop.permute.xlu1 %1087 }
 0x329   : > { %v1098_v7 = vsel %vm735_vm3, %v5680_v18, 0 }
 0x330   : > { %v5678_v17 = vpop.permute.xlu0 %853  ;;  %v972_v14 = vpop.permute.xlu1 %971 }
 0x331   : > { %v982_v23 = vsel %vm735_vm3, %v972_v14, 0 }
 0x339   : > { %v974_v20 = vpop.permute.xlu0 %973 }
 0x33a   : > { %v985_v21 = vsel %vm735_vm3, %v974_v20, 0 }
 0x33b   : > { %993 = vmatpush.bf16.xpose.msra.mxu0 %v985_v21 }
 0x343   : > { %994 = vmatpush.bf16.xpose.msra.mxu0 %v982_v23 }
 0x352   : > { %v757_v15 = vpop.f32.mrf.mxu0 }
 0x353   : > { %v5735_v58 = vadd.f32 %v757_v15, %v5674_v12 }
 0x358   : > { %v762_v60 = vpop.f32.mrf.mxu3 }
 0x359   : > { %v763_v28 = vadd.f32 %v762_v60, %v5688_v25 }
 0x35a   : > { %v759_v36 = vpop.f32.mrf.mxu0 }
 0x35b   : > { %v774_v29 = vsel %vm767_vm8, %v763_v28, -inf  ;;  %v5712_v38 = vadd.f32 %v759_v36, %v5684_v22 }
 0x35c   : > { %775 = vmax.xlane.f32.xlu2 %v774_v29 }
 0x35d   : > { %v771_v42 = vsel %vm767_vm8, %v5712_v38, -inf }
 0x360   : > { %v764_v32 = vpop.f32.mrf.mxu3 }
 0x361   : > { %v765_v33 = vadd.f32 %v764_v32, %v5693_v30 }
 0x363   : > { %v777_v1 = vsel %vm767_vm8, %v765_v33, -inf }
 0x364   : > { %778 = vmax.xlane.f32.xlu2 %v777_v1 }
 0x37c   : > { %857 = vrot.lane.b32.xlu2 %v5652_v4, %s5379_s30 }
 0x384   : > { %1089 = vrot.lane.b32.xlu2 %v5652_v4, %s5380_s5 }
 0x38c   : > { %1083 = vrot.lane.b32.xlu2 %v5636_v34, %s5380_s5 }
 0x394   : > { %1085 = vrot.lane.b32.xlu2 %v5646_v54, %s5380_s5 }
 0x39c   : > { %969 = vrot.lane.b32.xlu2 %v5646_v54, %s5381_s6 }
 0x3a4   : > { %1203 = vrot.lane.b32.xlu2 %v5640_v43, %s5383_s7 }
 0x3ac   : > { %1201 = vrot.lane.b32.xlu2 %v5646_v54, %s5383_s7 }
 0x3cf   : > { %v776_v37 = vpop.xlane.xlu2 %775 }
 0x3d0   : > { %v782_v40 = vsub.f32 %v763_v28, %v776_v37 }
 0x3d2   : > { %v788_v41 = vmul.f32 1.442695, %v782_v40 }
 0x3d4   : > { %5088 = vpow2.f32 %v788_v41 }
 0x3d5   : > { %772 = vmax.xlane.f32.xlu2 %v771_v42 }
 0x3d7   : > { %v779_v44 = vpop.xlane.xlu2 %778 }
 0x3d8   : > { %v783_v45 = vsub.f32 %v765_v33, %v779_v44 }
 0x3da   : > { %v5089_v46 = vpop.eup %5088  ;;  %v790_v48 = vmul.f32 1.442695, %v783_v45 }
 0x3db   : > { %v798_v49 = vsel %vm767_vm8, %v5089_v46, 0.0 }
 0x3dc   : > { %5090 = vpow2.f32 %v790_v48  ;;  %799 = vadd.xlane.f32.xlu0 %v798_v49 }
 0x3df   : > { %v858_v51 = vpop.permute.xlu2 %857 }
 0x3e0   : > { %v869_v52 = vsel %vm735_vm3, %v858_v51, 0 }
 0x3e1   : > { %877 = vmatpush.bf16.xpose.msra.mxu2 %v869_v52 }
 0x3e2   : > { %v5091_v53 = vpop.eup %5090 }
 0x3e3   : > { %v801_v56 = vsel %vm767_vm8, %v5091_v53, 0.0 }
 0x3e4   : > { %802 = vadd.xlane.f32.xlu1 %v801_v56 }
 0x3e7   : > { %v1090_v61 = vpop.permute.xlu2 %1089 }
 0x3e9   : > { %878 = vmatpush.bf16.xpose.msra.mxu2 %v866_v57 }
 0x3ef   : > { %v1084_v63 = vpop.permute.xlu2 %1083 }
 0x3f0   : > { %967 = vrot.lane.b32.xlu0 %v5636_v34, %s5381_s6 }
 0x3f7   : > { %v1086_v5 = vpop.permute.xlu2 %1085 }
 0x3f8   : > { %1319 = vrot.lane.b32.xlu0 %v5640_v43, %s5384_s8  ;;  %v768_v43 = vsel %vm767_vm8, %v5735_v58, -inf }
 0x3fd   : > { %1321 = vrot.lane.b32.xlu1 %v5652_v4, %s5384_s8 }
 0x3ff   : > { %v970_v10 = vpop.permute.xlu2 %969 }
 0x400   : > { %1315 = vrot.lane.b32.xlu0 %v5636_v34, %s5384_s8 }
 0x405   : > { %1205 = vrot.lane.b32.xlu1 %v5652_v4, %s5383_s7  ;;  %v1101_v4 = vsel %vm735_vm3, %v1090_v61, 0 }
 0x407   : > { %v1204_v18 = vpop.permute.xlu2 %1203 }
 0x408   : > { %1317 = vrot.lane.b32.xlu0 %v5646_v54, %s5384_s8  ;;  %v1214_v21 = vsel %vm735_vm3, %v1204_v18, 0 }
 0x40d   : > { %1199 = vrot.lane.b32.xlu1 %v5636_v34, %s5383_s7 }
 0x432   : > { %769 = vmax.xlane.f32.xlu0 %v768_v43 }
 0x446   : > { %938 = vrot.lane.b32.xlu0 %v5654_v6, %s5379_s30 }
 0x44e   : > { %1170 = vrot.lane.b32.xlu0 %v5654_v6, %s5380_s5 }
 0x44f   : > { %v800_v59 = vpop.xlane.xlu0 %799 }
 0x450   : > { %5092 = vrcp.f32 %v800_v59 }
 0x456   : > { %v5093_v62 = vpop.eup %5092 }
 0x457   : > { %v803_v54 = vpop.xlane.xlu1 %802  ;;  %v810_v0 = vmul.f32 %v5093_v62, %v5089_v46 }
 0x458   : > { %5094 = vrcp.f32 %v803_v54 }
 0x45e   : > { %v5095_v34 = vpop.eup %5094 }
 0x45f   : > { %v811_v2 = vmul.f32 %v5095_v34, %v5091_v53 }
 0x461   : > { %v813_v3 = vpack.c.bf16 %v811_v2, %v810_v0 }
 0x462   : > { %v968_v50 = vpop.permute.xlu0 %967 }
 0x463   : > { %4226 = vmatmul.msk.bf16.vlgmr.msrb.gmra.mxu2 %vm767_vm8, %v813_v3  ;;  %4231 = vmatmul.msk.bf16.vlgmr.msra.gmra.mxu0 %vm735_vm3, %v968_v50 }
 0x464   : > { %1109 = vmatpush.bf16.xpose.msrb.mxu2 %v1101_v4 }
 0x46a   : > { %v1320_v13 = vpop.permute.xlu0 %1319 }
 0x46b   : > { %v1330_v20 = vsel %vm735_vm3, %v1320_v13, 0 }
 0x46c   : > { %1110 = vmatpush.bf16.xpose.msrb.mxu2 %v1098_v7 }
 0x46f   : > { %v1322_v8 = vpop.permute.xlu1 %1321 }
 0x470   : > { %v1333_v11 = vsel %vm735_vm3, %v1322_v8, 0 }
 0x472   : > { %v1316_v23 = vpop.permute.xlu0 %1315 }
 0x473   : > { %4227 = vmatmul.msk.bf16.vlgmr.msra.gmra.mxu2 %vm735_vm3, %v5676_v16  ;;  %4232 = vmatmul.msk.bf16.gmra.mxu0 %vm735_vm3, %v970_v10  ;;  %v1202_v16 = vpop.permute.xlu2 %1201 }
 0x474   : > { %1341 = vmatpush.bf16.xpose.msra.mxu2 %v1333_v11 }
 0x477   : > { %v1206_v55 = vpop.permute.xlu1 %1205 }
 0x478   : > { %v1217_v19 = vsel %vm735_vm3, %v1206_v55, 0 }
 0x479   : > { %1225 = vmatpush.bf16.xpose.msrb.mxu0 %v1217_v19 }
 0x47a   : > { %v1318_v24 = vpop.permute.xlu0 %1317 }
 0x47b   : > { %v773_v42 = vpop.xlane.xlu2 %772 }
 0x47c   : > { %1342 = vmatpush.bf16.xpose.msra.mxu2 %v1330_v20  ;;  %v781_v46 = vsub.f32 %v5712_v38, %v773_v42 }
 0x47e   : > { %v786_v49 = vmul.f32 1.442695, %v781_v46 }
 0x47f   : > { %v1200_v14 = vpop.permute.xlu1 %1199 }
 0x481   : > { %1226 = vmatpush.bf16.xpose.msrb.mxu0 %v1214_v21 }
 0x483   : > { %4228 = vmatmul.msk.bf16.gmra.mxu2 %vm735_vm3, %v5678_v17 }
 0x488   : > { %4239 = vmatmul.msk.bf16.vlgmr.msrb.gmra.mxu0 %vm735_vm3, %v1200_v14 }
 0x493   : > { %4235 = vmatmul.msk.bf16.vlgmr.msrb.gmra.mxu2 %vm735_vm3, %v1084_v63 }
 0x498   : > { %4240 = vmatmul.msk.bf16.gmra.mxu0 %vm735_vm3, %v1202_v16 }
 0x4a3   : > { %4236 = vmatmul.msk.bf16.gmra.mxu2 %vm735_vm3, %v1086_v5 }
 0x4a5   : > { %v770_v26 = vpop.xlane.xlu0 %769 }
 0x4a6   : > { %v780_v37 = vsub.f32 %v5735_v58, %v770_v26 }
 0x4a8   : > { %v784_v41 = vmul.f32 1.442695, %v780_v37 }
 0x4aa   : > { %5096 = vpow2.f32 %v784_v41 }
 0x4ab   : > { %5098 = vpow2.f32 %v786_v49 }
 0x4b0   : > { %v5779_v51 = vpop.eup %5096 }
 0x4b1   : > { %v792_v53 = vsel %vm767_vm8, %v5779_v51, 0.0  ;;  %v5785_v57 = vpop.eup %5098 }
 0x4b2   : > { %v795_v38 = vsel %vm767_vm8, %v5785_v57, 0.0 }
 0x4b3   : > { %4243 = vmatmul.msk.bf16.vlgmr.msra.gmra.mxu2 %vm735_vm3, %v1316_v23 }
 0x4b8   : > { %v939_v60 = vpop.permute.xlu0 %938 }
 0x4b9   : > { %954 = vmatpush.bf16.msra.mxu3 %v939_v60 }
 0x4c3   : > { %4244 = vmatmul.msk.bf16.gmra.mxu2 %vm735_vm3, %v1318_v24 }
 0x4e0   : > { %v996_v17 = vpop.f32.mrf.mxu0 }
 0x4e1   : > { %v997_v28 = vadd.f32 %v996_v17, %v5674_v12 }
 0x4e3   : > { %v1006_v29 = vsel %vm767_vm8, %v997_v28, -inf }
 0x4e4   : > { %1007 = vmax.xlane.f32.xlu2 %v1006_v29 }
 0x4e6   : > { %v5781_v52 = vpop.f32.mrf.mxu2 }
 0x4e8   : > { %v998_v32 = vpop.f32.mrf.mxu0 }
 0x4e9   : > { %v999_v33 = vadd.f32 %v998_v32, %v5684_v22 }
 0x4eb   : > { %v1009_v1 = vsel %vm767_vm8, %v999_v33, -inf }
 0x4ec   : > { %1010 = vmax.xlane.f32.xlu1 %v1009_v1 }
 0x4ee   : > { %v5791_v58 = vpop.f32.mrf.mxu2 }
 0x4f0   : > { %v1001_v15 = vpop.f32.mrf.mxu0 }
 0x4f1   : > { %v5768_v36 = vadd.f32 %v1001_v15, %v5688_v25 }
 0x4f3   : > { %v1012_v40 = vsel %vm767_vm8, %v5768_v36, -inf }
 0x4f4   : > { %1013 = vmax.xlane.f32.xlu2 %v1012_v40 }
 0x4f6   : > { %v880_v62 = vpop.f32.mrf.mxu2 }
 0x4f7   : > { %v5848_v40 = vadd.f32 %v880_v62, %v5674_v12 }
 0x4f8   : > { %v1003_v44 = vpop.f32.mrf.mxu0 }
 0x4f9   : > { %v5774_v45 = vadd.f32 %v1003_v44, %v5693_v30  ;;  %v1171_v44 = vpop.permute.xlu0 %1170  ;;  %v890_v46 = vsel %vm767_vm8, %v5848_v40, -inf }
 0x4fb   : > { %v1015_v48 = vsel %vm767_vm8, %v5774_v45, -inf }
 0x4fc   : > { %1016 = vmax.xlane.f32.xlu1 %v1015_v48 }
 0x4fe   : > { %v882_v50 = vpop.f32.mrf.mxu2 }
 0x4ff   : > { %v5809_v4 = vadd.f32 %v882_v50, %v5684_v22 }
 0x501   : > { %v893_v5 = vsel %vm767_vm8, %v5809_v4, -inf }
 0x504   : > { %793 = vadd.xlane.f32.xlu1 %v792_v53 }
 0x505   : > { %v1228_v56 = vpop.f32.mrf.mxu0 }
 0x506   : > { %v5814_v7 = vadd.f32 %v1228_v56, %v5674_v12  ;;  %v885_v10 = vpop.f32.mrf.mxu2 }
 0x507   : > { %v5834_v17 = vadd.f32 %v885_v10, %v5688_v25 }
 0x508   : > { %v1238_v8 = vsel %vm767_vm8, %v5814_v7, -inf }
 0x509   : > { %v896_v15 = vsel %vm767_vm8, %v5834_v17, -inf }
 0x50c   : > { %936 = vrot.lane.b32.xlu2 %v5660_v9, %s5379_s30  ;;  %796 = vadd.xlane.f32.xlu1 %v795_v38 }
 0x50d   : > { %v1230_v43 = vpop.f32.mrf.mxu0 }
 0x50e   : > { %v5794_v59 = vadd.f32 %v1230_v43, %v5684_v22  ;;  %v5820_v11 = vpop.f32.mrf.mxu2 }
 0x510   : > { %v1241_v61 = vsel %vm767_vm8, %v5794_v59, -inf }
 0x514   : > { %1242 = vmax.xlane.f32.xlu1 %v1241_v61 }
 0x515   : > { %v1233_v54 = vpop.f32.mrf.mxu0 }
 0x516   : > { %v5799_v34 = vadd.f32 %v1233_v54, %v5688_v25  ;;  %v5822_v55 = vpop.f32.mrf.mxu2 }
 0x518   : > { %v1244_v63 = vsel %vm767_vm8, %v5799_v34, -inf }
 0x51c   : > { %1245 = vmax.xlane.f32.xlu1 %v1244_v63 }
 0x51d   : > { %v1235_v0 = vpop.f32.mrf.mxu0 }
 0x51e   : > { %v5804_v2 = vadd.f32 %v1235_v0, %v5693_v30  ;;  %v1114_v18 = vpop.f32.mrf.mxu2 }
 0x51f   : > { %v5827_v23 = vadd.f32 %v1114_v18, %v5684_v22 }
 0x520   : > { %v1247_v3 = vsel %vm767_vm8, %v5804_v2, -inf }
 0x521   : > { %1248 = vmax.xlane.f32.xlu0 %v1247_v3  ;;  %v1125_v60 = vsel %vm767_vm8, %v5827_v23, -inf }
 0x529   : > { %894 = vmax.xlane.f32.xlu0 %v893_v5 }
 0x535   : > { %1239 = vmax.xlane.f32.xlu2 %v1238_v8 }
 0x53d   : > { %1052 = vrot.lane.b32.xlu0 %v5660_v9, %s5381_s6 }
 0x557   : > { %v1008_v13 = vpop.xlane.xlu2 %1007 }
 0x558   : > { %v1018_v19 = vsub.f32 %v997_v28, %v1008_v13  ;;  %v1117_v28 = vpop.f32.mrf.mxu2 }
 0x55a   : > { %v1022_v20 = vmul.f32 1.442695, %v1018_v19 }
 0x55c   : > { %5100 = vpow2.f32 %v1022_v20 }
 0x55f   : > { %v1011_v21 = vpop.xlane.xlu1 %1010 }
 0x560   : > { %v1019_v14 = vsub.f32 %v999_v33, %v1011_v21  ;;  %v5839_v33 = vadd.f32 %v1117_v28, %v5688_v25 }
 0x562   : > { %v5824_v16 = vpop.eup %5100  ;;  %v1024_v24 = vmul.f32 1.442695, %v1019_v14  ;;  %v1128_v37 = vsel %vm767_vm8, %v5839_v33, -inf  ;;  %v1119_v14 = vpop.f32.mrf.mxu2 }
 0x563   : > { %v1030_v26 = vsel %vm767_vm8, %v5824_v16, 0.0 }
 0x564   : > { %5102 = vpow2.f32 %v1024_v24  ;;  %1031 = vadd.xlane.f32.xlu2 %v1030_v26 }
 0x567   : > { %1126 = vmax.xlane.f32.xlu0 %v1125_v60  ;;  %v1014_v29 = vpop.xlane.xlu2 %1013 }
 0x568   : > { %v1020_v10 = vsub.f32 %v5768_v36, %v1014_v29  ;;  %v5879_v36 = vadd.f32 %v1119_v14, %v5693_v30  ;;  %v5891_v29 = vadd.f32 %v5820_v11, %v5693_v30 }
 0x56a   : > { %v5836_v32 = vpop.eup %5102  ;;  %v1026_v21 = vmul.f32 1.442695, %v1020_v10  ;;  %v1131_v60 = vsel %vm767_vm8, %v5879_v36, -inf }
 0x56b   : > { %v1033_v1 = vsel %vm767_vm8, %v5836_v32, 0.0 }
 0x56c   : > { %1034 = vadd.xlane.f32.xlu1 %v1033_v1  ;;  %897 = vmax.xlane.f32.xlu2 %v896_v15  ;;  %v899_v15 = vsel %vm767_vm8, %v5891_v29, -inf }
 0x56f   : > { %v1017_v41 = vpop.xlane.xlu1 %1016  ;;  %1129 = vmax.xlane.f32.xlu0 %v1128_v37  ;;  %v937_v42 = vpop.permute.xlu2 %936 }
 0x570   : > { %955 = vmatpush.bf16.msra.mxu3 %v937_v42  ;;  %v1344_v37 = vpop.f32.mrf.mxu2 }
 0x571   : > { %v5904_v11 = vadd.f32 %v1344_v37, %v5674_v12 }
 0x574   : > { %1186 = vmatpush.bf16.msrb.mxu3 %v1171_v44  ;;  %891 = vmax.xlane.f32.xlu1 %v890_v46  ;;  %v1354_v46 = vsel %vm767_vm8, %v5904_v11, -inf }
 0x577   : > { %v794_v48 = vpop.xlane.xlu1 %793 }
 0x578   : > { %5104 = vrcp.f32 %v794_v48  ;;  %v1346_v44 = vpop.f32.mrf.mxu2 }
 0x579   : > { %v5909_v48 = vadd.f32 %v1346_v44, %v5684_v22 }
 0x57e   : > { %v5105_v53 = vpop.eup %5104 }
 0x57f   : > { %v797_v49 = vpop.xlane.xlu1 %796  ;;  %v808_v38 = vmul.f32 %v5105_v53, %v5779_v51  ;;  %v1021_v51 = vsub.f32 %v5774_v45, %v1017_v41  ;;  %v5899_v41 = vadd.f32 %v5822_v55, %v5674_v12  ;;  %v1357_v55 = vsel %vm767_vm8, %v5909_v48, -inf }
 0x580   : > { %5106 = vrcp.f32 %v797_v49  ;;  %v1349_v53 = vpop.f32.mrf.mxu2 }
 0x581   : > { %v1028_v5 = vmul.f32 1.442695, %v1021_v51  ;;  %v1122_v42 = vsel %vm767_vm8, %v5899_v41, -inf }
 0x584   : > { %1168 = vrot.lane.b32.xlu2 %v5660_v9, %s5380_s5 }
 0x586   : > { %v5107_v56 = vpop.eup %5106 }
 0x587   : > { %v809_v43 = vmul.f32 %v5107_v56, %v5785_v57  ;;  %v1243_v61 = vpop.xlane.xlu1 %1242 }
 0x588   : > { %v1251_v54 = vsub.f32 %v5794_v59, %v1243_v61 }
 0x589   : > { %v812_v62 = vpack.c.bf16 %v809_v43, %v808_v38  ;;  %v5916_v43 = vadd.f32 %v1349_v53, %v5688_v25 }
 0x58a   : > { %v1256_v63 = vmul.f32 1.442695, %v1251_v54 }
 0x58b   : > { %4225 = vmatmul.msk.bf16.vlgmr.msrb.gmra.mxu1 %vm767_vm8, %v812_v62 }
 0x58c   : > { %5108 = vpow2.f32 %v1256_v63  ;;  %v1351_v63 = vpop.f32.mrf.mxu2 }
 0x58d   : > { %1054 = vrot.lane.b32.xlu1 %v5654_v6, %s5381_s6 }
 0x58f   : > { %v5913_v56 = vpop.xlane.xlu1 %1245 }
 0x592   : > { %v5860_v0 = vpop.eup %5108 }
 0x593   : > { %v1265_v3 = vsel %vm767_vm8, %v5860_v0, 0.0 }
 0x594   : > { %v5864_v50 = vpop.xlane.xlu0 %1248  ;;  %1266 = vadd.xlane.f32.xlu0 %v1265_v3  ;;  %v1360_v3 = vsel %vm767_vm8, %v5916_v43, -inf }
 0x59c   : > { %v895_v57 = vpop.xlane.xlu0 %894 }
 0x59d   : > { %v903_v59 = vsub.f32 %v5809_v4, %v895_v57 }
 0x59f   : > { %v908_v8 = vmul.f32 1.442695, %v903_v59 }
 0x5a1   : > { %5110 = vpow2.f32 %v908_v8 }
 0x5a2   : > { %5112 = vpow2.f32 %v1028_v5  ;;  %v5923_v5 = vadd.f32 %v1351_v63, %v5693_v30 }
 0x5a3   : > { %5114 = vpow2.f32 %v1026_v21 }
 0x5a7   : > { %v5869_v13 = vpop.eup %5110 }
 0x5a8   : > { %v1240_v19 = vpop.xlane.xlu2 %1239  ;;  %v917_v20 = vsel %vm767_vm8, %v5869_v13, 0.0  ;;  %v5873_v18 = vpop.eup %5112 }
 0x5a9   : > { %918 = vadd.xlane.f32.xlu0 %v917_v20  ;;  %v1250_v45 = vsub.f32 %v5814_v7, %v1240_v19  ;;  %v1039_v4 = vsel %vm767_vm8, %v5873_v18, 0.0  ;;  %v5881_v26 = vpop.eup %5114 }
 0x5aa   : > { %v1036_v7 = vsel %vm767_vm8, %v5881_v26, 0.0 }
 0x5ab   : > { %v1254_v24 = vmul.f32 1.442695, %v1250_v45 }
 0x5ad   : > { %1040 = vadd.xlane.f32.xlu2 %v1039_v4  ;;  %5116 = vpow2.f32 %v1254_v24 }
 0x5af   : > { %v1053_v49 = vpop.permute.xlu0 %1052 }
 0x5b3   : > { %v5887_v28 = vpop.eup %5116 }
 0x5b4   : > { %v1262_v1 = vsel %vm767_vm8, %v5887_v28, 0.0 }
 0x5b5   : > { %1132 = vmax.xlane.f32.xlu2 %v1131_v60 }
 0x5b7   : > { %1037 = vadd.xlane.f32.xlu1 %v1036_v7 }
 0x5bd   : > { %1263 = vadd.xlane.f32.xlu2 %v1262_v1 }
 0x5bf   : > { %900 = vmax.xlane.f32.xlu1 %v899_v15 }
 0x5c7   : > { %1123 = vmax.xlane.f32.xlu1 %v1122_v42 }
 0x5cf   : > { %1355 = vmax.xlane.f32.xlu1 %v1354_v46 }
 0x5d7   : > { %1358 = vmax.xlane.f32.xlu1 %v1357_v55  ;;  %v1032_v38 = vpop.xlane.xlu2 %1031 }
 0x5da   : > { %v1127_v61 = vpop.xlane.xlu0 %1126 }
 0x5db   : > { %v1135_v54 = vsub.f32 %v5827_v23, %v1127_v61  ;;  %v1363_v23 = vsel %vm767_vm8, %v5923_v5, -inf }
 0x5dd   : > { %v1140_v62 = vmul.f32 1.442695, %v1135_v54 }
 0x5df   : > { %5118 = vpow2.f32 %v1140_v62  ;;  %v1035_v51 = vpop.xlane.xlu1 %1034  ;;  %1361 = vmax.xlane.f32.xlu1 %v1360_v3  ;;  %v898_v57 = vpop.xlane.xlu2 %897 }
 0x5e0   : > { %v904_v59 = vsub.f32 %v5834_v17, %v898_v57 }
 0x5e2   : > { %v910_v8 = vmul.f32 1.442695, %v904_v59  ;;  %v1130_v57 = vpop.xlane.xlu0 %1129 }
 0x5e4   : > { %5120 = vpow2.f32 %v910_v8 }
 0x5e5   : > { %v5925_v10 = vpop.eup %5118 }
 0x5e6   : > { %v1149_v19 = vsel %vm767_vm8, %v5925_v10, 0.0 }
 0x5e7   : > { %v892_v20 = vpop.xlane.xlu1 %891  ;;  %1364 = vmax.xlane.f32.xlu1 %v1363_v23  ;;  %1150 = vadd.xlane.f32.xlu2 %v1149_v19  ;;  %v1169_v21 = vpop.permute.xlu2 %1168 }
 0x5e8   : > { %v902_v45 = vsub.f32 %v5848_v40, %v892_v20  ;;  %1187 = vmatpush.bf16.msrb.mxu3 %v1169_v21 }
 0x5ea   : > { %v5932_v17 = vpop.eup %5120  ;;  %v906_v4 = vmul.f32 1.442695, %v902_v45 }
 0x5eb   : > { %v920_v14 = vsel %vm767_vm8, %v5932_v17, 0.0 }
 0x5ec   : > { %5122 = vpow2.f32 %v906_v4  ;;  %921 = vadd.xlane.f32.xlu0 %v920_v14 }
 0x5ed   : > { %5124 = vrcp.f32 %v1035_v51 }
 0x5ee   : > { %5126 = vrcp.f32 %v1032_v38 }
 0x5f2   : > { %v5936_v24 = vpop.eup %5122 }
 0x5f3   : > { %v914_v60 = vsel %vm767_vm8, %v5936_v24, 0.0  ;;  %v5125_v7 = vpop.eup %5124 }
 0x5f4   : > { %915 = vadd.xlane.f32.xlu1 %v914_v60  ;;  %v5127_v40 = vpop.eup %5126  ;;  %v1047_v15 = vmul.f32 %v5125_v7, %v5836_v32 }
 0x5f5   : > { %v1046_v37 = vmul.f32 %v5127_v40, %v5824_v16 }
 0x5f7   : > { %v1050_v42 = vpack.c.bf16 %v1047_v15, %v1046_v37 }
 0x5ff   : > { %v1055_v1 = vpop.permute.xlu1 %1054 }
 0x600   : > { %1070 = vmatpush.bf16.msra.mxu1 %v1055_v1 }
 0x604   : > { %1071 = vmatpush.bf16.msra.mxu1 %v1053_v49 }
 0x607   : > { %4233 = vmatmul.msk.bf16.vlgmr.msra.gmra.mxu1 %vm767_vm8, %v1050_v42  ;;  %v5978_v42 = vpop.xlane.xlu0 %1266 }
 0x620   : > { %v1041_v44 = vpop.xlane.xlu2 %1040 }
 0x621   : > { %5128 = vrcp.f32 %v1041_v44 }
 0x627   : > { %v5129_v38 = vpop.eup %5128 }
 0x628   : > { %v1133_v46 = vpop.xlane.xlu2 %1132  ;;  %v1049_v16 = vmul.f32 %v5129_v38, %v5873_v18  ;;  %v1136_v18 = vsub.f32 %v5839_v33, %v1130_v57 }
 0x629   : > { %v1137_v53 = vsub.f32 %v5879_v36, %v1133_v46  ;;  %v919_v46 = vpop.xlane.xlu0 %918 }
 0x62a   : > { %v1038_v55 = vpop.xlane.xlu1 %1037  ;;  %v1142_v19 = vmul.f32 1.442695, %v1136_v18 }
 0x62b   : > { %v1144_v61 = vmul.f32 1.442695, %v1137_v53  ;;  %5130 = vrcp.f32 %v1038_v55 }
 0x62d   : > { %5132 = vpow2.f32 %v1144_v61 }
 0x631   : > { %v5131_v54 = vpop.eup %5130 }
 0x632   : > { %v901_v62 = vpop.xlane.xlu1 %900  ;;  %v1048_v32 = vmul.f32 %v5131_v54, %v5881_v26 }
 0x633   : > { %v5946_v49 = vpop.eup %5132  ;;  %v905_v63 = vsub.f32 %v5891_v29, %v901_v62 }
 0x634   : > { %v1155_v3 = vsel %vm767_vm8, %v5946_v49, 0.0  ;;  %v1051_v51 = vpack.c.bf16 %v1049_v16, %v1048_v32 }
 0x635   : > { %v912_v36 = vmul.f32 1.442695, %v905_v63  ;;  %1156 = vadd.xlane.f32.xlu2 %v1155_v3 }
 0x636   : > { %4234 = vmatmul.msk.bf16.gmra.mxu1 %vm767_vm8, %v1051_v51 }
 0x637   : > { %5134 = vpow2.f32 %v912_v36  ;;  %v5999_v36 = vpop.f32.mrf.mxu1 }
 0x63a   : > { %v1124_v59 = vpop.xlane.xlu1 %1123 }
 0x63b   : > { %v1134_v8 = vsub.f32 %v5899_v41, %v1124_v59 }
 0x63d   : > { %v5953_v26 = vpop.eup %5134  ;;  %v1138_v23 = vmul.f32 1.442695, %v1134_v8 }
 0x63e   : > { %v923_v29 = vsel %vm767_vm8, %v5953_v26, 0.0 }
 0x63f   : > { %5136 = vpow2.f32 %v1138_v23  ;;  %924 = vadd.xlane.f32.xlu1 %v923_v29  ;;  %v6007_v8 = vpop.f32.mrf.mxu1 }
 0x640   : > { %5138 = vpow2.f32 %v1142_v19 }
 0x642   : > { %v1356_v20 = vpop.xlane.xlu1 %1355 }
 0x643   : > { %v1366_v45 = vsub.f32 %v5904_v11, %v1356_v20  ;;  %v1264_v20 = vpop.xlane.xlu2 %1263 }
 0x645   : > { %v5958_v21 = vpop.eup %5136  ;;  %v1370_v4 = vmul.f32 1.442695, %v1366_v45 }
 0x646   : > { %v1146_v41 = vsel %vm767_vm8, %v5958_v21, 0.0  ;;  %v5963_v33 = vpop.eup %5138 }
 0x647   : > { %1147 = vadd.xlane.f32.xlu0 %v1146_v41  ;;  %5140 = vpow2.f32 %v1370_v4  ;;  %v1152_v1 = vsel %vm767_vm8, %v5963_v33, 0.0 }
 0x64a   : > { %v1359_v14 = vpop.xlane.xlu1 %1358 }
 0x64b   : > { %v1367_v60 = vsub.f32 %v5909_v48, %v1359_v14 }
 0x64d   : > { %v1372_v7 = vmul.f32 1.442695, %v1367_v60  ;;  %1400 = vrot.lane.b32.xlu2 %v5660_v9, %s5384_s8  ;;  %v5970_v11 = vpop.eup %5140 }
 0x64e   : > { %v1378_v48 = vsel %vm767_vm8, %v5970_v11, 0.0 }
 0x64f   : > { %5142 = vpow2.f32 %v1372_v7  ;;  %1153 = vadd.xlane.f32.xlu0 %v1152_v1 }
 0x650   : > { %5144 = vrcp.f32 %v919_v46 }
 0x652   : > { %v1362_v15 = vpop.xlane.xlu1 %1361 }
 0x653   : > { %v1368_v3 = vsub.f32 %v5916_v43, %v1362_v15 }
 0x655   : > { %v5972_v40 = vpop.eup %5142 }
 0x656   : > { %v1381_v37 = vsel %vm767_vm8, %v5972_v40, 0.0  ;;  %v5145_v38 = vpop.eup %5144 }
 0x657   : > { %1382 = vadd.xlane.f32.xlu1 %v1381_v37  ;;  %1379 = vadd.xlane.f32.xlu0 %v1378_v48  ;;  %v931_v62 = vmul.f32 %v5145_v38, %v5869_v13  ;;  %v1252_v13 = vsub.f32 %v5799_v34, %v5913_v56 }
 0x659   : > { %v1258_v51 = vmul.f32 1.442695, %v1252_v13 }
 0x65a   : > { %v1365_v44 = vpop.xlane.xlu1 %1364  ;;  %v1151_v1 = vpop.xlane.xlu2 %1150 }
 0x65b   : > { %v1369_v53 = vsub.f32 %v5923_v5, %v1365_v44 }
 0x65d   : > { %v1376_v61 = vmul.f32 1.442695, %v1369_v53 }
 0x65f   : > { %v922_v23 = vpop.xlane.xlu0 %921 }
 0x667   : > { %v916_v55 = vpop.xlane.xlu1 %915 }
 0x668   : > { %5146 = vrcp.f32 %v916_v55 }
 0x669   : > { %5148 = vpow2.f32 %v1376_v61 }
 0x66b   : > { %1286 = vrot.lane.b32.xlu0 %v5654_v6, %s5383_s7 }
 0x66e   : > { %v5147_v54 = vpop.eup %5146 }
 0x66f   : > { %v930_v32 = vmul.f32 %v5147_v54, %v5936_v24  ;;  %v5987_v63 = vpop.eup %5148  ;;  %v1374_v24 = vmul.f32 1.442695, %v1368_v3 }
 0x670   : > { %1402 = vrot.lane.b32.xlu1 %v5654_v6, %s5384_s8  ;;  %v1387_v5 = vsel %vm767_vm8, %v5987_v63, 0.0  ;;  %v1253_v6 = vsub.f32 %v5804_v2, %v5864_v50 }
 0x671   : > { %v934_v16 = vpack.c.bf16 %v931_v62, %v930_v32  ;;  %5150 = vpow2.f32 %v1374_v24 }
 0x672   : > { %5152 = vpow2.f32 %v1258_v51  ;;  %v1260_v57 = vmul.f32 1.442695, %v1253_v6 }
 0x673   : > { %4229 = vmatmul.msk.bf16.vlgmr.msra.gmra.mxu3 %vm767_vm8, %v934_v16  ;;  %1284 = vrot.lane.b32.xlu0 %v5660_v9, %s5383_s7 }
 0x674   : > { %5154 = vpow2.f32 %v1260_v57 }
 0x675   : > { %5156 = vrcp.f32 %v922_v23 }
 0x676   : > { %1388 = vadd.xlane.f32.xlu2 %v1387_v5 }
 0x677   : > { %v6001_v9 = vpop.eup %5150 }
 0x678   : > { %v6003_v59 = vpop.eup %5152  ;;  %v1384_v43 = vsel %vm767_vm8, %v6001_v9, 0.0 }
 0x679   : > { %v1268_v34 = vsel %vm767_vm8, %v6003_v59, 0.0 }
 0x67a   : > { %v6011_v2 = vpop.eup %5154 }
 0x67b   : > { %v1271_v50 = vsel %vm767_vm8, %v6011_v2, 0.0  ;;  %v5157_v45 = vpop.eup %5156 }
 0x67c   : > { %v932_v4 = vmul.f32 %v5157_v45, %v5932_v17 }
 0x684   : > { %v1073_v56 = vpop.f32.mrf.mxu1 }
 0x68c   : > { %v1075_v18 = vpop.f32.mrf.mxu1 }
 0x68d   : > { %v4978_v29 = vpack.i.bf16 %v1075_v18, %v1073_v56 }
 0x69a   : > { %1385 = vadd.xlane.f32.xlu1 %v1384_v43 }
 0x69d   : > { %1269 = vadd.xlane.f32.xlu0 %v1268_v34 }
 0x6a2   : > { %1272 = vadd.xlane.f32.xlu1 %v1271_v50 }
 0x6a8   : > { %v1157_v55 = vpop.xlane.xlu2 %1156 }
 0x6b0   : > { %v1401_v51 = vpop.permute.xlu2 %1400 }
 0x6b1   : > { %4979 = vrot.lane.b32.xlu0 %v4978_v29, %s7269_s9 }
 0x6b2   : > { %v925_v19 = vpop.xlane.xlu1 %924 }
 0x6b3   : > { %5158 = vrcp.f32 %v925_v19 }
 0x6b9   : > { %v5159_v41 = vpop.eup %5158 }
 0x6ba   : > { %v933_v14 = vmul.f32 %v5159_v41, %v5953_v26  ;;  %v1148_v60 = vpop.xlane.xlu0 %1147 }
 0x6bb   : > { %5160 = vrcp.f32 %v1148_v60 }
 0x6bc   : > { %v935_v7 = vpack.c.bf16 %v933_v14, %v932_v4  ;;  %5162 = vrcp.f32 %v1151_v1 }
 0x6be   : > { %4230 = vmatmul.msk.bf16.gmra.mxu3 %vm767_vm8, %v935_v7 }
 0x6c1   : > { %v5161_v15 = vpop.eup %5160 }
 0x6c2   : > { %v5163_v37 = vpop.eup %5162  ;;  %v1162_v48 = vmul.f32 %v5161_v15, %v5958_v21  ;;  %v1154_v46 = vpop.xlane.xlu0 %1153 }
 0x6c3   : > { %v1163_v44 = vmul.f32 %v5163_v37, %v5925_v10  ;;  %5164 = vrcp.f32 %v1154_v46  ;;  %v1078_v37 = vpop.f32.mrf.mxu1 }
 0x6c4   : > { %5166 = vrcp.f32 %v1157_v55 }
 0x6c5   : > { %v1166_v53 = vpack.c.bf16 %v1163_v44, %v1162_v48  ;;  %5168 = vrcp.f32 %v1264_v20 }
 0x6c6   : > { %5170 = vrcp.f32 %v5978_v42 }
 0x6c9   : > { %v5165_v17 = vpop.eup %5164 }
 0x6ca   : > { %v1380_v26 = vpop.xlane.xlu0 %1379  ;;  %v5167_v61 = vpop.eup %5166  ;;  %v1164_v38 = vmul.f32 %v5165_v17, %v5963_v33 }
 0x6cb   : > { %v1383_v54 = vpop.xlane.xlu1 %1382  ;;  %v1165_v62 = vmul.f32 %v5167_v61, %v5946_v49  ;;  %v5169_v32 = vpop.eup %5168 }
 0x6cc   : > { %5172 = vrcp.f32 %v1383_v54  ;;  %v5171_v16 = vpop.eup %5170  ;;  %v1278_v3 = vmul.f32 %v5169_v32, %v5887_v28 }
 0x6cd   : > { %v1167_v21 = vpack.c.bf16 %v1165_v62, %v1164_v38  ;;  %5174 = vrcp.f32 %v1380_v26  ;;  %v1279_v24 = vmul.f32 %v5171_v16, %v5860_v0 }
 0x6ce   : > { %4237 = vmatmul.msk.bf16.vlgmr.msrb.gmra.mxu3 %vm767_vm8, %v1166_v53 }
 0x6cf   : > { %v1282_v42 = vpack.c.bf16 %v1279_v24, %v1278_v3  ;;  %v4804_v3 = vld [vmem:[%s7265_s1 + $0xb8] sm:$0xff]  ;;  %v4801_v24 = vld [vmem:[%s7265_s1 + $0xa0] sm:$0xff] }
 0x6d0   : > { %1580 = vmatpush.bf16.msra.mxu0 %v4804_v3 }
 0x6d2   : > { %v5173_v33 = vpop.eup %5172 }
 0x6d3   : > { %v5175_v13 = vpop.eup %5174  ;;  %v1395_v6 = vmul.f32 %v5173_v33, %v5972_v40  ;;  %v4803_v33 = vld [vmem:[%s7265_s1 + $0xb0] sm:$0xff] }
 0x6d4   : > { %v1394_v57 = vmul.f32 %v5175_v13, %v5970_v11  ;;  %1581 = vmatpush.bf16.msra.mxu0 %v4803_v33  ;;  %v4802_v13 = vld [vmem:[%s7265_s1 + $0xa8] sm:$0xff] }
 0x6d6   : > { %v1398_v43 = vpack.c.bf16 %v1395_v6, %v1394_v57 }
 0x6d8   : > { %1582 = vmatpush.bf16.msra.mxu0 %v4802_v13 }
 0x6dc   : > { %1583 = vmatpush.bf16.msra.mxu0 %v4801_v24  ;;  %v420_v24 = vld [vmem:[%s7267_s3 + $0x13a] ss:$0 sm:$0xff] }
 0x6dd   : > { %v1287_v10 = vpop.permute.xlu0 %1286 }
 0x6de   : > { %4238 = vmatmul.msk.bf16.gmra.mxu3 %vm767_vm8, %v1167_v21  ;;  %1302 = vmatpush.bf16.msrb.mxu1 %v1287_v10 }
 0x6e2   : > { %v1403_v5 = vpop.permute.xlu1 %1402 }
 0x6e3   : > { %1418 = vmatpush.bf16.msra.mxu3 %v1403_v5 }
 0x6e5   : > { %v1285_v49 = vpop.permute.xlu0 %1284 }
 0x6e6   : > { %1303 = vmatpush.bf16.msrb.mxu1 %v1285_v49  ;;  %v4800_v49 = vld [vmem:[%s7265_s1 + $0x98] sm:$0xff] }
 0x6e7   : > { %1419 = vmatpush.bf16.msra.mxu3 %v1401_v51  ;;  %1584 = vmatpush.bf16.msra.mxu0 %v4800_v49  ;;  %v4799_v51 = vld [vmem:[%s7265_s1 + $0x90] sm:$0xff] }
 0x6e9   : > { %4241 = vmatmul.msk.bf16.vlgmr.msrb.gmra.mxu1 %vm767_vm8, %v1282_v42  ;;  %v1389_v0 = vpop.xlane.xlu2 %1388 }
 0x6ea   : > { %5176 = vrcp.f32 %v1389_v0 }
 0x6eb   : > { %1585 = vmatpush.bf16.msra.mxu0 %v4799_v51 }
 0x6ee   : > { %4245 = vmatmul.msk.bf16.vlgmr.msra.gmra.mxu3 %vm767_vm8, %v1398_v43 }
 0x6f0   : > { %v5177_v23 = vpop.eup %5176 }
 0x6f1   : > { %v1397_v19 = vmul.f32 %v5177_v23, %v5987_v63  ;;  %v1080_v63 = vpop.f32.mrf.mxu1 }
 0x6f2   : > { %v5008_v26 = vpack.i.bf16 %v1080_v63, %v1078_v37 }
 0x6f6   : > { %v957_v28 = vpop.f32.mrf.mxu3 }
 0x6fe   : > { %v959_v34 = vpop.f32.mrf.mxu3 }
 0x6ff   : > { %v4983_v50 = vpack.i.bf16 %v959_v34, %v957_v28 }
 0x701   : > { %4984 = vrot.lane.b32.xlu2 %v4983_v50, %s5386_s10 }
 0x70d   : > { %v1386_v56 = vpop.xlane.xlu1 %1385 }
 0x70e   : > { %5178 = vrcp.f32 %v1386_v56 }
 0x710   : > { %v1270_v18 = vpop.xlane.xlu0 %1269 }
 0x711   : > { %5180 = vrcp.f32 %v1270_v18 }
 0x714   : > { %v5179_v40 = vpop.eup %5178 }
 0x715   : > { %v1273_v11 = vpop.xlane.xlu1 %1272  ;;  %v1396_v29 = vmul.f32 %v5179_v40, %v6001_v9 }
 0x716   : > { %5182 = vrcp.f32 %v1273_v11 }
 0x717   : > { %v1399_v20 = vpack.c.bf16 %v1397_v19, %v1396_v29  ;;  %v5181_v45 = vpop.eup %5180 }
 0x718   : > { %v1280_v4 = vmul.f32 %v5181_v45, %v6003_v59 }
 0x719   : > { %4246 = vmatmul.msk.bf16.gmra.mxu3 %vm767_vm8, %v1399_v20 }
 0x71c   : > { %v5183_v41 = vpop.eup %5182 }
 0x71d   : > { %v1281_v14 = vmul.f32 %v5183_v41, %v6011_v2 }
 0x71f   : > { %v1283_v60 = vpack.c.bf16 %v1281_v14, %v1280_v4 }
 0x721   : > { %4242 = vmatmul.msk.bf16.gmra.mxu1 %vm767_vm8, %v1283_v60 }
 0x723   : > { %v4980_v43 = vpop.permute.xlu0 %4979 }
 0x724   : > { %v4982_v18 = vunpack.i.h.bf16 %v4980_v43  ;;  %v4981_v23 = vunpack.i.l.bf16 %v4980_v43 }
 0x741   : > { %v962_v7 = vpop.f32.mrf.mxu3 }
 0x749   : > { %v964_v1 = vpop.f32.mrf.mxu3 }
 0x74a   : > { %v5003_v46 = vpack.i.bf16 %v964_v1, %v962_v7 }
 0x751   : > { %v1189_v15 = vpop.f32.mrf.mxu3 }
 0x759   : > { %v1191_v9 = vpop.f32.mrf.mxu3 }
 0x75a   : > { %v4988_v48 = vpack.i.bf16 %v1191_v9, %v1189_v15 }
 0x75b   : > { %v4985_v42 = vpop.permute.xlu2 %4984 }
 0x75c   : > { %4989 = vrot.lane.b32.xlu1 %v4988_v48, %s5384_s8  ;;  %v4987_v6 = vunpack.i.h.bf16 %v4985_v42  ;;  %v4986_v57 = vunpack.i.l.bf16 %v4985_v42 }
 0x75e   : > { %v1512_v34 = vsel %vm735_vm3, %v6007_v8, %v4987_v6  ;;  %v1511_v50 = vsel %vm735_vm3, %v5999_v36, %v4986_v57 }
 0x75f   : > { %v1515_v11 = vsel %vm767_vm8, %v1511_v50, %v4981_v23  ;;  %v1516_v29 = vsel %vm767_vm8, %v1512_v34, %v4982_v18 }
 0x761   : > { %v1194_v44 = vpop.f32.mrf.mxu3 }
 0x764   : > { %5004 = vrot.lane.b32.xlu1 %v5003_v46, %s5386_s10 }
 0x766   : > { %v1305_v53 = vpop.f32.mrf.mxu1 }
 0x769   : > { %v1196_v59 = vpop.f32.mrf.mxu3 }
 0x76a   : > { %v5013_v54 = vpack.i.bf16 %v1196_v59, %v1194_v44 }
 0x76e   : > { %v1307_v55 = vpop.f32.mrf.mxu1 }
 0x76f   : > { %v4993_v2 = vpack.i.bf16 %v1307_v55, %v1305_v53 }
 0x771   : > { %4994 = vrot.lane.b32.xlu2 %v4993_v2, %s5383_s7  ;;  %v1421_v17 = vpop.f32.mrf.mxu3 }
 0x779   : > { %5009 = vrot.lane.b32.xlu2 %v5008_v26, %s7269_s9  ;;  %v1423_v61 = vpop.f32.mrf.mxu3 }
 0x77a   : > { %v4998_v38 = vpack.i.bf16 %v1423_v61, %v1421_v17 }
 0x77c   : > { %4999 = vrot.lane.b32.xlu0 %v4998_v38, %s5380_s5 }
 0x784   : > { %5014 = vrot.lane.b32.xlu0 %v5013_v54, %s5384_s8 }
 0x79c   : > { %v1426_v62 = vpop.f32.mrf.mxu3 }
 0x79e   : > { %v1310_v21 = vpop.f32.mrf.mxu1 }
 0x7a4   : > { %v1428_v10 = vpop.f32.mrf.mxu3 }
 0x7a5   : > { %v5023_v32 = vpack.i.bf16 %v1428_v10, %v1426_v62 }
 0x7a6   : > { %v1312_v16 = vpop.f32.mrf.mxu1 }
 0x7a7   : > { %v5018_v5 = vpack.i.bf16 %v1312_v16, %v1310_v21  ;;  %5024 = vrot.lane.b32.xlu2 %v5023_v32, %s5380_s5 }
 0x7a9   : > { %5019 = vrot.lane.b32.xlu1 %v5018_v5, %s5383_s7 }
 0x7cb   : > { %v4995_v40 = vpop.permute.xlu2 %4994 }
 0x7cc   : > { %v4997_v45 = vunpack.i.h.bf16 %v4995_v40  ;;  %v4996_v8 = vunpack.i.l.bf16 %v4995_v40 }
 0x7ce   : > { %v4990_v28 = vpop.permute.xlu1 %4989 }
 0x7cf   : > { %v4992_v0 = vunpack.i.h.bf16 %v4990_v28  ;;  %v4991_v56 = vunpack.i.l.bf16 %v4990_v28 }
 0x7d1   : > { %v1520_v19 = vsel %vm1519_vm10, %v1515_v11, %v4991_v56  ;;  %v1521_v20 = vsel %vm1519_vm10, %v1516_v29, %v4992_v0 }
 0x7d2   : > { %v1525_v14 = vsel %vm1524_vm11, %v1520_v19, %v4996_v8  ;;  %v1526_v60 = vsel %vm1524_vm11, %v1521_v20, %v4997_v45 }
 0x7d3   : > { %v5010_v37 = vpop.permute.xlu2 %5009 }
 0x7d4   : > { %v5012_v2 = vunpack.i.h.bf16 %v5010_v37  ;;  %v5011_v17 = vunpack.i.l.bf16 %v5010_v37 }
 0x7d6   : > { %v5005_v9 = vpop.permute.xlu1 %5004 }
 0x7d7   : > { %v5007_v48 = vunpack.i.h.bf16 %v5005_v9  ;;  %v5006_v63 = vunpack.i.l.bf16 %v5005_v9 }
 0x7d9   : > { %v1514_v46 = vsel %vm735_vm3, %v5791_v58, %v5007_v48  ;;  %v1513_v53 = vsel %vm735_vm3, %v5781_v52, %v5006_v63 }
 0x7da   : > { %v1517_v38 = vsel %vm767_vm8, %v1513_v53, %v5011_v17  ;;  %v1518_v54 = vsel %vm767_vm8, %v1514_v46, %v5012_v2  ;;  %v4845_v46 = vld [vmem:[%s7266_s2 + $0x80] sm:$0xf0]  ;;  %v4844_v53 = vld [vmem:[%s7266_s2 + $0x7c] sm:$0xf]  ;;  %v4343_v2 = vld [vmem:[%s7266_s2 + $0x80] sm:$0xf] }
 0x7db   : > { %v4846_v17 = vld [vmem:[%s7266_s2 + $0x88] sm:$0xf0] }
 0x7ee   : > { %v5000_v41 = vpop.permute.xlu0 %4999 }
 0x7ef   : > { %v5002_v36 = vunpack.i.h.bf16 %v5000_v41  ;;  %v5001_v4 = vunpack.i.l.bf16 %v5000_v41 }
 0x7f1   : > { %v1530_v7 = vsel %vm1529_vm12, %v1525_v14, %v5001_v4  ;;  %v1531_v1 = vsel %vm1529_vm12, %v1526_v60, %v5002_v36 }
 0x7f2   : > { %v1534_v15 = vpack.c.bf16 %v1531_v1, %v1530_v7 }
 0x7f4   : > { %4271 = vmatmul.msk.bf16.vlgmr.msra.gmra.mxu0 %vm426_vm5, %v1534_v15 }
 0x7f6   : > { %v5015_v44 = vpop.permute.xlu0 %5014 }
 0x7f7   : > { %v5017_v59 = vunpack.i.h.bf16 %v5015_v44  ;;  %v5016_v55 = vunpack.i.l.bf16 %v5015_v44  ;;  %v4335_v44 = vld [vmem:[%s7266_s2 + $0x78] sm:$0xf] }
 0x7f9   : > { %v1522_v10 = vsel %vm1519_vm10, %v1517_v38, %v5016_v55  ;;  %v1523_v32 = vsel %vm1519_vm10, %v1518_v54, %v5017_v59  ;;  %v4336_v59 = vor.u32 %v4845_v46, %v4335_v44  ;;  %v4337_v55 = vld [vmem:[%s7266_s2 + $0x84] sm:$0xf0]  ;;  %v4323_v38 = vld [vmem:[%s7266_s2 + $0x60] sm:$0xf]  ;;  %v4842_v54 = vld [vmem:[%s7266_s2 + $0x68] sm:$0xf0] }
 0x7fa   : > { %v4277_v46 = vld [vmem:[%s7266_s2 + $0xc] sm:$0xf0] }
 0x7fb   : > { %1814 = vmatpush.bf16.msra.mxu1 %v4336_v59 }
 0x801   : > { %v5025_v26 = vpop.permute.xlu2 %5024 }
 0x802   : > { %v5027_v58 = vunpack.i.h.bf16 %v5025_v26  ;;  %v5026_v16 = vunpack.i.l.bf16 %v5025_v26  ;;  %v4340_v26 = vor.u32 %v4844_v53, %v4337_v55  ;;  %v4283_v53 = vld [vmem:[%s7266_s2 + $0x8] sm:$0xf]  ;;  %v4831_v55 = vld [vmem:[%s7266_s2 + $0x10] sm:$0xf0] }
 0x804   : > { %1833 = vmatpush.bf16.msrb.mxu2 %v4340_v26 }
 0x81b   : > { %v5020_v61 = vpop.permute.xlu1 %5019 }
 0x81c   : > { %v5022_v62 = vunpack.i.h.bf16 %v5020_v61  ;;  %v5021_v21 = vunpack.i.l.bf16 %v5020_v61  ;;  %v4344_v61 = vor.u32 %v4846_v17, %v4343_v2  ;;  %v4284_v2 = vor.u32 %v4831_v55, %v4283_v53 }
 0x81e   : > { %v1527_v52 = vsel %vm1524_vm11, %v1522_v10, %v5021_v21  ;;  %v1528_v5 = vsel %vm1524_vm11, %v1523_v32, %v5022_v62  ;;  %1852 = vmatpush.bf16.msrb.mxu3 %v4344_v61  ;;  %v4841_v62 = vld [vmem:[%s7266_s2 + $0x64] sm:$0xf]  ;;  %v4324_v21 = vor.u32 %v4842_v54, %v4323_v38  ;;  %v4325_v10 = vld [vmem:[%s7266_s2 + $0x6c] sm:$0xf0]  ;;  %v4331_v32 = vld [vmem:[%s7266_s2 + $0x68] sm:$0xf] }
 0x81f   : > { %v1532_v3 = vsel %vm1529_vm12, %v1527_v52, %v5026_v16  ;;  %v1533_v33 = vsel %vm1529_vm12, %v1528_v5, %v5027_v58  ;;  %v4843_v58 = vld [vmem:[%s7266_s2 + $0x70] sm:$0xf0]  ;;  %v4328_v16 = vor.u32 %v4841_v62, %v4325_v10  ;;  %v4311_v5 = vld [vmem:[%s7266_s2 + $0x48] sm:$0xf] }
 0x820   : > { %v1535_v13 = vpack.c.bf16 %v1533_v33, %v1532_v3  ;;  %v4332_v52 = vor.u32 %v4843_v58, %v4331_v32  ;;  %1815 = vmatpush.bf16.msra.mxu1 %v4324_v21  ;;  %v4839_v3 = vld [vmem:[%s7266_s2 + $0x50] sm:$0xf0]  ;;  %v4838_v33 = vld [vmem:[%s7266_s2 + $0x4c] sm:$0xf] }
 0x821   : > { %1834 = vmatpush.bf16.msrb.mxu2 %v4328_v16 }
 0x822   : > { %4272 = vmatmul.msk.bf16.gmra.mxu0 %vm426_vm5, %v1535_v13  ;;  %1853 = vmatpush.bf16.msrb.mxu3 %v4332_v52  ;;  %v4312_v13 = vor.u32 %v4839_v3, %v4311_v5 }
 0x824   : > { %1816 = vmatpush.bf16.msra.mxu1 %v4312_v13 }
 0x871   : > { %v1587_v49 = vpop.f32.mrf.mxu0 }
 0x872   : > { %v1597_v51 = vadd.f32 %v1587_v49, %v5507_v27  ;;  %v4319_v49 = vld [vmem:[%s7266_s2 + $0x50] sm:$0xf] }
 0x874   : > { %v6095_v42 = vadd.f32 %v1597_v51, %v420_v24  ;;  %v4840_v51 = vld [vmem:[%s7266_s2 + $0x58] sm:$0xf0] }
 0x876   : > { %v1605_v6 = vsel %vm426_vm5, %v6095_v42, 0.0 }
 0x877   : > { %1606 = vadd.xlane.f32.xlu0 %v1605_v6 }
 0x879   : > { %v1589_v57 = vpop.f32.mrf.mxu0 }
 0x87a   : > { %v1598_v43 = vadd.f32 %v1589_v57, %v5514_v31  ;;  %v4320_v57 = vor.u32 %v4840_v51, %v4319_v49 }
 0x87c   : > { %v6100_v28 = vadd.f32 %v1598_v43, %v420_v24  ;;  %1854 = vmatpush.bf16.msrb.mxu3 %v4320_v57  ;;  %v4299_v43 = vld [vmem:[%s7266_s2 + $0x30] sm:$0xf] }
 0x87e   : > { %v1608_v34 = vsel %vm426_vm5, %v6100_v28, 0.0 }
 0x87f   : > { %1609 = vadd.xlane.f32.xlu1 %v1608_v34  ;;  %v4836_v34 = vld [vmem:[%s7266_s2 + $0x38] sm:$0xf0] }
 0x89f   : > { %v1592_v50 = vpop.f32.mrf.mxu0 }
 0x8a0   : > { %v1599_v0 = vadd.f32 %v1592_v50, %v5521_v35  ;;  %v4835_v50 = vld [vmem:[%s7266_s2 + $0x34] sm:$0xf] }
 0x8a2   : > { %v6105_v56 = vadd.f32 %v1599_v0, %v420_v24  ;;  %v4300_v0 = vor.u32 %v4836_v34, %v4299_v43  ;;  %v422_v43 = vld [vmem:[%s7267_s3 + $0x13c] ss:$0 sm:$0xff] }
 0x8a4   : > { %v1611_v27 = vsel %vm426_vm5, %v6105_v56, 0.0  ;;  %1817 = vmatpush.bf16.msra.mxu1 %v4300_v0 }
 0x8a5   : > { %1612 = vadd.xlane.f32.xlu2 %v1611_v27  ;;  %v4301_v27 = vld [vmem:[%s7266_s2 + $0x3c] sm:$0xf0] }
 0x8a7   : > { %v1594_v18 = vpop.f32.mrf.mxu0 }
 0x8a8   : > { %v1600_v23 = vadd.f32 %v1594_v18, %v5528_v39  ;;  %v4307_v18 = vld [vmem:[%s7266_s2 + $0x38] sm:$0xf] }
 0x8aa   : > { %v6110_v40 = vadd.f32 %v1600_v23, %v420_v24  ;;  %v4313_v24 = vld [vmem:[%s7266_s2 + $0x54] sm:$0xf0]  ;;  %v4837_v23 = vld [vmem:[%s7266_s2 + $0x40] sm:$0xf0] }
 0x8ab   : > { %v4316_v6 = vor.u32 %v4838_v33, %v4313_v24  ;;  %v6256_v24 = vld [vmem:[%s7267_s3 + $0x13b] ss:$0 sm:$0xff] }
 0x8ac   : > { %v1614_v31 = vsel %vm426_vm5, %v6110_v40, 0.0 }
 0x8ad   : > { %1615 = vadd.xlane.f32.xlu0 %v1614_v31  ;;  %1835 = vmatpush.bf16.msrb.mxu2 %v4316_v6  ;;  %v4304_v31 = vor.u32 %v4835_v50, %v4301_v27 }
 0x8b1   : > { %1836 = vmatpush.bf16.msrb.mxu2 %v4304_v31  ;;  %v4812_v31 = vld [vmem:[%s7265_s1 + $0xf8] sm:$0xff] }
 0x8b2   : > { %2031 = vmatpush.bf16.msrb.mxu0 %v4812_v31 }
 0x8ea   : > { %v1607_v11 = vpop.xlane.xlu0 %1606 }
 0x8eb   : > { %v1617_v29 = vmul.f32 %v1607_v11, %v5532_v47  ;;  %v4308_v11 = vor.u32 %v4837_v23, %v4307_v18 }
 0x8ed   : > { %v6116_v35 = vsub.f32 %v6095_v42, %v1617_v29  ;;  %1855 = vmatpush.bf16.msrb.mxu3 %v4308_v11  ;;  %v4287_v29 = vld [vmem:[%s7266_s2 + $0x18] sm:$0xf] }
 0x8ee   : > { %v4820_v11 = vld [vmem:[%s7265_s1 + $0x138] sm:$0xff] }
 0x8ef   : > { %v1625_v19 = vmul.f32 %v6116_v35, %v6116_v35 }
 0x8f1   : > { %v1629_v20 = vsel %vm426_vm5, %v1625_v19, 0.0  ;;  %v4833_v19 = vld [vmem:[%s7266_s2 + $0x20] sm:$0xf0] }
 0x8f2   : > { %v1610_v45 = vpop.xlane.xlu1 %1609  ;;  %1630 = vadd.xlane.f32.xlu2 %v1629_v20  ;;  %v4832_v20 = vld [vmem:[%s7266_s2 + $0x1c] sm:$0xf] }
 0x8f3   : > { %v1618_v39 = vmul.f32 %v1610_v45, %v5532_v47  ;;  %v4288_v45 = vor.u32 %v4833_v19, %v4287_v29  ;;  %v4828_v19 = vld [vmem:[%s7265_s1 + $0x178] sm:$0xff] }
 0x8f5   : > { %v6123_v8 = vsub.f32 %v6100_v28, %v1618_v39  ;;  %v4289_v39 = vld [vmem:[%s7266_s2 + $0x24] sm:$0xf0]  ;;  %1818 = vmatpush.bf16.msra.mxu1 %v4288_v45  ;;  %v4819_v45 = vld [vmem:[%s7265_s1 + $0x130] sm:$0xff] }
 0x8f7   : > { %v1626_v41 = vmul.f32 %v6123_v8, %v6123_v8 }
 0x8f9   : > { %v1632_v36 = vsel %vm426_vm5, %v1626_v41, 0.0  ;;  %v4295_v41 = vld [vmem:[%s7266_s2 + $0x20] sm:$0xf] }
 0x8fa   : > { %1633 = vadd.xlane.f32.xlu1 %v1632_v36  ;;  %v4834_v36 = vld [vmem:[%s7266_s2 + $0x28] sm:$0xf0] }
 0x918   : > { %v1613_v4 = vpop.xlane.xlu2 %1612 }
 0x919   : > { %v1619_v14 = vmul.f32 %v1613_v4, %v5532_v47 }
 0x91b   : > { %v6130_v60 = vsub.f32 %v6105_v56, %v1619_v14  ;;  %v4292_v14 = vor.u32 %v4832_v20, %v4289_v39  ;;  %v4811_v20 = vld [vmem:[%s7265_s1 + $0xf0] sm:$0xff] }
 0x91c   : > { %2032 = vmatpush.bf16.msrb.mxu0 %v4811_v20 }
 0x91d   : > { %v1627_v7 = vmul.f32 %v6130_v60, %v6130_v60  ;;  %1837 = vmatpush.bf16.msrb.mxu2 %v4292_v14 }
 0x91f   : > { %v1635_v1 = vsel %vm426_vm5, %v1627_v7, 0.0  ;;  %v4296_v7 = vor.u32 %v4834_v36, %v4295_v41  ;;  %v4827_v36 = vld [vmem:[%s7265_s1 + $0x170] sm:$0xff] }
 0x920   : > { %1636 = vadd.xlane.f32.xlu0 %v1635_v1  ;;  %v1616_v15 = vpop.xlane.xlu0 %1615 }
 0x921   : > { %v1620_v37 = vmul.f32 %v1616_v15, %v5532_v47  ;;  %1856 = vmatpush.bf16.msrb.mxu3 %v4296_v7  ;;  %v4275_v15 = vld [vmem:[%s7266_s2] sm:$0xf]  ;;  %v4810_v7 = vld [vmem:[%s7265_s1 + $0xe8] sm:$0xff] }
 0x922   : > { %2033 = vmatpush.bf16.msrb.mxu0 %v4810_v7 }
 0x923   : > { %v6137_v9 = vsub.f32 %v6110_v40, %v1620_v37  ;;  %v4830_v37 = vld [vmem:[%s7266_s2 + $0x8] sm:$0xf0] }
 0x924   : > { %v4276_v44 = vor.u32 %v4830_v37, %v4275_v15  ;;  %v4826_v15 = vld [vmem:[%s7265_s1 + $0x168] sm:$0xff] }
 0x925   : > { %v1628_v48 = vmul.f32 %v6137_v9, %v6137_v9  ;;  %1857 = vmatpush.bf16.msrb.mxu3 %v4284_v2 }
 0x926   : > { %1819 = vmatpush.bf16.msra.mxu1 %v4276_v44 }
 0x927   : > { %v1638_v63 = vsel %vm426_vm5, %v1628_v48, 0.0  ;;  %v4829_v48 = vld [vmem:[%s7266_s2 + $0x4] sm:$0xf] }
 0x928   : > { %1639 = vadd.xlane.f32.xlu2 %v1638_v63  ;;  %v4280_v59 = vor.u32 %v4829_v48, %v4277_v46 }
 0x92a   : > { %1838 = vmatpush.bf16.msrb.mxu2 %v4280_v59  ;;  %2050 = vmatpush.bf16.msrb.mxu1 %v4820_v11 }
 0x92e   : > { %2069 = vmatpush.bf16.msra.mxu2 %v4828_v19  ;;  %2051 = vmatpush.bf16.msrb.mxu1 %v4819_v45 }
 0x932   : > { %2070 = vmatpush.bf16.msra.mxu2 %v4827_v36 }
 0x936   : > { %2071 = vmatpush.bf16.msra.mxu2 %v4826_v15 }
 0x965   : > { %v1631_v4 = vpop.xlane.xlu2 %1630 }
 0x966   : > { %v1641_v1 = vmul.f32 %v1631_v4, %v5532_v47 }
 0x968   : > { %v1645_v63 = vadd.f32 1e-05, %v1641_v1  ;;  %v4818_v1 = vld [vmem:[%s7265_s1 + $0x128] sm:$0xff] }
 0x969   : > { %2052 = vmatpush.bf16.msrb.mxu1 %v4818_v1 }
 0x96a   : > { %5184 = vrsqrt.f32 %v1645_v63  ;;  %vm1655_vm14 = vweird.f32 %v1645_v63 }
 0x96d   : > { %v1634_v17 = vpop.xlane.xlu1 %1633 }
 0x96e   : > { %v1642_v26 = vmul.f32 %v1634_v17, %v5532_v47 }
 0x970   : > { %v5185_v61 = vpop.eup %5184  ;;  %v1646_v38 = vadd.f32 1e-05, %v1642_v26 }
 0x971   : > { %v1650_v54 = vmul.f32 %v5185_v61, %v1645_v63  ;;  %vm1656_vm13 = vweird.f32 %v5185_v61  ;;  %v4809_v63 = vld [vmem:[%s7265_s1 + $0xe0] sm:$0xff] }
 0x972   : > { %5186 = vrsqrt.f32 %v1646_v38  ;;  %vm1657_vm15 = vmor %vm1655_vm14, %vm1656_vm13  ;;  %vm1665_vm1 = vweird.f32 %v1646_v38  ;;  %2034 = vmatpush.bf16.msrb.mxu0 %v4809_v63 }
 0x973   : > { %v1651_v62 = vmul.f32 %v5185_v61, %v1650_v54 }
 0x975   : > { %v1652_v21 = vmul.f32 0.5, %v1651_v62 }
 0x977   : > { %v1653_v10 = vsub.f32 1.5, %v1652_v21 }
 0x978   : > { %v5187_v32 = vpop.eup %5186 }
 0x979   : > { %v1654_v58 = vmul.f32 %v5185_v61, %v1653_v10  ;;  %v1660_v16 = vmul.f32 %v5187_v32, %v1646_v38  ;;  %vm1666_vm0 = vweird.f32 %v5187_v32 }
 0x97a   : > { %vm1667_vm2 = vmor %vm1665_vm1, %vm1666_vm0 }
 0x97b   : > { %v1661_v52 = vmul.f32 %v5187_v32, %v1660_v16  ;;  %v1658_v5 = vsel %vm1657_vm15, %v5185_v61, %v1654_v58  ;;  %v4825_v16 = vld [vmem:[%s7265_s1 + $0x160] sm:$0xff] }
 0x97c   : > { %v1689_v13 = vmul.f32 %v1658_v5, %v6116_v35  ;;  %2072 = vmatpush.bf16.msra.mxu2 %v4825_v16  ;;  %v4816_v5 = vld [vmem:[%s7265_s1 + $0x118] sm:$0xff] }
 0x97d   : > { %v1662_v3 = vmul.f32 0.5, %v1661_v52  ;;  %v4807_v52 = vld [vmem:[%s7265_s1 + $0xd0] sm:$0xff] }
 0x97e   : > { %v1693_v6 = vmul.f32 %v1689_v13, %v6256_v24  ;;  %v4815_v13 = vld [vmem:[%s7265_s1 + $0x110] sm:$0xff] }
 0x97f   : > { %v1663_v33 = vsub.f32 1.5, %v1662_v3  ;;  %v4824_v3 = vld [vmem:[%s7265_s1 + $0x158] sm:$0xff] }
 0x980   : > { %v1697_v35 = vadd.f32 %v1693_v6, %v422_v43  ;;  %2073 = vmatpush.bf16.msra.mxu2 %v4824_v3  ;;  %v4822_v6 = vld [vmem:[%s7265_s1 + $0x148] sm:$0xff] }
 0x981   : > { %v1664_v49 = vmul.f32 %v5187_v32, %v1663_v33  ;;  %v4806_v33 = vld [vmem:[%s7265_s1 + $0xc8] sm:$0xff] }
 0x983   : > { %v1668_v51 = vsel %vm1667_vm2, %v5187_v32, %v1664_v49  ;;  %v4805_v49 = vld [vmem:[%s7265_s1 + $0xc0] sm:$0xff] }
 0x984   : > { %v1690_v57 = vmul.f32 %v1668_v51, %v6123_v8  ;;  %v4814_v51 = vld [vmem:[%s7265_s1 + $0x108] sm:$0xff] }
 0x986   : > { %v1694_v34 = vmul.f32 %v1690_v57, %v6256_v24  ;;  %v4813_v57 = vld [vmem:[%s7265_s1 + $0x100] sm:$0xff] }
 0x988   : > { %v1698_v50 = vadd.f32 %v1694_v34, %v422_v43  ;;  %v4144_v34 = vld [vmem:[%s7267_s3 + $0x13d] ss:$8 sm:$0x7] }
 0x989   : > { %v1706_v11 = vperm.slane %v4144_v34, 2 }
 0x98a   : > { %v1701_v0 = vpack.c.bf16 %v1698_v50, %v1697_v35  ;;  %v1704_v50 = vperm.slane %v4144_v34, 0 }
 0x98c   : > { %4345 = vmatmul.msk.bf16.vlgmr.msra.gmra.mxu1 %vm426_vm5, %v1701_v0  ;;  %4347 = vmatmul.msk.bf16.vlgmr.msrb.gmra.mxu2 %vm426_vm5, %v1701_v0 }
 0x98d   : > { %4349 = vmatmul.msk.bf16.vlgmr.msrb.gmra.mxu3 %vm426_vm5, %v1701_v0 }
 0x993   : > { %v1637_v27 = vpop.xlane.xlu0 %1636 }
 0x994   : > { %v1643_v18 = vmul.f32 %v1637_v27, %v5532_v47 }
 0x996   : > { %v1647_v23 = vadd.f32 1e-05, %v1643_v18 }
 0x998   : > { %5188 = vrsqrt.f32 %v1647_v23  ;;  %vm1675_vm6 = vweird.f32 %v1647_v23 }
 0x99b   : > { %v1640_v8 = vpop.xlane.xlu2 %1639 }
 0x99c   : > { %v1644_v29 = vmul.f32 %v1640_v8, %v5532_v47  ;;  %v1705_v8 = vperm.slane %v4144_v34, 1 }
 0x99e   : > { %v5189_v39 = vpop.eup %5188  ;;  %v1648_v41 = vadd.f32 1e-05, %v1644_v29 }
 0x99f   : > { %v1670_v4 = vmul.f32 %v5189_v39, %v1647_v23  ;;  %vm1676_vm4 = vweird.f32 %v5189_v39 }
 0x9a0   : > { %5190 = vrsqrt.f32 %v1648_v41  ;;  %vm1677_vm7 = vmor %vm1675_vm6, %vm1676_vm4  ;;  %vm1685_vm13 = vweird.f32 %v1648_v41 }
 0x9a1   : > { %v1671_v14 = vmul.f32 %v5189_v39, %v1670_v4 }
 0x9a3   : > { %v1672_v37 = vmul.f32 0.5, %v1671_v14 }
 0x9a5   : > { %v1673_v48 = vsub.f32 1.5, %v1672_v37 }
 0x9a6   : > { %v5191_v44 = vpop.eup %5190 }
 0x9a7   : > { %v1674_v46 = vmul.f32 %v5189_v39, %v1673_v48  ;;  %v1680_v53 = vmul.f32 %v5191_v44, %v1648_v41  ;;  %vm1686_vm9 = vweird.f32 %v5191_v44 }
 0x9a8   : > { %vm1687_vm14 = vmor %vm1685_vm13, %vm1686_vm9 }
 0x9a9   : > { %v1681_v59 = vmul.f32 %v5191_v44, %v1680_v53  ;;  %v1678_v55 = vsel %vm1677_vm7, %v5189_v39, %v1674_v46 }
 0x9aa   : > { %v1691_v26 = vmul.f32 %v1678_v55, %v6130_v60  ;;  %v4808_v60 = vld [vmem:[%s7265_s1 + $0xd8] sm:$0xff] }
 0x9ab   : > { %v1682_v2 = vmul.f32 0.5, %v1681_v59  ;;  %2035 = vmatpush.bf16.msrb.mxu0 %v4808_v60 }
 0x9ac   : > { %v1695_v62 = vmul.f32 %v1691_v26, %v6256_v24 }
 0x9ad   : > { %v1683_v17 = vsub.f32 1.5, %v1682_v2 }
 0x9ae   : > { %v1699_v10 = vadd.f32 %v1695_v62, %v422_v43 }
 0x9af   : > { %v1684_v61 = vmul.f32 %v5191_v44, %v1683_v17  ;;  %2036 = vmatpush.bf16.msrb.mxu0 %v4807_v52 }
 0x9b1   : > { %v1688_v38 = vsel %vm1687_vm14, %v5191_v44, %v1684_v61 }
 0x9b2   : > { %v1692_v54 = vmul.f32 %v1688_v38, %v6137_v9  ;;  %v4817_v9 = vld [vmem:[%s7265_s1 + $0x120] sm:$0xff] }
 0x9b3   : > { %2053 = vmatpush.bf16.msrb.mxu1 %v4817_v9  ;;  %2037 = vmatpush.bf16.msrb.mxu0 %v4806_v33  ;;  %v425_v33 = vld [vmem:[%s7267_s3 + $0x13e] ss:$0 sm:$0xff] }
 0x9b4   : > { %v1696_v21 = vmul.f32 %v1692_v54, %v6256_v24  ;;  %v4823_v24 = vld [vmem:[%s7265_s1 + $0x150] sm:$0xff] }
 0x9b5   : > { %2074 = vmatpush.bf16.msra.mxu2 %v4823_v24 }
 0x9b6   : > { %v1700_v32 = vadd.f32 %v1696_v21, %v422_v43  ;;  %v4821_v43 = vld [vmem:[%s7265_s1 + $0x140] sm:$0xff] }
 0x9b7   : > { %2054 = vmatpush.bf16.msrb.mxu1 %v4816_v5  ;;  %2038 = vmatpush.bf16.msrb.mxu0 %v4805_v49 }
 0x9b8   : > { %v1702_v58 = vpack.c.bf16 %v1700_v32, %v1699_v10 }
 0x9b9   : > { %2075 = vmatpush.bf16.msra.mxu2 %v4822_v6 }
 0x9ba   : > { %4346 = vmatmul.msk.bf16.gmra.mxu1 %vm426_vm5, %v1702_v58  ;;  %4348 = vmatmul.msk.bf16.gmra.mxu2 %vm426_vm5, %v1702_v58 }
 0x9bb   : > { %4350 = vmatmul.msk.bf16.gmra.mxu3 %vm426_vm5, %v1702_v58  ;;  %2055 = vmatpush.bf16.msrb.mxu1 %v4815_v13 }
 0x9bd   : > { %2076 = vmatpush.bf16.msra.mxu2 %v4821_v43 }
 0x9bf   : > { %2056 = vmatpush.bf16.msrb.mxu1 %v4814_v51 }
 0x9c3   : > { %2057 = vmatpush.bf16.msrb.mxu1 %v4813_v57 }
 0xa09   : > { %v1821_v35 = vpop.f32.mrf.mxu1 }
 0xa0a   : > { %v1822_v27 = vadd.f32 %v1821_v35, %v1704_v50 }
 0xa0c   : > { %v1869_v29 = vmax.f32 %v1822_v27, 0.0 }
 0xa0f   : > { %v1840_v0 = vpop.f32.mrf.mxu2 }
 0xa10   : > { %v1859_v18 = vpop.f32.mrf.mxu3  ;;  %v1841_v20 = vadd.f32 %v1840_v0, %v1705_v8 }
 0xa11   : > { %v1823_v23 = vpop.f32.mrf.mxu1  ;;  %v1860_v39 = vadd.f32 %v1859_v18, %v1706_v11 }
 0xa12   : > { %v1824_v31 = vadd.f32 %v1823_v23, %v1704_v50  ;;  %v1870_v7 = vmax.f32 %v1841_v20, 0.0 }
 0xa13   : > { %v1871_v15 = vmax.f32 %v1860_v39, 0.0 }
 0xa14   : > { %v1872_v19 = vmax.f32 %v1824_v31, 0.0 }
 0xa16   : > { %v1881_v45 = vpack.c.bf16 %v1872_v19, %v1869_v29 }
 0xa17   : > { %v1842_v41 = vpop.f32.mrf.mxu2 }
 0xa18   : > { %v1843_v36 = vadd.f32 %v1842_v41, %v1705_v8  ;;  %v1861_v4 = vpop.f32.mrf.mxu3  ;;  %2039 = vmatmul.bf16.vlgmr.msrb.gmra.mxu0 %v1881_v45 }
 0xa19   : > { %v1862_v14 = vadd.f32 %v1861_v4, %v1706_v11 }
 0xa1a   : > { %v1873_v1 = vmax.f32 %v1843_v36, 0.0 }
 0xa1b   : > { %v1874_v37 = vmax.f32 %v1862_v14, 0.0 }
 0xa1c   : > { %v1882_v48 = vpack.c.bf16 %v1873_v1, %v1870_v7 }
 0xa1d   : > { %v1883_v63 = vpack.c.bf16 %v1874_v37, %v1871_v15 }
 0xa1e   : > { %2058 = vmatmul.bf16.vlgmr.msrb.gmra.mxu1 %v1882_v48 }
 0xa1f   : > { %2077 = vmatmul.bf16.vlgmr.msra.gmra.mxu2 %v1883_v63 }
 0xa37   : > { %v1826_v44 = vpop.f32.mrf.mxu1 }
 0xa38   : > { %v1827_v53 = vadd.f32 %v1826_v44, %v1704_v50 }
 0xa3a   : > { %v1875_v17 = vmax.f32 %v1827_v53, 0.0 }
 0xa3d   : > { %v1845_v46 = vpop.f32.mrf.mxu2 }
 0xa3e   : > { %v1864_v59 = vpop.f32.mrf.mxu3  ;;  %v1846_v61 = vadd.f32 %v1845_v46, %v1705_v8 }
 0xa3f   : > { %v1828_v55 = vpop.f32.mrf.mxu1  ;;  %v1865_v54 = vadd.f32 %v1864_v59, %v1706_v11 }
 0xa40   : > { %v1829_v2 = vadd.f32 %v1828_v55, %v1704_v50  ;;  %v1876_v58 = vmax.f32 %v1846_v61, 0.0 }
 0xa41   : > { %v1877_v9 = vmax.f32 %v1865_v54, 0.0 }
 0xa42   : > { %v1878_v26 = vmax.f32 %v1829_v2, 0.0 }
 0xa44   : > { %v1884_v38 = vpack.c.bf16 %v1878_v26, %v1875_v17 }
 0xa45   : > { %v1847_v62 = vpop.f32.mrf.mxu2 }
 0xa46   : > { %v1848_v21 = vadd.f32 %v1847_v62, %v1705_v8  ;;  %v1866_v10 = vpop.f32.mrf.mxu3  ;;  %2044 = vmatmul.bf16.gmra.mxu0 %v1884_v38 }
 0xa47   : > { %v1867_v32 = vadd.f32 %v1866_v10, %v1706_v11 }
 0xa48   : > { %v1879_v60 = vmax.f32 %v1848_v21, 0.0 }
 0xa49   : > { %v1880_v16 = vmax.f32 %v1867_v32, 0.0 }
 0xa4a   : > { %v1885_v52 = vpack.c.bf16 %v1879_v60, %v1876_v58  ;;  %v4852_v58 = vld [vmem:[%s7265_s1 + $0x1a8] sm:$0xff]  ;;  %v4858_v60 = vld [vmem:[%s7265_s1 + $0x1d8] sm:$0xff] }
 0xa4b   : > { %v1886_v5 = vpack.c.bf16 %v1880_v16, %v1877_v9  ;;  %v4864_v9 = vld [vmem:[%s7265_s1 + $0x208] sm:$0xff]  ;;  %2362 = vmatpush.bf16.msra.mxu3 %v4852_v58  ;;  %2421 = vmatpush.bf16.msra.mxu0 %v4858_v60  ;;  %v4851_v16 = vld [vmem:[%s7265_s1 + $0x1a0] sm:$0xff] }
 0xa4c   : > { %2063 = vmatmul.bf16.gmra.mxu1 %v1885_v52  ;;  %v4857_v52 = vld [vmem:[%s7265_s1 + $0x1d0] sm:$0xff] }
 0xa4d   : > { %2082 = vmatmul.bf16.gmra.mxu2 %v1886_v5  ;;  %2480 = vmatpush.bf16.msra.mxu1 %v4864_v9  ;;  %v4863_v5 = vld [vmem:[%s7265_s1 + $0x200] sm:$0xff] }
 0xa4f   : > { %2363 = vmatpush.bf16.msra.mxu3 %v4851_v16  ;;  %2422 = vmatpush.bf16.msra.mxu0 %v4857_v52 }
 0xa51   : > { %2481 = vmatpush.bf16.msra.mxu1 %v4863_v5 }
 0xa95   : > { %v2040_v3 = vpop.f32.mrf.mxu0 }
 0xa96   : > { %v2041_v24 = vadd.f32 %v2040_v3, %v425_v33  ;;  %v4850_v3 = vld [vmem:[%s7265_s1 + $0x198] sm:$0xff] }
 0xa97   : > { %2364 = vmatpush.bf16.msra.mxu3 %v4850_v3 }
 0xa9b   : > { %v2059_v13 = vpop.f32.mrf.mxu1 }
 0xa9c   : > { %v2060_v49 = vadd.f32 %v2059_v13, %v2041_v24  ;;  %v4862_v13 = vld [vmem:[%s7265_s1 + $0x1f8] sm:$0xff]  ;;  %v4849_v24 = vld [vmem:[%s7265_s1 + $0x190] sm:$0xff] }
 0xa9d   : > { %v2042_v57 = vpop.f32.mrf.mxu0  ;;  %2482 = vmatpush.bf16.msra.mxu1 %v4862_v13  ;;  %2365 = vmatpush.bf16.msra.mxu3 %v4849_v24 }
 0xa9e   : > { %v2043_v35 = vadd.f32 %v2042_v57, %v425_v33  ;;  %v4854_v57 = vld [vmem:[%s7265_s1 + $0x1b8] sm:$0xff] }
 0xaa2   : > { %v2078_v51 = vpop.f32.mrf.mxu2 }
 0xaa3   : > { %v2079_v6 = vadd.f32 %v2078_v51, %v2060_v49  ;;  %v2061_v34 = vpop.f32.mrf.mxu1  ;;  %v4855_v49 = vld [vmem:[%s7265_s1 + $0x1c0] sm:$0xff]  ;;  %v4861_v51 = vld [vmem:[%s7265_s1 + $0x1f0] sm:$0xff] }
 0xaa4   : > { %v2062_v0 = vadd.f32 %v2061_v34, %v2043_v35  ;;  %2483 = vmatpush.bf16.msra.mxu1 %v4861_v51  ;;  %v4860_v34 = vld [vmem:[%s7265_s1 + $0x1e8] sm:$0xff] }
 0xaa5   : > { %v6355_v43 = vadd.f32 %v2079_v6, %v6095_v42  ;;  %v4848_v6 = vld [vmem:[%s7265_s1 + $0x188] sm:$0xff] }
 0xaa6   : > { %2366 = vmatpush.bf16.msra.mxu3 %v4848_v6 }
 0xaa7   : > { %v2220_v50 = vsel %vm426_vm5, %v6355_v43, 0.0 }
 0xaa8   : > { %2221 = vadd.xlane.f32.xlu1 %v2220_v50  ;;  %2484 = vmatpush.bf16.msra.mxu1 %v4860_v34 }
 0xaaa   : > { %v2080_v27 = vpop.f32.mrf.mxu2 }
 0xaab   : > { %v2081_v18 = vadd.f32 %v2080_v27, %v2062_v0  ;;  %v4847_v0 = vld [vmem:[%s7265_s1 + $0x180] sm:$0xff]  ;;  %v4853_v27 = vld [vmem:[%s7265_s1 + $0x1b0] sm:$0xff] }
 0xaac   : > { %2367 = vmatpush.bf16.msra.mxu3 %v4847_v0 }
 0xaad   : > { %v6360_v23 = vadd.f32 %v2081_v18, %v6100_v28  ;;  %v4859_v18 = vld [vmem:[%s7265_s1 + $0x1e0] sm:$0xff] }
 0xaae   : > { %2485 = vmatpush.bf16.msra.mxu1 %v4859_v18 }
 0xaaf   : > { %v2223_v8 = vsel %vm426_vm5, %v6360_v23, 0.0 }
 0xab0   : > { %2224 = vadd.xlane.f32.xlu0 %v2223_v8 }
 0xac3   : > { %v2045_v31 = vpop.f32.mrf.mxu0 }
 0xac4   : > { %v2046_v42 = vadd.f32 %v2045_v31, %v425_v33 }
 0xac9   : > { %v2064_v11 = vpop.f32.mrf.mxu1 }
 0xaca   : > { %v2065_v29 = vadd.f32 %v2064_v11, %v2046_v42 }
 0xacb   : > { %v2047_v45 = vpop.f32.mrf.mxu0 }
 0xacc   : > { %v2048_v36 = vadd.f32 %v2047_v45, %v425_v33  ;;  %v4856_v33 = vld [vmem:[%s7265_s1 + $0x1c8] sm:$0xff] }
 0xacd   : > { %2423 = vmatpush.bf16.msra.mxu0 %v4856_v33 }
 0xad0   : > { %v2083_v19 = vpop.f32.mrf.mxu2 }
 0xad1   : > { %v2084_v20 = vadd.f32 %v2083_v19, %v2065_v29  ;;  %v2066_v41 = vpop.f32.mrf.mxu1  ;;  %2424 = vmatpush.bf16.msra.mxu0 %v4855_v49 }
 0xad2   : > { %v2067_v4 = vadd.f32 %v2066_v41, %v2048_v36 }
 0xad3   : > { %v6365_v39 = vadd.f32 %v2084_v20, %v6105_v56 }
 0xad5   : > { %v2226_v28 = vsel %vm426_vm5, %v6365_v39, 0.0  ;;  %2425 = vmatpush.bf16.msra.mxu0 %v4854_v57 }
 0xad6   : > { %2227 = vadd.xlane.f32.xlu2 %v2226_v28 }
 0xad8   : > { %v2085_v14 = vpop.f32.mrf.mxu2 }
 0xad9   : > { %v2086_v7 = vadd.f32 %v2085_v14, %v2067_v4  ;;  %2426 = vmatpush.bf16.msra.mxu0 %v4853_v27 }
 0xadb   : > { %v6370_v1 = vadd.f32 %v2086_v7, %v6110_v40 }
 0xadd   : > { %v2229_v15 = vsel %vm426_vm5, %v6370_v1, 0.0 }
 0xade   : > { %2230 = vadd.xlane.f32.xlu1 %v2229_v15 }
 0xb1b   : > { %v2222_v37 = vpop.xlane.xlu1 %2221 }
 0xb1c   : > { %v2232_v56 = vmul.f32 %v2222_v37, %v5532_v47 }
 0xb1e   : > { %v6376_v48 = vsub.f32 %v6355_v43, %v2232_v56 }
 0xb20   : > { %v2240_v63 = vmul.f32 %v6376_v48, %v6376_v48 }
 0xb22   : > { %v2244_v44 = vsel %vm426_vm5, %v2240_v63, 0.0  ;;  %v2212_v63 = vld [vmem:[%s7267_s3 + $0x150] ss:$0 sm:$0xff] }
 0xb23   : > { %v2225_v46 = vpop.xlane.xlu0 %2224  ;;  %2245 = vadd.xlane.f32.xlu0 %v2244_v44 }
 0xb24   : > { %v2233_v40 = vmul.f32 %v2225_v46, %v5532_v47 }
 0xb26   : > { %v6383_v53 = vsub.f32 %v6360_v23, %v2233_v40 }
 0xb28   : > { %v2241_v59 = vmul.f32 %v6383_v53, %v6383_v53 }
 0xb2a   : > { %v2247_v55 = vsel %vm426_vm5, %v2241_v59, 0.0 }
 0xb2b   : > { %2248 = vadd.xlane.f32.xlu2 %v2247_v55  ;;  %v2213_v55 = vld [vmem:[%s7267_s3 + $0x151] ss:$0 sm:$0xff] }
 0xb49   : > { %v2228_v2 = vpop.xlane.xlu2 %2227 }
 0xb4a   : > { %v2234_v17 = vmul.f32 %v2228_v2, %v5532_v47 }
 0xb4c   : > { %v6390_v26 = vsub.f32 %v6365_v39, %v2234_v17 }
 0xb4e   : > { %v2242_v61 = vmul.f32 %v6390_v26, %v6390_v26 }
 0xb50   : > { %v2250_v38 = vsel %vm426_vm5, %v2242_v61, 0.0 }
 0xb51   : > { %v2231_v54 = vpop.xlane.xlu1 %2230  ;;  %2251 = vadd.xlane.f32.xlu1 %v2250_v38 }
 0xb52   : > { %v2235_v62 = vmul.f32 %v2231_v54, %v5532_v47 }
 0xb54   : > { %v6397_v21 = vsub.f32 %v6370_v1, %v2235_v62 }
 0xb56   : > { %v2243_v10 = vmul.f32 %v6397_v21, %v6397_v21 }
 0xb58   : > { %v2253_v32 = vsel %vm426_vm5, %v2243_v10, 0.0 }
 0xb59   : > { %2254 = vadd.xlane.f32.xlu0 %v2253_v32 }
 0xb96   : > { %v2246_v35 = vpop.xlane.xlu0 %2245 }
 0xb97   : > { %v2256_v50 = vmul.f32 %v2246_v35, %v5532_v47 }
 0xb99   : > { %v2260_v8 = vadd.f32 1e-05, %v2256_v50 }
 0xb9b   : > { %5192 = vrsqrt.f32 %v2260_v8  ;;  %vm2270_vm0 = vweird.f32 %v2260_v8 }
 0xb9e   : > { %v2249_v31 = vpop.xlane.xlu2 %2248 }
 0xb9f   : > { %v2257_v11 = vmul.f32 %v2249_v31, %v5532_v47 }
 0xba1   : > { %v5193_v42 = vpop.eup %5192  ;;  %v2261_v29 = vadd.f32 1e-05, %v2257_v11 }
 0xba2   : > { %v2265_v19 = vmul.f32 %v5193_v42, %v2260_v8  ;;  %vm2271_vm15 = vweird.f32 %v5193_v42 }
 0xba3   : > { %5194 = vrsqrt.f32 %v2261_v29  ;;  %vm2272_vm1 = vmor %vm2270_vm0, %vm2271_vm15  ;;  %vm2280_vm4 = vweird.f32 %v2261_v29 }
 0xba4   : > { %v2266_v20 = vmul.f32 %v5193_v42, %v2265_v19 }
 0xba6   : > { %v2267_v45 = vmul.f32 0.5, %v2266_v20 }
 0xba8   : > { %v2268_v41 = vsub.f32 1.5, %v2267_v45 }
 0xba9   : > { %v5195_v36 = vpop.eup %5194 }
 0xbaa   : > { %v2269_v28 = vmul.f32 %v5193_v42, %v2268_v41  ;;  %v2275_v4 = vmul.f32 %v5195_v36, %v2261_v29  ;;  %vm2281_vm2 = vweird.f32 %v5195_v36 }
 0xbab   : > { %vm2282_vm6 = vmor %vm2280_vm4, %vm2281_vm2 }
 0xbac   : > { %v2276_v14 = vmul.f32 %v5195_v36, %v2275_v4  ;;  %v2273_v7 = vsel %vm2272_vm1, %v5193_v42, %v2269_v28 }
 0xbad   : > { %v2304_v56 = vmul.f32 %v2273_v7, %v6376_v48 }
 0xbae   : > { %v2277_v15 = vmul.f32 0.5, %v2276_v14 }
 0xbaf   : > { %v2308_v40 = vmul.f32 %v2304_v56, %v2212_v63 }
 0xbb0   : > { %v2278_v37 = vsub.f32 1.5, %v2277_v15 }
 0xbb1   : > { %v2312_v17 = vadd.f32 %v2308_v40, %v2213_v55 }
 0xbb2   : > { %v2279_v44 = vmul.f32 %v5195_v36, %v2278_v37 }
 0xbb4   : > { %v2283_v46 = vsel %vm2282_vm6, %v5195_v36, %v2279_v44 }
 0xbb5   : > { %v2305_v59 = vmul.f32 %v2283_v46, %v6383_v53 }
 0xbb7   : > { %v2309_v2 = vmul.f32 %v2305_v59, %v2212_v63 }
 0xbb9   : > { %v2313_v61 = vadd.f32 %v2309_v2, %v2213_v55 }
 0xbbb   : > { %v2316_v38 = vpack.c.bf16 %v2313_v61, %v2312_v17 }
 0xbbd   : > { %4472 = vmatmul.msk.bf16.vlgmr.msra.gmra.mxu3 %vm426_vm5, %v2316_v38  ;;  %4498 = vmatmul.msk.bf16.vlgmr.msra.gmra.mxu0 %vm426_vm5, %v2316_v38 }
 0xbbe   : > { %4524 = vmatmul.msk.bf16.vlgmr.msra.gmra.mxu1 %vm426_vm5, %v2316_v38 }
 0xbc4   : > { %v2252_v48 = vpop.xlane.xlu1 %2251 }
 0xbc5   : > { %v2258_v54 = vmul.f32 %v2252_v48, %v5532_v47 }
 0xbc7   : > { %v2262_v62 = vadd.f32 1e-05, %v2258_v54 }
 0xbc9   : > { %5196 = vrsqrt.f32 %v2262_v62  ;;  %vm2290_vm9 = vweird.f32 %v2262_v62 }
 0xbcc   : > { %v2255_v53 = vpop.xlane.xlu0 %2254 }
 0xbcd   : > { %v2259_v10 = vmul.f32 %v2255_v53, %v5532_v47 }
 0xbcf   : > { %v5197_v32 = vpop.eup %5196  ;;  %v2263_v58 = vadd.f32 1e-05, %v2259_v10 }
 0xbd0   : > { %v2285_v60 = vmul.f32 %v5197_v32, %v2262_v62  ;;  %vm2291_vm7 = vweird.f32 %v5197_v32 }
 0xbd1   : > { %5198 = vrsqrt.f32 %v2263_v58  ;;  %vm2292_vm13 = vmor %vm2290_vm9, %vm2291_vm7  ;;  %vm2300_vm15 = vweird.f32 %v2263_v58 }
 0xbd2   : > { %v2286_v9 = vmul.f32 %v5197_v32, %v2285_v60 }
 0xbd4   : > { %v2287_v16 = vmul.f32 0.5, %v2286_v9 }
 0xbd6   : > { %v2288_v52 = vsub.f32 1.5, %v2287_v16 }
 0xbd7   : > { %v5199_v5 = vpop.eup %5198 }
 0xbd8   : > { %v2289_v3 = vmul.f32 %v5197_v32, %v2288_v52  ;;  %v2295_v33 = vmul.f32 %v5199_v5, %v2263_v58  ;;  %vm2301_vm14 = vweird.f32 %v5199_v5 }
 0xbd9   : > { %vm2302_vm0 = vmor %vm2300_vm15, %vm2301_vm14 }
 0xbda   : > { %v2296_v13 = vmul.f32 %v5199_v5, %v2295_v33  ;;  %v2293_v24 = vsel %vm2292_vm13, %v5197_v32, %v2289_v3 }
 0xbdb   : > { %v2306_v6 = vmul.f32 %v2293_v24, %v6390_v26 }
 0xbdc   : > { %v2297_v49 = vmul.f32 0.5, %v2296_v13 }
 0xbdd   : > { %v2310_v50 = vmul.f32 %v2306_v6, %v2212_v63 }
 0xbde   : > { %v2298_v51 = vsub.f32 1.5, %v2297_v49 }
 0xbdf   : > { %v2314_v27 = vadd.f32 %v2310_v50, %v2213_v55 }
 0xbe0   : > { %v2299_v57 = vmul.f32 %v5199_v5, %v2298_v51 }
 0xbe2   : > { %v2303_v34 = vsel %vm2302_vm0, %v5199_v5, %v2299_v57 }
 0xbe3   : > { %v2307_v35 = vmul.f32 %v2303_v34, %v6397_v21 }
 0xbe5   : > { %v2311_v0 = vmul.f32 %v2307_v35, %v2212_v63 }
 0xbe7   : > { %v2315_v18 = vadd.f32 %v2311_v0, %v2213_v55 }
 0xbe9   : > { %v2317_v8 = vpack.c.bf16 %v2315_v18, %v2314_v27 }
 0xbeb   : > { %4473 = vmatmul.msk.bf16.gmra.mxu3 %vm426_vm5, %v2317_v8  ;;  %4499 = vmatmul.msk.bf16.gmra.mxu0 %vm426_vm5, %v2317_v8 }
 0xbec   : > { %4525 = vmatmul.msk.bf16.gmra.mxu1 %vm426_vm5, %v2317_v8 }
 0xc3a   : > { %v2428_v31 = vpop.f32.mrf.mxu0 }
 0xc3b   : > { %v2438_v26 = vpack.c.bf16 %v2428_v31, %v2428_v31  ;;  %v2487_v7 = vpop.f32.mrf.mxu1 }
 0xc3c   : > { %v2497_v48 = vpack.c.bf16 %v2487_v7, %v2487_v7 }
 0xc3d   : > { %v2515_v19 = vunpack.c.l.b16 %v2438_v26 }
 0xc3e   : > { %v2602_v52 = vunpack.c.l.b16 %v2497_v48 }
 0xc40   : > { %v2369_v11 = vpop.f32.mrf.mxu3 }
 0xc41   : > { %v2379_v45 = vpack.c.bf16 %v2369_v11, %v2369_v11 }
 0xc42   : > { %v2430_v42 = vpop.f32.mrf.mxu0 }
 0xc43   : > { %v2439_v29 = vpack.c.bf16 %v2430_v42, %v2430_v42  ;;  %v2505_v28 = vunpack.c.l.b16 %v2379_v45  ;;  %v2489_v15 = vpop.f32.mrf.mxu1 }
 0xc44   : > { %v2498_v2 = vpack.c.bf16 %v2489_v15, %v2489_v15 }
 0xc45   : > { %v2516_v20 = vunpack.c.l.b16 %v2439_v29 }
 0xc46   : > { %v2603_v32 = vunpack.c.l.b16 %v2498_v2 }
 0xc47   : > { %v2519_v21 = vpack.c.b16 %v2516_v20, %v2515_v19 }
 0xc48   : > { %v2371_v41 = vpop.f32.mrf.mxu3  ;;  %v6484_v33 = vpack.c.b16 %v2603_v32, %v2602_v52 }
 0xc49   : > { %v2380_v36 = vpack.c.bf16 %v2371_v41, %v2371_v41  ;;  %2639 = vrot.lane.b32.xlu1 %v2519_v21, %s5379_s30  ;;  %v2528_v24 = vsel %vm735_vm3, %v2519_v21, 0 }
 0xc4b   : > { %v2506_v4 = vunpack.c.l.b16 %v2380_v36 }
 0xc4d   : > { %v2509_v14 = vpack.c.b16 %v2506_v4, %v2505_v28 }
 0xc4f   : > { %2635 = vrot.lane.b32.xlu0 %v2509_v14, %s5379_s30 }
 0xc68   : > { %v2433_v37 = vpop.f32.mrf.mxu0 }
 0xc69   : > { %v2492_v56 = vpop.f32.mrf.mxu1  ;;  %v2440_v44 = vpack.c.bf16 %v2433_v37, %v2433_v37 }
 0xc6a   : > { %v2499_v46 = vpack.c.bf16 %v2492_v56, %v2492_v56 }
 0xc6b   : > { %v2517_v61 = vunpack.c.l.b16 %v2440_v44 }
 0xc6c   : > { %v2604_v54 = vunpack.c.l.b16 %v2499_v46 }
 0xc6e   : > { %v2374_v63 = vpop.f32.mrf.mxu3 }
 0xc6f   : > { %v2381_v53 = vpack.c.bf16 %v2374_v63, %v2374_v63 }
 0xc70   : > { %v2435_v40 = vpop.f32.mrf.mxu0 }
 0xc71   : > { %v2441_v59 = vpack.c.bf16 %v2435_v40, %v2435_v40  ;;  %v2494_v55 = vpop.f32.mrf.mxu1  ;;  %v2507_v5 = vunpack.c.l.b16 %v2381_v53 }
 0xc72   : > { %v2500_v17 = vpack.c.bf16 %v2494_v55, %v2494_v55 }
 0xc73   : > { %v2518_v38 = vunpack.c.l.b16 %v2441_v59 }
 0xc74   : > { %v2605_v62 = vunpack.c.l.b16 %v2500_v17 }
 0xc75   : > { %v2520_v10 = vpack.c.b16 %v2518_v38, %v2517_v61 }
 0xc76   : > { %v6478_v58 = vpack.c.b16 %v2605_v62, %v2604_v54  ;;  %v2376_v60 = vpop.f32.mrf.mxu3 }
 0xc77   : > { %v2382_v9 = vpack.c.bf16 %v2376_v60, %v2376_v60  ;;  %2641 = vrot.lane.b32.xlu2 %v2520_v10, %s5379_s30  ;;  %2757 = vrot.lane.b32.xlu0 %v2520_v10, %s5381_s6  ;;  %v2531_v16 = vsel %vm735_vm3, %v2520_v10, 0 }
 0xc78   : > { %2622 = vmatpush.bf16.msrb.mxu3 %v6478_v58  ;;  %2539 = vmatpush.bf16.xpose.msrb.mxu2 %v2531_v16 }
 0xc79   : > { %v2508_v3 = vunpack.c.l.b16 %v2382_v9 }
 0xc7b   : > { %v2510_v13 = vpack.c.b16 %v2508_v3, %v2507_v5 }
 0xc7c   : > { %2623 = vmatpush.bf16.msrb.mxu3 %v6484_v33 }
 0xc7d   : > { %2637 = vrot.lane.b32.xlu1 %v2510_v13, %s5379_s30 }
 0xc7f   : > { %2755 = vrot.lane.b32.xlu2 %v2519_v21, %s5381_s6  ;;  %2873 = vrot.lane.b32.xlu0 %v2520_v10, %s5380_s5 }
 0xc80   : > { %2540 = vmatpush.bf16.xpose.msrb.mxu2 %v2528_v24 }
 0xc85   : > { %2871 = vrot.lane.b32.xlu1 %v2519_v21, %s5380_s5 }
 0xc87   : > { %2751 = vrot.lane.b32.xlu2 %v2509_v14, %s5381_s6  ;;  %2867 = vrot.lane.b32.xlu0 %v2509_v14, %s5380_s5 }
 0xc88   : > { %4526 = vmatmul.msk.bf16.vlgmr.msrb.gmra.mxu2 %vm735_vm3, %v2509_v14 }
 0xc8d   : > { %2989 = vrot.lane.b32.xlu1 %v2520_v10, %s5383_s7 }
 0xc8f   : > { %2987 = vrot.lane.b32.xlu0 %v2519_v21, %s5383_s7  ;;  %2753 = vrot.lane.b32.xlu2 %v2510_v13, %s5381_s6 }
 0xc95   : > { %3105 = vrot.lane.b32.xlu1 %v2520_v10, %s5384_s8 }
 0xc97   : > { %2983 = vrot.lane.b32.xlu0 %v2509_v14, %s5383_s7  ;;  %2869 = vrot.lane.b32.xlu2 %v2510_v13, %s5380_s5 }
 0xc98   : > { %4527 = vmatmul.msk.bf16.gmra.mxu2 %vm735_vm3, %v2510_v13 }
 0xc9d   : > { %3099 = vrot.lane.b32.xlu1 %v2509_v14, %s5384_s8 }
 0xc9f   : > { %2985 = vrot.lane.b32.xlu0 %v2510_v13, %s5383_s7  ;;  %3103 = vrot.lane.b32.xlu2 %v2519_v21, %s5384_s8 }
 0xca5   : > { %2720 = vrot.lane.b32.xlu1 %v6484_v33, %s5379_s30 }
 0xca7   : > { %2836 = vrot.lane.b32.xlu0 %v6484_v33, %s5381_s6  ;;  %3101 = vrot.lane.b32.xlu2 %v2510_v13, %s5384_s8 }
 0xcad   : > { %2954 = vrot.lane.b32.xlu1 %v6478_v58, %s5380_s5 }
 0xcaf   : > { %2722 = vrot.lane.b32.xlu2 %v6478_v58, %s5379_s30  ;;  %s7273_s30 = smov 32  }
 0xcb5   : > { %2952 = vrot.lane.b32.xlu1 %v6484_v33, %s5380_s5 }
 0xcb7   : > { %2838 = vrot.lane.b32.xlu2 %v6478_v58, %s5381_s6  ;;  %s189_s6 = sand.u32 1, %s5366_s16  }
 0xcb8   : > { %s4052_s13 = scalar_lea.sflag [#allocation3], %s189_s6 }
 0xcbb   : > { %v2640_v6 = vpop.permute.xlu1 %2639 }
 0xcbc   : > { %v2650_v34 = vsel %vm735_vm3, %v2640_v6, 0 }
 0xcc1   : > { %v2636_v35 = vpop.permute.xlu0 %2635 }
 0xcd1   : > { %v2642_v49 = vpop.permute.xlu2 %2641 }
 0xcd2   : > { %v2653_v51 = vsel %vm735_vm3, %v2642_v49, 0 }
 0xcd3   : > { %2661 = vmatpush.bf16.xpose.msrb.mxu0 %v2653_v51 }
 0xcd9   : > { %v2756_v57 = vpop.permute.xlu2 %2755 }
 0xcda   : > { %v2766_v26 = vsel %vm735_vm3, %v2756_v57, 0 }
 0xcdb   : > { %2662 = vmatpush.bf16.xpose.msrb.mxu0 %v2650_v34 }
 0xce1   : > { %v2752_v50 = vpop.permute.xlu2 %2751 }
 0xce2   : > { %4530 = vmatmul.msk.bf16.vlgmr.msrb.gmra.mxu0 %vm735_vm3, %v2636_v35 }
 0xce9   : > { %v2758_v0 = vpop.permute.xlu0 %2757  ;;  %v2754_v27 = vpop.permute.xlu2 %2753 }
 0xcea   : > { %v2769_v18 = vsel %vm735_vm3, %v2758_v0, 0 }
 0xceb   : > { %2777 = vmatpush.bf16.xpose.msra.mxu2 %v2769_v18 }
 0xcef   : > { %v2638_v8 = vpop.permute.xlu1 %2637 }
 0xcf1   : > { %v2874_v31 = vpop.permute.xlu0 %2873  ;;  %v2870_v11 = vpop.permute.xlu2 %2869 }
 0xcf2   : > { %v2885_v42 = vsel %vm735_vm3, %v2874_v31, 0  ;;  %4531 = vmatmul.msk.bf16.gmra.mxu0 %vm735_vm3, %v2638_v8 }
 0xcf3   : > { %2778 = vmatpush.bf16.xpose.msra.mxu2 %v2766_v26  ;;  %2893 = vmatpush.bf16.xpose.msra.mxu0 %v2885_v42 }
 0xcf7   : > { %v2872_v29 = vpop.permute.xlu1 %2871 }
 0xcf8   : > { %v2882_v45 = vsel %vm735_vm3, %v2872_v29, 0 }
 0xcf9   : > { %v2868_v19 = vpop.permute.xlu0 %2867  ;;  %v3104_v20 = vpop.permute.xlu2 %3103 }
 0xcfa   : > { %4534 = vmatmul.msk.bf16.vlgmr.msra.gmra.mxu2 %vm735_vm3, %v2752_v50  ;;  %v3114_v40 = vsel %vm735_vm3, %v3104_v20, 0 }
 0xcfb   : > { %2894 = vmatpush.bf16.xpose.msra.mxu0 %v2882_v45 }
 0xcff   : > { %v2990_v21 = vpop.permute.xlu1 %2989 }
 0xd00   : > { %v3001_v41 = vsel %vm735_vm3, %v2990_v21, 0 }
 0xd01   : > { %v2988_v36 = vpop.permute.xlu0 %2987  ;;  %v3102_v28 = vpop.permute.xlu2 %3101  ;;  %3009 = vmatpush.bf16.xpose.msrb.mxu2 %v3001_v41 }
 0xd02   : > { %4538 = vmatmul.msk.bf16.vlgmr.msra.gmra.mxu0 %vm735_vm3, %v2868_v19  ;;  %v2998_v14 = vsel %vm735_vm3, %v2988_v36, 0 }
 0xd07   : > { %v3106_v4 = vpop.permute.xlu1 %3105 }
 0xd08   : > { %v3117_v7 = vsel %vm735_vm3, %v3106_v4, 0 }
 0xd09   : > { %v2984_v15 = vpop.permute.xlu0 %2983  ;;  %v2723_v37 = vpop.permute.xlu2 %2722  ;;  %3010 = vmatpush.bf16.xpose.msrb.mxu2 %v2998_v14  ;;  %3125 = vmatpush.bf16.xpose.msrb.mxu0 %v3117_v7 }
 0xd0a   : > { %2738 = vmatpush.bf16.msrb.mxu1 %v2723_v37  ;;  %4535 = vmatmul.msk.bf16.gmra.mxu2 %vm735_vm3, %v2754_v27 }
 0xd0b   : > { %v2542_v56 = vpop.f32.mrf.mxu2 }
 0xd0c   : > { %v2543_v63 = vadd.f32 %v2542_v56, %v5674_v12 }
 0xd0e   : > { %v2552_v44 = vsel %vm767_vm8, %v2543_v63, -inf }
 0xd0f   : > { %2553 = vmax.xlane.f32.xlu1 %v2552_v44  ;;  %v3100_v46 = vpop.permute.xlu1 %3099 }
 0xd11   : > { %v2986_v59 = vpop.permute.xlu0 %2985  ;;  %v2839_v55 = vpop.permute.xlu2 %2838  ;;  %3126 = vmatpush.bf16.xpose.msrb.mxu0 %v3114_v40 }
 0xd12   : > { %2854 = vmatpush.bf16.msra.mxu3 %v2839_v55  ;;  %4539 = vmatmul.msk.bf16.gmra.mxu0 %vm735_vm3, %v2870_v11 }
 0xd13   : > { %v2544_v2 = vpop.f32.mrf.mxu2 }
 0xd14   : > { %v2545_v17 = vadd.f32 %v2544_v2, %v5684_v22 }
 0xd16   : > { %v2555_v61 = vsel %vm767_vm8, %v2545_v17, -inf }
 0xd17   : > { %2556 = vmax.xlane.f32.xlu0 %v2555_v61  ;;  %v2721_v38 = vpop.permute.xlu1 %2720 }
 0xd18   : > { %2739 = vmatpush.bf16.msrb.mxu1 %v2721_v38 }
 0xd19   : > { %v2837_v48 = vpop.permute.xlu0 %2836 }
 0xd1a   : > { %2855 = vmatpush.bf16.msra.mxu3 %v2837_v48  ;;  %4542 = vmatmul.msk.bf16.vlgmr.msrb.gmra.mxu2 %vm735_vm3, %v2984_v15 }
 0xd1b   : > { %v2547_v54 = vpop.f32.mrf.mxu2 }
 0xd1c   : > { %v6540_v62 = vadd.f32 %v2547_v54, %v5688_v25 }
 0xd1e   : > { %v2558_v53 = vsel %vm767_vm8, %v6540_v62, -inf }
 0xd1f   : > { %2559 = vmax.xlane.f32.xlu0 %v2558_v53  ;;  %v2955_v10 = vpop.permute.xlu1 %2954 }
 0xd20   : > { %2970 = vmatpush.bf16.msra.mxu1 %v2955_v10 }
 0xd22   : > { %4546 = vmatmul.msk.bf16.vlgmr.msrb.gmra.mxu0 %vm735_vm3, %v3100_v46 }
 0xd23   : > { %v2549_v32 = vpop.f32.mrf.mxu2 }
 0xd24   : > { %v6546_v60 = vadd.f32 %v2549_v32, %v5693_v30 }
 0xd26   : > { %v2561_v9 = vsel %vm767_vm8, %v6546_v60, -inf }
 0xd27   : > { %2562 = vmax.xlane.f32.xlu2 %v2561_v9  ;;  %v2953_v16 = vpop.permute.xlu1 %2952 }
 0xd28   : > { %2971 = vmatpush.bf16.msra.mxu1 %v2953_v16 }
 0xd2a   : > { %4543 = vmatmul.msk.bf16.gmra.mxu2 %vm735_vm3, %v2986_v59 }
 0xd32   : > { %4547 = vmatmul.msk.bf16.gmra.mxu0 %vm735_vm3, %v3102_v28 }
 0xd5f   : > { %v2664_v52 = vpop.f32.mrf.mxu0 }
 0xd60   : > { %v6553_v5 = vadd.f32 %v2664_v52, %v5674_v12 }
 0xd62   : > { %v2674_v3 = vsel %vm767_vm8, %v6553_v5, -inf }
 0xd63   : > { %2675 = vmax.xlane.f32.xlu2 %v2674_v3 }
 0xd67   : > { %v2666_v13 = vpop.f32.mrf.mxu0 }
 0xd68   : > { %v6558_v24 = vadd.f32 %v2666_v13, %v5684_v22 }
 0xd6a   : > { %v2677_v49 = vsel %vm767_vm8, %v6558_v24, -inf }
 0xd6b   : > { %2678 = vmax.xlane.f32.xlu1 %v2677_v49 }
 0xd6f   : > { %v2669_v51 = vpop.f32.mrf.mxu0 }
 0xd70   : > { %v6578_v20 = vadd.f32 %v2669_v51, %v5688_v25 }
 0xd72   : > { %v2680_v4 = vsel %vm767_vm8, %v6578_v20, -inf }
 0xd77   : > { %v2671_v6 = vpop.f32.mrf.mxu0 }
 0xd78   : > { %v6563_v57 = vadd.f32 %v2671_v6, %v5693_v30 }
 0xd7a   : > { %v2683_v34 = vsel %vm767_vm8, %v6563_v57, -inf }
 0xd7b   : > { %2684 = vmax.xlane.f32.xlu0 %v2683_v34 }
 0xd7d   : > { %v2780_v35 = vpop.f32.mrf.mxu2 }
 0xd7e   : > { %v6568_v50 = vadd.f32 %v2780_v35, %v5674_v12 }
 0xd7f   : > { %v2896_v0 = vpop.f32.mrf.mxu0 }
 0xd80   : > { %v2790_v27 = vsel %vm767_vm8, %v6568_v50, -inf  ;;  %v6607_v48 = vadd.f32 %v2896_v0, %v5674_v12 }
 0xd81   : > { %2791 = vmax.xlane.f32.xlu2 %v2790_v27 }
 0xd82   : > { %v2554_v18 = vpop.xlane.xlu1 %2553 }
 0xd83   : > { %v2564_v8 = vsub.f32 %v2543_v63, %v2554_v18 }
 0xd85   : > { %v2568_v31 = vmul.f32 1.442695, %v2564_v8  ;;  %v2782_v11 = vpop.f32.mrf.mxu2 }
 0xd86   : > { %v6573_v26 = vadd.f32 %v2782_v11, %v5684_v22 }
 0xd87   : > { %5200 = vpow2.f32 %v2568_v31  ;;  %v2898_v42 = vpop.f32.mrf.mxu0 }
 0xd88   : > { %v2793_v29 = vsel %vm767_vm8, %v6573_v26, -inf  ;;  %v6587_v14 = vadd.f32 %v2898_v42, %v5684_v22 }
 0xd89   : > { %2794 = vmax.xlane.f32.xlu1 %v2793_v29 }
 0xd8a   : > { %v2557_v19 = vpop.xlane.xlu0 %2556  ;;  %v2909_v46 = vsel %vm767_vm8, %v6587_v14, -inf }
 0xd8b   : > { %v2565_v36 = vsub.f32 %v2545_v17, %v2557_v19 }
 0xd8d   : > { %v6580_v45 = vpop.eup %5200  ;;  %v2785_v21 = vpop.f32.mrf.mxu2  ;;  %v2570_v7 = vmul.f32 1.442695, %v2565_v36 }
 0xd8e   : > { %v2576_v41 = vsel %vm767_vm8, %v6580_v45, 0.0  ;;  %v6590_v37 = vadd.f32 %v2785_v21, %v5688_v25 }
 0xd8f   : > { %2577 = vadd.xlane.f32.xlu2 %v2576_v41  ;;  %v2901_v28 = vpop.f32.mrf.mxu0  ;;  %5202 = vpow2.f32 %v2570_v7 }
 0xd90   : > { %v2796_v59 = vsel %vm767_vm8, %v6590_v37, -inf }
 0xd91   : > { %2681 = vmax.xlane.f32.xlu1 %v2680_v4 }
 0xd92   : > { %v2560_v15 = vpop.xlane.xlu0 %2559 }
 0xd93   : > { %v2566_v63 = vsub.f32 %v6540_v62, %v2560_v15 }
 0xd95   : > { %v2787_v56 = vpop.f32.mrf.mxu2  ;;  %v2572_v2 = vmul.f32 1.442695, %v2566_v63  ;;  %v6609_v54 = vpop.eup %5202 }
 0xd96   : > { %v6594_v44 = vadd.f32 %v2787_v56, %v5693_v30  ;;  %v2579_v9 = vsel %vm767_vm8, %v6609_v54, 0.0 }
 0xd97   : > { %2910 = vmax.xlane.f32.xlu2 %v2909_v46  ;;  %v2903_v40 = vpop.f32.mrf.mxu0  ;;  %5204 = vpow2.f32 %v2572_v2 }
 0xd98   : > { %v2799_v55 = vsel %vm767_vm8, %v6594_v44, -inf  ;;  %v6603_v17 = vadd.f32 %v2903_v40, %v5693_v30 }
 0xd99   : > { %2797 = vmax.xlane.f32.xlu1 %v2796_v59  ;;  %2800 = vmax.xlane.f32.xlu0 %v2799_v55 }
 0xd9a   : > { %v2563_v61 = vpop.xlane.xlu2 %2562  ;;  %v2915_v10 = vsel %vm767_vm8, %v6603_v17, -inf }
 0xd9b   : > { %v2567_v38 = vsub.f32 %v6546_v60, %v2563_v61  ;;  %v2906_v60 = vsel %vm767_vm8, %v6607_v48, -inf }
 0xd9d   : > { %v2574_v62 = vmul.f32 1.442695, %v2567_v38  ;;  %v3012_v53 = vpop.f32.mrf.mxu2  ;;  %v6617_v16 = vpop.eup %5204 }
 0xd9e   : > { %v2582_v6 = vsel %vm767_vm8, %v6617_v16, 0.0  ;;  %v6631_v35 = vadd.f32 %v3012_v53, %v5674_v12 }
 0xd9f   : > { %5206 = vpow2.f32 %v2574_v62  ;;  %2916 = vmax.xlane.f32.xlu2 %v2915_v10  ;;  %v3128_v32 = vpop.f32.mrf.mxu0 }
 0xda0   : > { %v3022_v11 = vsel %vm767_vm8, %v6631_v35, -inf }
 0xda1   : > { %2580 = vadd.xlane.f32.xlu1 %v2579_v9  ;;  %2907 = vmax.xlane.f32.xlu0 %v2906_v60 }
 0xda5   : > { %v6619_v52 = vpop.eup %5206  ;;  %v3014_v3 = vpop.f32.mrf.mxu2 }
 0xda6   : > { %v2585_v51 = vsel %vm767_vm8, %v6619_v52, 0.0  ;;  %v6634_v0 = vadd.f32 %v3014_v3, %v5684_v22 }
 0xda7   : > { %v3130_v13 = vpop.f32.mrf.mxu0 }
 0xda8   : > { %v6622_v49 = vadd.f32 %v3130_v13, %v5684_v22  ;;  %v3025_v31 = vsel %vm767_vm8, %v6634_v0, -inf  ;;  %v6646_v22 = vadd.f32 %v2901_v28, %v5688_v25  ;;  %v6661_v28 = vadd.f32 %v3128_v32, %v5674_v12 }
 0xda9   : > { %2586 = vadd.xlane.f32.xlu0 %v2585_v51  ;;  %2583 = vadd.xlane.f32.xlu1 %v2582_v6 }
 0xdaa   : > { %v3141_v34 = vsel %vm767_vm8, %v6622_v49, -inf  ;;  %v2912_v19 = vsel %vm767_vm8, %v6646_v22, -inf }
 0xdab   : > { %3142 = vmax.xlane.f32.xlu2 %v3141_v34 }
 0xdad   : > { %v3017_v27 = vpop.f32.mrf.mxu2 }
 0xdae   : > { %v6649_v29 = vadd.f32 %v3017_v27, %v5688_v25 }
 0xdaf   : > { %v3133_v18 = vpop.f32.mrf.mxu0 }
 0xdb0   : > { %v6637_v8 = vadd.f32 %v3133_v18, %v5688_v25  ;;  %v3028_v21 = vsel %vm767_vm8, %v6649_v29, -inf  ;;  %v3138_v25 = vsel %vm767_vm8, %v6661_v28, -inf }
 0xdb1   : > { %3026 = vmax.xlane.f32.xlu0 %v3025_v31  ;;  %3023 = vmax.xlane.f32.xlu1 %v3022_v11 }
 0xdb2   : > { %v3144_v42 = vsel %vm767_vm8, %v6637_v8, -inf }
 0xdb3   : > { %3145 = vmax.xlane.f32.xlu2 %v3144_v42 }
 0xdb5   : > { %v3019_v41 = vpop.f32.mrf.mxu2 }
 0xdb6   : > { %v6656_v36 = vadd.f32 %v3019_v41, %v5693_v30 }
 0xdb7   : > { %v3135_v7 = vpop.f32.mrf.mxu0 }
 0xdb8   : > { %v3031_v4 = vsel %vm767_vm8, %v6656_v36, -inf  ;;  %v6666_v15 = vadd.f32 %v3135_v7, %v5693_v30 }
 0xdb9   : > { %2913 = vmax.xlane.f32.xlu0 %v2912_v19  ;;  %3029 = vmax.xlane.f32.xlu1 %v3028_v21 }
 0xdba   : > { %v3147_v56 = vsel %vm767_vm8, %v6666_v15, -inf }
 0xdc1   : > { %3032 = vmax.xlane.f32.xlu0 %v3031_v4 }
 0xdc9   : > { %3139 = vmax.xlane.f32.xlu0 %v3138_v25 }
 0xdd1   : > { %3148 = vmax.xlane.f32.xlu0 %v3147_v56 }
 0xdd6   : > { %v2676_v63 = vpop.xlane.xlu2 %2675 }
 0xdd7   : > { %v2686_v46 = vsub.f32 %v6553_v5, %v2676_v63 }
 0xdd9   : > { %v2690_v40 = vmul.f32 1.442695, %v2686_v46 }
 0xddb   : > { %5208 = vpow2.f32 %v2690_v40 }
 0xdde   : > { %v2679_v55 = vpop.xlane.xlu1 %2678 }
 0xddf   : > { %v2687_v61 = vsub.f32 %v6558_v24, %v2679_v55 }
 0xde1   : > { %v6671_v59 = vpop.eup %5208  ;;  %v2692_v62 = vmul.f32 1.442695, %v2687_v61 }
 0xde2   : > { %v2698_v12 = vsel %vm767_vm8, %v6671_v59, 0.0 }
 0xde3   : > { %2699 = vadd.xlane.f32.xlu1 %v2698_v12 }
 0xdee   : > { %v2685_v3 = vpop.xlane.xlu0 %2684 }
 0xdef   : > { %v2689_v19 = vsub.f32 %v6563_v57, %v2685_v3 }
 0xdf1   : > { %v2696_v41 = vmul.f32 1.442695, %v2689_v19 }
 0xdf4   : > { %v2792_v2 = vpop.xlane.xlu2 %2791 }
 0xdf5   : > { %v2802_v30 = vsub.f32 %v6568_v50, %v2792_v2 }
 0xdf7   : > { %v2806_v38 = vmul.f32 1.442695, %v2802_v30 }
 0xdf9   : > { %5210 = vpow2.f32 %v2806_v38 }
 0xdfa   : > { %5212 = vpow2.f32 %v2692_v62 }
 0xdfc   : > { %v2795_v53 = vpop.xlane.xlu1 %2794 }
 0xdfd   : > { %v2803_v5 = vsub.f32 %v6573_v26, %v2795_v53 }
 0xdff   : > { %v6677_v10 = vpop.eup %5210  ;;  %v2808_v60 = vmul.f32 1.442695, %v2803_v5 }
 0xe00   : > { %v2814_v32 = vsel %vm767_vm8, %v6677_v10, 0.0  ;;  %v6682_v50 = vpop.eup %5212 }
 0xe01   : > { %2815 = vadd.xlane.f32.xlu0 %v2814_v32  ;;  %5214 = vpow2.f32 %v2808_v60  ;;  %v2701_v51 = vsel %vm767_vm8, %v6682_v50, 0.0 }
 0xe02   : > { %v2578_v9 = vpop.xlane.xlu2 %2577 }
 0xe04   : > { %v2682_v13 = vpop.xlane.xlu1 %2681 }
 0xe05   : > { %v2688_v24 = vsub.f32 %v6578_v20, %v2682_v13 }
 0xe07   : > { %v2694_v6 = vmul.f32 1.442695, %v2688_v24  ;;  %v6688_v31 = vpop.eup %5214 }
 0xe08   : > { %v2817_v21 = vsel %vm767_vm8, %v6688_v31, 0.0 }
 0xe09   : > { %2702 = vadd.xlane.f32.xlu0 %v2701_v51  ;;  %5216 = vpow2.f32 %v2694_v6 }
 0xe0a   : > { %v2911_v34 = vpop.xlane.xlu2 %2910 }
 0xe0b   : > { %v2919_v26 = vsub.f32 %v6587_v14, %v2911_v34 }
 0xe0c   : > { %v2798_v27 = vpop.xlane.xlu1 %2797  ;;  %v2801_v18 = vpop.xlane.xlu0 %2800 }
 0xe0d   : > { %v2924_v11 = vmul.f32 1.442695, %v2919_v26  ;;  %v2804_v42 = vsub.f32 %v6590_v37, %v2798_v27  ;;  %v2805_v56 = vsub.f32 %v6594_v44, %v2801_v18 }
 0xe0f   : > { %5218 = vpow2.f32 %v2924_v11  ;;  %v2810_v20 = vmul.f32 1.442695, %v2804_v42  ;;  %v6694_v14 = vpop.eup %5216  ;;  %v2812_v55 = vmul.f32 1.442695, %v2805_v56 }
 0xe10   : > { %v2704_v46 = vsel %vm767_vm8, %v6694_v14, 0.0 }
 0xe11   : > { %5220 = vpow2.f32 %v2810_v20  ;;  %2818 = vadd.xlane.f32.xlu0 %v2817_v21 }
 0xe12   : > { %5222 = vrcp.f32 %v2578_v9  ;;  %v2917_v32 = vpop.xlane.xlu2 %2916 }
 0xe13   : > { %v2921_v24 = vsub.f32 %v6603_v17, %v2917_v32 }
 0xe14   : > { %v2581_v4 = vpop.xlane.xlu1 %2580  ;;  %v2908_v25 = vpop.xlane.xlu0 %2907 }
 0xe15   : > { %v6696_v7 = vpop.eup %5218  ;;  %5224 = vrcp.f32 %v2581_v4  ;;  %v2918_v53 = vsub.f32 %v6607_v48, %v2908_v25  ;;  %v2928_v26 = vmul.f32 1.442695, %v2921_v24 }
 0xe16   : > { %v2933_v37 = vsel %vm767_vm8, %v6696_v7, 0.0  ;;  %5226 = vpow2.f32 %v2696_v41 }
 0xe17   : > { %v6700_v57 = vpop.eup %5220  ;;  %2934 = vadd.xlane.f32.xlu1 %v2933_v37  ;;  %5228 = vpow2.f32 %v2812_v55 }
 0xe18   : > { %v2820_v63 = vsel %vm767_vm8, %v6700_v57, 0.0  ;;  %v5223_v40 = vpop.eup %5222 }
 0xe19   : > { %2821 = vadd.xlane.f32.xlu2 %v2820_v63  ;;  %2705 = vadd.xlane.f32.xlu0 %v2704_v46  ;;  %v2592_v2 = vmul.f32 %v5223_v40, %v6580_v45  ;;  %v2922_v45 = vmul.f32 1.442695, %v2918_v53 }
 0xe1b   : > { %v5225_v12 = vpop.eup %5224 }
 0xe1c   : > { %v2593_v30 = vmul.f32 %v5225_v12, %v6609_v54  ;;  %v2584_v61 = vpop.xlane.xlu1 %2583  ;;  %v2587_v38 = vpop.xlane.xlu0 %2586 }
 0xe1d   : > { %v6709_v62 = vpop.eup %5226  ;;  %5230 = vrcp.f32 %v2584_v61 }
 0xe1e   : > { %v2596_v44 = vpack.c.bf16 %v2593_v30, %v2592_v2  ;;  %v2707_v5 = vsel %vm767_vm8, %v6709_v62, 0.0  ;;  %5232 = vrcp.f32 %v2587_v38  ;;  %v6715_v60 = vpop.eup %5228  ;;  %v3143_v63 = vpop.xlane.xlu2 %3142 }
 0xe1f   : > { %5234 = vpow2.f32 %v2922_v45  ;;  %v2823_v34 = vsel %vm767_vm8, %v6715_v60, 0.0  ;;  %v3151_v12 = vsub.f32 %v6622_v49, %v3143_v63 }
 0xe20   : > { %4528 = vmatmul.msk.bf16.vlgmr.msrb.gmra.mxu3 %vm767_vm8, %v2596_v44 }
 0xe21   : > { %2708 = vadd.xlane.f32.xlu0 %v2707_v5  ;;  %v3156_v2 = vmul.f32 1.442695, %v3151_v12 }
 0xe23   : > { %v5231_v13 = vpop.eup %5230 }
 0xe24   : > { %v3024_v9 = vpop.xlane.xlu1 %3023  ;;  %v3027_v54 = vpop.xlane.xlu0 %3026  ;;  %v2594_v27 = vmul.f32 %v5231_v13, %v6617_v16 }
 0xe25   : > { %v3034_v3 = vsub.f32 %v6631_v35, %v3024_v9  ;;  %v5233_v48 = vpop.eup %5232  ;;  %v3035_v6 = vsub.f32 %v6634_v0, %v3027_v54 }
 0xe26   : > { %v2595_v18 = vmul.f32 %v5233_v48, %v6619_v52  ;;  %v6724_v42 = vpop.eup %5234  ;;  %v3146_v32 = vpop.xlane.xlu2 %3145 }
 0xe27   : > { %v3038_v51 = vmul.f32 1.442695, %v3034_v3  ;;  %v3040_v11 = vmul.f32 1.442695, %v3035_v6  ;;  %v2930_v16 = vsel %vm767_vm8, %v6724_v42, 0.0  ;;  %v3152_v9 = vsub.f32 %v6637_v8, %v3146_v32 }
 0xe28   : > { %v2597_v19 = vpack.c.bf16 %v2595_v18, %v2594_v27 }
 0xe29   : > { %5236 = vpow2.f32 %v3038_v51  ;;  %2824 = vadd.xlane.f32.xlu0 %v2823_v34  ;;  %v3158_v24 = vmul.f32 1.442695, %v3152_v9 }
 0xe2a   : > { %5238 = vpow2.f32 %v2928_v26 }
 0xe2b   : > { %5240 = vpow2.f32 %v3040_v11 }
 0xe2c   : > { %v2914_v35 = vpop.xlane.xlu0 %2913  ;;  %v3030_v49 = vpop.xlane.xlu1 %3029 }
 0xe2d   : > { %v2920_v17 = vsub.f32 %v6646_v22, %v2914_v35 }
 0xe2f   : > { %v6727_v20 = vpop.eup %5236  ;;  %v2926_v0 = vmul.f32 1.442695, %v2920_v17 }
 0xe30   : > { %4529 = vmatmul.msk.bf16.gmra.mxu3 %vm767_vm8, %v2597_v19  ;;  %v3046_v21 = vsel %vm767_vm8, %v6727_v20, 0.0  ;;  %v6734_v52 = vpop.eup %5238 }
 0xe31   : > { %3047 = vadd.xlane.f32.xlu2 %v3046_v21  ;;  %2931 = vadd.xlane.f32.xlu0 %v2930_v16  ;;  %5242 = vpow2.f32 %v2926_v0  ;;  %v6736_v41 = vpop.eup %5240  ;;  %v2939_v25 = vsel %vm767_vm8, %v6734_v52, 0.0 }
 0xe32   : > { %v3049_v37 = vsel %vm767_vm8, %v6736_v41, 0.0 }
 0xe34   : > { %v3033_v22 = vpop.xlane.xlu0 %3032 }
 0xe37   : > { %v6738_v4 = vpop.eup %5242 }
 0xe38   : > { %v2936_v56 = vsel %vm767_vm8, %v6738_v4, 0.0 }
 0xe39   : > { %2940 = vadd.xlane.f32.xlu2 %v2939_v25  ;;  %3050 = vadd.xlane.f32.xlu0 %v3049_v37 }
 0xe3a   : > { %2937 = vadd.xlane.f32.xlu1 %v2936_v56 }
 0xe3c   : > { %v3140_v46 = vpop.xlane.xlu0 %3139 }
 0xe3d   : > { %v3150_v40 = vsub.f32 %v6661_v28, %v3140_v46  ;;  %v3036_v28 = vsub.f32 %v6649_v29, %v3030_v49  ;;  %v3037_v29 = vsub.f32 %v6656_v36, %v3033_v22 }
 0xe3f   : > { %v3154_v55 = vmul.f32 1.442695, %v3150_v40  ;;  %v3042_v53 = vmul.f32 1.442695, %v3036_v28  ;;  %v3044_v51 = vmul.f32 1.442695, %v3037_v29 }
 0xe41   : > { %5244 = vpow2.f32 %v3154_v55 }
 0xe42   : > { %5246 = vpow2.f32 %v3156_v2 }
 0xe43   : > { %5248 = vpow2.f32 %v3042_v53 }
 0xe44   : > { %v3149_v5 = vpop.xlane.xlu0 %3148 }
 0xe45   : > { %v3153_v45 = vsub.f32 %v6666_v15, %v3149_v5 }
 0xe47   : > { %v6748_v30 = vpop.eup %5244  ;;  %v3160_v54 = vmul.f32 1.442695, %v3153_v45 }
 0xe48   : > { %v3162_v61 = vsel %vm767_vm8, %v6748_v30, 0.0  ;;  %v6752_v38 = vpop.eup %5246 }
 0xe49   : > { %3163 = vadd.xlane.f32.xlu0 %v3162_v61  ;;  %v3165_v44 = vsel %vm767_vm8, %v6752_v38, 0.0  ;;  %v6767_v13 = vpop.eup %5248  ;;  %5250 = vpow2.f32 %v3160_v54 }
 0xe4a   : > { %5252 = vpow2.f32 %v3158_v24 }
 0xe4f   : > { %v6772_v15 = vpop.eup %5250 }
 0xe50   : > { %v6774_v8 = vpop.eup %5252  ;;  %v3171_v34 = vsel %vm767_vm8, %v6772_v15, 0.0 }
 0xe51   : > { %3070 = vrot.lane.b32.xlu2 %v6478_v58, %s5383_s7  ;;  %3166 = vadd.xlane.f32.xlu0 %v3165_v44  ;;  %v3168_v36 = vsel %vm767_vm8, %v6774_v8, 0.0 }
 0xe53   : > { %3068 = vrot.lane.b32.xlu1 %v6484_v33, %s5383_s7 }
 0xe5b   : > { %3184 = vrot.lane.b32.xlu1 %v6484_v33, %s5384_s8  ;;  %v2700_v33 = vpop.xlane.xlu1 %2699 }
 0xe5c   : > { %5254 = vrcp.f32 %v2700_v33 }
 0xe62   : > { %v5255_v6 = vpop.eup %5254 }
 0xe63   : > { %v2714_v27 = vmul.f32 %v5255_v6, %v6671_v59 }
 0xe65   : > { %3186 = vrot.lane.b32.xlu0 %v6478_v58, %s5384_s8  ;;  %v3052_v58 = vsel %vm767_vm8, %v6767_v13, 0.0 }
 0xe74   : > { %v2816_v3 = vpop.xlane.xlu0 %2815 }
 0xe7a   : > { %3053 = vadd.xlane.f32.xlu2 %v3052_v58 }
 0xe7c   : > { %v2703_v48 = vpop.xlane.xlu0 %2702 }
 0xe7d   : > { %5256 = vrcp.f32 %v2703_v48 }
 0xe7e   : > { %5258 = vrcp.f32 %v2816_v3 }
 0xe7f   : > { %5260 = vpow2.f32 %v3044_v51 }
 0xe82   : > { %3172 = vadd.xlane.f32.xlu2 %v3171_v34 }
 0xe83   : > { %v5257_v26 = vpop.eup %5256 }
 0xe84   : > { %v2715_v18 = vmul.f32 %v5257_v26, %v6682_v50  ;;  %v2819_v11 = vpop.xlane.xlu0 %2818  ;;  %v5259_v17 = vpop.eup %5258 }
 0xe85   : > { %3169 = vadd.xlane.f32.xlu1 %v3168_v36  ;;  %5262 = vrcp.f32 %v2819_v11  ;;  %v6783_v19 = vpop.eup %5260  ;;  %v2830_v21 = vmul.f32 %v5259_v17, %v6677_v10 }
 0xe86   : > { %v2718_v35 = vpack.c.bf16 %v2715_v18, %v2714_v27  ;;  %v3055_v50 = vsel %vm767_vm8, %v6783_v19, 0.0 }
 0xe88   : > { %4532 = vmatmul.msk.bf16.vlgmr.msrb.gmra.mxu1 %vm767_vm8, %v2718_v35 }
 0xe8a   : > { %v2935_v55 = vpop.xlane.xlu1 %2934 }
 0xe8b   : > { %v5263_v0 = vpop.eup %5262 }
 0xe8c   : > { %v2831_v16 = vmul.f32 %v5263_v0, %v6688_v31  ;;  %v2706_v59 = vpop.xlane.xlu0 %2705  ;;  %v2822_v37 = vpop.xlane.xlu2 %2821 }
 0xe8d   : > { %5264 = vrcp.f32 %v2706_v59 }
 0xe8e   : > { %v2834_v22 = vpack.c.bf16 %v2831_v16, %v2830_v21 }
 0xe8f   : > { %3056 = vadd.xlane.f32.xlu0 %v3055_v50 }
 0xe90   : > { %4536 = vmatmul.msk.bf16.vlgmr.msra.gmra.mxu3 %vm767_vm8, %v2834_v22 }
 0xe93   : > { %v5265_v56 = vpop.eup %5264 }
 0xe94   : > { %v2709_v25 = vpop.xlane.xlu0 %2708  ;;  %v2716_v46 = vmul.f32 %v5265_v56, %v6694_v14 }
 0xe95   : > { %5266 = vrcp.f32 %v2709_v25 }
 0xe96   : > { %5268 = vrcp.f32 %v2822_v37 }
 0xe9b   : > { %v5267_v63 = vpop.eup %5266 }
 0xe9c   : > { %v2717_v10 = vmul.f32 %v5267_v63, %v6709_v62  ;;  %v2825_v31 = vpop.xlane.xlu0 %2824  ;;  %v5269_v12 = vpop.eup %5268 }
 0xe9d   : > { %5270 = vrcp.f32 %v2825_v31  ;;  %v2832_v61 = vmul.f32 %v5269_v12, %v6700_v57 }
 0xe9e   : > { %v2719_v40 = vpack.c.bf16 %v2717_v10, %v2716_v46  ;;  %5272 = vrcp.f32 %v2935_v55 }
 0xea0   : > { %4533 = vmatmul.msk.bf16.gmra.mxu1 %vm767_vm8, %v2719_v40 }
 0xea3   : > { %v5271_v2 = vpop.eup %5270 }
 0xea4   : > { %v2833_v44 = vmul.f32 %v5271_v2, %v6715_v60  ;;  %v3048_v49 = vpop.xlane.xlu2 %3047  ;;  %v2932_v28 = vpop.xlane.xlu0 %2931 }
 0xea5   : > { %5274 = vrcp.f32 %v2932_v28  ;;  %v5273_v14 = vpop.eup %5272 }
 0xea6   : > { %v2835_v53 = vpack.c.bf16 %v2833_v44, %v2832_v61  ;;  %v2947_v32 = vmul.f32 %v5273_v14, %v6696_v7 }
 0xea8   : > { %4537 = vmatmul.msk.bf16.gmra.mxu3 %vm767_vm8, %v2835_v53 }
 0xeab   : > { %v5275_v62 = vpop.eup %5274 }
 0xeac   : > { %v2941_v5 = vpop.xlane.xlu2 %2940  ;;  %v2946_v45 = vmul.f32 %v5275_v62, %v6724_v42  ;;  %v3051_v3 = vpop.xlane.xlu0 %3050 }
 0xead   : > { %v2938_v54 = vpop.xlane.xlu1 %2937  ;;  %5276 = vrcp.f32 %v2941_v5 }
 0xeae   : > { %v2950_v9 = vpack.c.bf16 %v2947_v32, %v2946_v45  ;;  %5278 = vrcp.f32 %v2938_v54 }
 0xeaf   : > { %5280 = vrcp.f32 %v3051_v3 }
 0xeb0   : > { %4540 = vmatmul.msk.bf16.vlgmr.msra.gmra.mxu1 %vm767_vm8, %v2950_v9  ;;  %5282 = vrcp.f32 %v3048_v49 }
 0xeb3   : > { %v5277_v60 = vpop.eup %5276 }
 0xeb4   : > { %v3071_v57 = vpop.permute.xlu2 %3070  ;;  %v5279_v24 = vpop.eup %5278  ;;  %v2949_v33 = vmul.f32 %v5277_v60, %v6734_v52 }
 0xeb5   : > { %3086 = vmatpush.bf16.msrb.mxu3 %v3071_v57  ;;  %v2948_v58 = vmul.f32 %v5279_v24, %v6738_v4  ;;  %v5281_v29 = vpop.eup %5280 }
 0xeb6   : > { %v5283_v42 = vpop.eup %5282  ;;  %v3063_v48 = vmul.f32 %v5281_v29, %v6736_v41 }
 0xeb7   : > { %v2951_v7 = vpack.c.bf16 %v2949_v33, %v2948_v58  ;;  %v3062_v6 = vmul.f32 %v5283_v42, %v6727_v20  ;;  %v6808_v20 = vpop.f32.mrf.mxu3 }
 0xeb9   : > { %v3066_v26 = vpack.c.bf16 %v3063_v48, %v3062_v6  ;;  %v4870_v6 = vld [vmem:[%s7265_s1 + $0x238] sm:$0xff] }
 0xeba   : > { %3361 = vmatpush.bf16.msra.mxu2 %v4870_v6 }
 0xebc   : > { %v3164_v51 = vpop.xlane.xlu0 %3163 }
 0xebf   : > { %v6810_v21 = vpop.f32.mrf.mxu3 }
 0xec0   : > { %4541 = vmatmul.msk.bf16.gmra.mxu1 %vm767_vm8, %v2951_v7 }
 0xec4   : > { %v3167_v27 = vpop.xlane.xlu0 %3166 }
 0xec5   : > { %v3069_v34 = vpop.permute.xlu1 %3068  ;;  %5284 = vrcp.f32 %v3167_v27  ;;  %v4867_v27 = vld [vmem:[%s7265_s1 + $0x220] sm:$0xff] }
 0xec6   : > { %3087 = vmatpush.bf16.msrb.mxu3 %v3069_v34  ;;  %5286 = vrcp.f32 %v3164_v51  ;;  %v4869_v34 = vld [vmem:[%s7265_s1 + $0x230] sm:$0xff] }
 0xec7   : > { %v6814_v50 = vpop.f32.mrf.mxu3  ;;  %3362 = vmatpush.bf16.msra.mxu2 %v4869_v34 }
 0xec9   : > { %4544 = vmatmul.msk.bf16.vlgmr.msrb.gmra.mxu3 %vm767_vm8, %v3066_v26  ;;  %v4868_v26 = vld [vmem:[%s7265_s1 + $0x228] sm:$0xff] }
 0xecb   : > { %v5285_v52 = vpop.eup %5284  ;;  %3363 = vmatpush.bf16.msra.mxu2 %v4868_v26 }
 0xecc   : > { %v5287_v18 = vpop.eup %5286  ;;  %v3179_v36 = vmul.f32 %v5285_v52, %v6752_v38  ;;  %v4866_v52 = vld [vmem:[%s7265_s1 + $0x218] sm:$0xff] }
 0xecd   : > { %v3178_v11 = vmul.f32 %v5287_v18, %v6748_v30  ;;  %v3185_v41 = vpop.permute.xlu1 %3184 }
 0xecf   : > { %v3182_v35 = vpack.c.bf16 %v3179_v36, %v3178_v11  ;;  %v6819_v40 = vpop.f32.mrf.mxu3  ;;  %3364 = vmatpush.bf16.msra.mxu2 %v4867_v27 }
 0xed3   : > { %3365 = vmatpush.bf16.msra.mxu2 %v4866_v52 }
 0xed7   : > { %v3187_v4 = vpop.permute.xlu0 %3186 }
 0xed8   : > { %3202 = vmatpush.bf16.msrb.mxu1 %v3187_v4  ;;  %v4865_v4 = vld [vmem:[%s7265_s1 + $0x210] sm:$0xff] }
 0xed9   : > { %3366 = vmatpush.bf16.msra.mxu2 %v4865_v4 }
 0xedc   : > { %3203 = vmatpush.bf16.msrb.mxu1 %v3185_v41 }
 0xedf   : > { %4548 = vmatmul.msk.bf16.vlgmr.msrb.gmra.mxu1 %vm767_vm8, %v3182_v35 }
 0xeed   : > { %v3054_v17 = vpop.xlane.xlu2 %3053 }
 0xef5   : > { %v3173_v0 = vpop.xlane.xlu2 %3172 }
 0xef6   : > { %5288 = vrcp.f32 %v3173_v0 }
 0xef8   : > { %v3170_v16 = vpop.xlane.xlu1 %3169 }
 0xef9   : > { %5290 = vrcp.f32 %v3170_v16 }
 0xefa   : > { %5292 = vrcp.f32 %v3054_v17 }
 0xefc   : > { %v5289_v59 = vpop.eup %5288 }
 0xefd   : > { %v3181_v38 = vmul.f32 %v5289_v59, %v6772_v15 }
 0xeff   : > { %v5291_v22 = vpop.eup %5290 }
 0xf00   : > { %v3180_v30 = vmul.f32 %v5291_v22, %v6774_v8  ;;  %v5293_v63 = vpop.eup %5292 }
 0xf01   : > { %v3064_v10 = vmul.f32 %v5293_v63, %v6767_v13 }
 0xf02   : > { %v3057_v25 = vpop.xlane.xlu0 %3056  ;;  %v3183_v37 = vpack.c.bf16 %v3181_v38, %v3180_v30 }
 0xf03   : > { %5294 = vrcp.f32 %v3057_v25 }
 0xf04   : > { %4549 = vmatmul.msk.bf16.gmra.mxu1 %vm767_vm8, %v3183_v37 }
 0xf05   : > { %v2741_v56 = vpop.f32.mrf.mxu1 }
 0xf09   : > { %v5295_v46 = vpop.eup %5294 }
 0xf0a   : > { %v3065_v31 = vmul.f32 %v5295_v46, %v6783_v19 }
 0xf0c   : > { %v3067_v15 = vpack.c.bf16 %v3065_v31, %v3064_v10 }
 0xf0d   : > { %v2743_v12 = vpop.f32.mrf.mxu1 }
 0xf0e   : > { %v5028_v8 = vpack.i.bf16 %v2743_v12, %v2741_v56  ;;  %4545 = vmatmul.msk.bf16.gmra.mxu3 %vm767_vm8, %v3067_v15 }
 0xf10   : > { %5029 = vrot.lane.b32.xlu2 %v5028_v8, %s5386_s10 }
 0xf13   : > { %v2857_v55 = vpop.f32.mrf.mxu3 }
 0xf1b   : > { %v2859_v2 = vpop.f32.mrf.mxu3 }
 0xf1c   : > { %v5033_v61 = vpack.i.bf16 %v2859_v2, %v2857_v55 }
 0xf1d   : > { %v2746_v44 = vpop.f32.mrf.mxu1 }
 0xf1e   : > { %5034 = vrot.lane.b32.xlu0 %v5033_v61, %s7273_s30 }
 0xf25   : > { %v2748_v49 = vpop.f32.mrf.mxu1 }
 0xf26   : > { %v5048_v57 = vpack.i.bf16 %v2748_v49, %v2746_v44 }
 0xf2b   : > { %v2862_v19 = vpop.f32.mrf.mxu3 }
 0xf2d   : > { %v2973_v28 = vpop.f32.mrf.mxu1 }
 0xf33   : > { %v2864_v14 = vpop.f32.mrf.mxu3 }
 0xf34   : > { %v5058_v33 = vpack.i.bf16 %v2864_v14, %v2862_v19 }
 0xf35   : > { %v2975_v13 = vpop.f32.mrf.mxu1 }
 0xf36   : > { %v5038_v53 = vpack.i.bf16 %v2975_v13, %v2973_v28 }
 0xf38   : > { %5039 = vrot.lane.b32.xlu1 %v5038_v53, %s5384_s8 }
 0xf3d   : > { %v2978_v62 = vpop.f32.mrf.mxu1 }
 0xf45   : > { %v2980_v32 = vpop.f32.mrf.mxu1 }
 0xf46   : > { %v5063_v3 = vpack.i.bf16 %v2980_v32, %v2978_v62 }
 0xf4c   : > { %v3089_v5 = vpop.f32.mrf.mxu3 }
 0xf54   : > { %v3091_v45 = vpop.f32.mrf.mxu3 }
 0xf55   : > { %v5043_v9 = vpack.i.bf16 %v3091_v45, %v3089_v5 }
 0xf57   : > { %5044 = vrot.lane.b32.xlu2 %v5043_v9, %s5383_s7 }
 0xf5c   : > { %v3205_v54 = vpop.f32.mrf.mxu1 }
 0xf5f   : > { %5049 = vrot.lane.b32.xlu2 %v5048_v57, %s5386_s10  ;;  %s4133_s10 = sshll.u32 %s189_s6, 5 }
 0xf60   : > { %s191_s28 = scalar_lea.vmem [#allocation2], %s4133_s10 }
 0xf61   : > { %s4064_s9 = sshll.u32 %s191_s28, 4  ;;  %s4065_s9 = int_to_ptr.vmem [resolvable:$true] %s4064_s9 }
 0xf64   : > { %v3207_v60 = vpop.f32.mrf.mxu1 }
 0xf65   : > { %v5053_v24 = vpack.i.bf16 %v3207_v60, %v3205_v54 }
 0xf67   : > { %5064 = vrot.lane.b32.xlu2 %v5063_v3, %s5384_s8  ;;  %5054 = vrot.lane.b32.xlu0 %v5053_v24, %s5380_s5 }
 0xf6a   : > { %v5030_v18 = vpop.permute.xlu2 %5029 }
 0xf6b   : > { %v5032_v41 = vunpack.i.h.bf16 %v5030_v18  ;;  %v5031_v35 = vunpack.i.l.bf16 %v5030_v18 }
 0xf6d   : > { %v3296_v25 = vsel %vm735_vm3, %v6810_v21, %v5032_v41  ;;  %v3295_v37 = vsel %vm735_vm3, %v6808_v20, %v5031_v35 }
 0xf6f   : > { %5059 = vrot.lane.b32.xlu0 %v5058_v33, %s7273_s30 }
 0xf81   : > { %v3210_v58 = vpop.f32.mrf.mxu1 }
 0xf89   : > { %v3212_v7 = vpop.f32.mrf.mxu1 }
 0xf8a   : > { %v5073_v29 = vpack.i.bf16 %v3212_v7, %v3210_v58 }
 0xf8c   : > { %5074 = vrot.lane.b32.xlu0 %v5073_v29, %s5380_s5 }
 0xf90   : > { %v5035_v36 = vpop.permute.xlu0 %5034 }
 0xf91   : > { %v3094_v42 = vpop.f32.mrf.mxu3  ;;  %v5037_v0 = vunpack.i.h.bf16 %v5035_v36  ;;  %v5036_v16 = vunpack.i.l.bf16 %v5035_v36 }
 0xf93   : > { %v3300_v56 = vsel %vm767_vm8, %v3296_v25, %v5037_v0  ;;  %v3299_v63 = vsel %vm767_vm8, %v3295_v37, %v5036_v16 }
 0xf99   : > { %v3096_v48 = vpop.f32.mrf.mxu3 }
 0xf9a   : > { %v5068_v51 = vpack.i.bf16 %v3096_v48, %v3094_v42 }
 0xf9c   : > { %5069 = vrot.lane.b32.xlu1 %v5068_v51, %s5383_s7  ;;  %v2214_v51 = vld [vmem:[%s7267_s3 + $0x152] ss:$0 sm:$0xff]  ;;  %s4063_s7 = scalar_lea.hbm %s7268_s4, %s4919_s29 }
 0xf9d   : > { %s4066_s12 = sshll.u32 %s4063_s7, 4  ;;  %s4067_s12 = int_to_ptr.hbm [resolvable:$true] %s4066_s12 }
 0xf9e   : > { %s5326_s14 = sshra.s32 %s4067_s12, 4  ;;  %s5327_s14 = int_to_ptr.hbm [resolvable:$true] %s5326_s14 }
 0xf9f   : > { %s5328_s20 = scalar_lea.hbm %s5327_s14, 32  ;;  %p5333_p0 = scmp.lt.s32.totalorder %s5327_s14, %s7268_s4 }
 0xfa0   : > { %p5329_p11 = scmp.ne.s32.totalorder %s5327_s14, %s5328_s20  ;;  %p5334_p1 = scmp.lt.s32.totalorder %s5332_s23, %s5328_s20 }
 0xfa2   : > { %p5330_p12 = pnand %p5329_p11, %p5452_p5  ;;  %p5335_p2 = por %p5334_p1, %p5333_p0 }
 0xfa4   : > { %p5331_p13 = pneg %p5330_p12 }
 0xfa6   : > { %p5336_p3 = pnand %p5335_p2, %p5331_p13 }
 0xfaa   : > { %v5040_v11 = vpop.permute.xlu1 %5039 }
 0xfab   : > { %v5042_v59 = vunpack.i.h.bf16 %v5040_v11  ;;  %v5041_v22 = vunpack.i.l.bf16 %v5040_v11 }
 0xfad   : > { %v3303_v10 = vsel %vm1519_vm10, %v3299_v63, %v5041_v22  ;;  %v3304_v31 = vsel %vm1519_vm10, %v3300_v56, %v5042_v59 }
 0xfb1   : > { %v5045_v17 = vpop.permute.xlu2 %5044 }
 0xfb2   : > { %v5047_v38 = vunpack.i.h.bf16 %v5045_v17  ;;  %v5046_v30 = vunpack.i.l.bf16 %v5045_v17 }
 0xfb4   : > { %v3307_v8 = vsel %vm1524_vm11, %v3303_v10, %v5046_v30  ;;  %v3308_v55 = vsel %vm1524_vm11, %v3304_v31, %v5047_v38 }
 0xfb9   : > { %v5050_v61 = vpop.permute.xlu2 %5049 }
 0xfba   : > { %v5052_v49 = vunpack.i.h.bf16 %v5050_v61  ;;  %v5051_v28 = vunpack.i.l.bf16 %v5050_v61  ;;  %v4638_v61 = vld [vmem:[%s7266_s2 + $0x108] sm:$0xf] }
 0xfbc   : > { %v3298_v14 = vsel %vm735_vm3, %v6819_v40, %v5052_v49  ;;  %v3297_v62 = vsel %vm735_vm3, %v6814_v50, %v5051_v28  ;;  %v4910_v49 = vld [vmem:[%s7266_s2 + $0x10c] sm:$0xf] }
 0xfc1   : > { %v5065_v19 = vpop.permute.xlu2 %5064 }
 0xfc2   : > { %v5067_v9 = vunpack.i.h.bf16 %v5065_v19  ;;  %v5066_v54 = vunpack.i.l.bf16 %v5065_v19  ;;  %v4912_v19 = vld [vmem:[%s7266_s2 + $0x118] sm:$0xf0] }
 0xfd9   : > { %v5055_v46 = vpop.permute.xlu0 %5054 }
 0xfda   : > { %v5057_v15 = vunpack.i.h.bf16 %v5055_v46  ;;  %v5056_v12 = vunpack.i.l.bf16 %v5055_v46 }
 0xfdc   : > { %v3311_v21 = vsel %vm1529_vm12, %v3307_v8, %v5056_v12  ;;  %v3312_v2 = vsel %vm1529_vm12, %v3308_v55, %v5057_v15 }
 0xfdd   : > { %v3315_v20 = vpack.c.bf16 %v3312_v2, %v3311_v21 }
 0xfdf   : > { %4574 = vmatmul.msk.bf16.vlgmr.msra.gmra.mxu2 %vm426_vm5, %v3315_v20 }
 0xfe1   : > { %v5060_v44 = vpop.permute.xlu0 %5059 }
 0xfe2   : > { %v5062_v13 = vunpack.i.h.bf16 %v5060_v44  ;;  %v5061_v53 = vunpack.i.l.bf16 %v5060_v44  ;;  %v4911_v44 = vld [vmem:[%s7266_s2 + $0x110] sm:$0xf0] }
 0xfe3   : > { %v4639_v28 = vor.u32 %v4911_v44, %v4638_v61  ;;  %v4897_v61 = vld [vmem:[%s7266_s2 + $0xa0] sm:$0xf0] }
 0xfe4   : > { %v3302_v5 = vsel %vm767_vm8, %v3298_v14, %v5062_v13  ;;  %v3301_v32 = vsel %vm767_vm8, %v3297_v62, %v5061_v53  ;;  %v4640_v13 = vld [vmem:[%s7266_s2 + $0x114] sm:$0xf0]  ;;  %v4646_v53 = vld [vmem:[%s7266_s2 + $0x110] sm:$0xf] }
 0xfe5   : > { %v3305_v58 = vsel %vm1519_vm10, %v3301_v32, %v5066_v54  ;;  %v3306_v7 = vsel %vm1519_vm10, %v3302_v5, %v5067_v9  ;;  %v4643_v14 = vor.u32 %v4910_v49, %v4640_v13  ;;  %v4647_v62 = vor.u32 %v4912_v19, %v4646_v53  ;;  %3595 = vmatpush.bf16.msra.mxu3 %v4639_v28  ;;  %v4626_v5 = vld [vmem:[%s7266_s2 + $0xf0] sm:$0xf]  ;;  %v4908_v32 = vld [vmem:[%s7266_s2 + $0xf8] sm:$0xf0]  ;;  %v4628_v54 = vld [vmem:[%s7266_s2 + $0xfc] sm:$0xf0] }
 0xfe6   : > { %v4627_v9 = vor.u32 %v4908_v32, %v4626_v5 }
 0xfe7   : > { %3614 = vmatpush.bf16.msra.mxu0 %v4643_v14  ;;  %3633 = vmatpush.bf16.msra.mxu1 %v4647_v62 }
 0xfe9   : > { %3596 = vmatpush.bf16.msra.mxu3 %v4627_v9 }
 0xffe   : > { %v5075_v45 = vpop.permute.xlu0 %5074 }
 0xfff   : > { %v5077_v24 = vunpack.i.h.bf16 %v5075_v45  ;;  %v5076_v33 = vunpack.i.l.bf16 %v5075_v45  ;;  %v4907_v45 = vld [vmem:[%s7266_s2 + $0xf4] sm:$0xf] }
0x100e   : > { %v5070_v57 = vpop.permute.xlu1 %5069 }
0x100f   : > { %v5072_v60 = vunpack.i.h.bf16 %v5070_v57  ;;  %v5071_v3 = vunpack.i.l.bf16 %v5070_v57  ;;  %v4634_v57 = vld [vmem:[%s7266_s2 + $0xf8] sm:$0xf] }
0x1011   : > { %v3309_v40 = vsel %vm1524_vm11, %v3305_v58, %v5071_v3  ;;  %v3310_v50 = vsel %vm1524_vm11, %v3306_v7, %v5072_v60  ;;  %v4909_v60 = vld [vmem:[%s7266_s2 + $0x100] sm:$0xf0]  ;;  %v4631_v3 = vor.u32 %v4907_v45, %v4628_v54  ;;  %v4904_v7 = vld [vmem:[%s7266_s2 + $0xdc] sm:$0xf] }
0x1012   : > { %v3313_v29 = vsel %vm1529_vm12, %v3309_v40, %v5076_v33  ;;  %v3314_v42 = vsel %vm1529_vm12, %v3310_v50, %v5077_v24  ;;  %v4635_v24 = vor.u32 %v4909_v60, %v4634_v57  ;;  %v4614_v33 = vld [vmem:[%s7266_s2 + $0xd8] sm:$0xf]  ;;  %v4905_v58 = vld [vmem:[%s7266_s2 + $0xe0] sm:$0xf0]  ;;  %v4616_v50 = vld [vmem:[%s7266_s2 + $0xe4] sm:$0xf0] }
0x1013   : > { %v3316_v48 = vpack.c.bf16 %v3314_v42, %v3313_v29  ;;  %3615 = vmatpush.bf16.msra.mxu0 %v4631_v3  ;;  %v4615_v40 = vor.u32 %v4905_v58, %v4614_v33  ;;  %v4622_v29 = vld [vmem:[%s7266_s2 + $0xe0] sm:$0xf]  ;;  %v4906_v42 = vld [vmem:[%s7266_s2 + $0xe8] sm:$0xf0]  ;;  %v7041_v33 = vld [vmem:[%s7267_s3 + $0x153] ss:$0 sm:$0xff] }
0x1014   : > { %3634 = vmatpush.bf16.msra.mxu1 %v4635_v24 }
0x1015   : > { %4575 = vmatmul.msk.bf16.gmra.mxu2 %vm426_vm5, %v3316_v48  ;;  %v4619_v48 = vor.u32 %v4904_v7, %v4616_v50  ;;  %3597 = vmatpush.bf16.msra.mxu3 %v4615_v40 }
0x1017   : > { %3616 = vmatpush.bf16.msra.mxu0 %v4619_v48 }
0x1062   : > { %v3368_v6 = vpop.f32.mrf.mxu2 }
0x1063   : > { %v3378_v34 = vadd.f32 %v3368_v6, %v6355_v43  ;;  %v4602_v6 = vld [vmem:[%s7266_s2 + $0xc0] sm:$0xf] }
0x1065   : > { %v6880_v26 = vadd.f32 %v3378_v34, %v2214_v51  ;;  %v4902_v34 = vld [vmem:[%s7266_s2 + $0xc8] sm:$0xf0] }
0x1067   : > { %v3386_v27 = vsel %vm426_vm5, %v6880_v26, 0.0 }
0x1068   : > { %3387 = vadd.xlane.f32.xlu2 %v3386_v27  ;;  %v4901_v27 = vld [vmem:[%s7266_s2 + $0xc4] sm:$0xf] }
0x106a   : > { %v3370_v52 = vpop.f32.mrf.mxu2 }
0x106b   : > { %v3379_v4 = vadd.f32 %v3370_v52, %v6360_v23  ;;  %v4603_v52 = vor.u32 %v4902_v34, %v4602_v6 }
0x106d   : > { %v6885_v18 = vadd.f32 %v3379_v4, %v2214_v51  ;;  %v4604_v4 = vld [vmem:[%s7266_s2 + $0xcc] sm:$0xf0]  ;;  %3598 = vmatpush.bf16.msra.mxu3 %v4603_v52  ;;  %v4886_v52 = vld [vmem:[%s7265_s1 + $0x2b8] sm:$0xff] }
0x106f   : > { %v3389_v36 = vsel %vm426_vm5, %v6885_v18, 0.0 }
0x1070   : > { %3390 = vadd.xlane.f32.xlu1 %v3389_v36  ;;  %v4610_v36 = vld [vmem:[%s7266_s2 + $0xc8] sm:$0xf] }
0x1098   : > { %v3373_v11 = vpop.f32.mrf.mxu2 }
0x1099   : > { %v3380_v41 = vadd.f32 %v3373_v11, %v6365_v39  ;;  %v4903_v11 = vld [vmem:[%s7266_s2 + $0xd0] sm:$0xf0] }
0x109b   : > { %v6890_v35 = vadd.f32 %v3380_v41, %v2214_v51  ;;  %v4607_v41 = vor.u32 %v4901_v27, %v4604_v4  ;;  %v4894_v4 = vld [vmem:[%s7265_s1 + $0x2f8] sm:$0xff] }
0x109d   : > { %v3392_v43 = vsel %vm426_vm5, %v6890_v35, 0.0  ;;  %3617 = vmatpush.bf16.msra.mxu0 %v4607_v41  ;;  %v4885_v41 = vld [vmem:[%s7265_s1 + $0x2b0] sm:$0xff] }
0x109e   : > { %3393 = vadd.xlane.f32.xlu0 %v3392_v43  ;;  %v4611_v43 = vor.u32 %v4903_v11, %v4610_v36  ;;  %v4878_v11 = vld [vmem:[%s7265_s1 + $0x278] sm:$0xff] }
0x109f   : > { %3812 = vmatpush.bf16.msrb.mxu2 %v4878_v11 }
0x10a0   : > { %v3375_v17 = vpop.f32.mrf.mxu2 }
0x10a1   : > { %v3381_v0 = vadd.f32 %v3375_v17, %v6370_v1  ;;  %v4590_v17 = vld [vmem:[%s7266_s2 + $0xa8] sm:$0xf] }
0x10a3   : > { %v6895_v16 = vadd.f32 %v3381_v0, %v2214_v51  ;;  %v4623_v51 = vor.u32 %v4906_v42, %v4622_v29  ;;  %v4899_v0 = vld [vmem:[%s7266_s2 + $0xb0] sm:$0xf0] }
0x10a4   : > { %v7048_v29 = vld [vmem:[%s7267_s3 + $0x154] ss:$0 sm:$0xff] }
0x10a5   : > { %v3395_v23 = vsel %vm426_vm5, %v6895_v16, 0.0  ;;  %3635 = vmatpush.bf16.msra.mxu1 %v4623_v51 }
0x10a6   : > { %3396 = vadd.xlane.f32.xlu2 %v3395_v23  ;;  %v4898_v23 = vld [vmem:[%s7266_s2 + $0xac] sm:$0xf] }
0x10a9   : > { %3636 = vmatpush.bf16.msra.mxu1 %v4611_v43  ;;  %v4893_v43 = vld [vmem:[%s7265_s1 + $0x2f0] sm:$0xff] }
0x10db   : > { %v3388_v59 = vpop.xlane.xlu2 %3387 }
0x10dc   : > { %v3398_v22 = vmul.f32 %v3388_v59, %v5532_v47 }
0x10de   : > { %v6901_v39 = vsub.f32 %v6880_v26, %v3398_v22  ;;  %v4591_v22 = vor.u32 %v4899_v0, %v4590_v17 }
0x10e0   : > { %v3406_v38 = vmul.f32 %v6901_v39, %v6901_v39  ;;  %3599 = vmatpush.bf16.msra.mxu3 %v4591_v22 }
0x10e2   : > { %v3410_v30 = vsel %vm426_vm5, %v3406_v38, 0.0  ;;  %v4592_v38 = vld [vmem:[%s7266_s2 + $0xb4] sm:$0xf0] }
0x10e3   : > { %3411 = vadd.xlane.f32.xlu1 %v3410_v30  ;;  %v3391_v25 = vpop.xlane.xlu1 %3390  ;;  %v4598_v30 = vld [vmem:[%s7266_s2 + $0xb0] sm:$0xf] }
0x10e4   : > { %v3399_v1 = vmul.f32 %v3391_v25, %v5532_v47  ;;  %v4900_v25 = vld [vmem:[%s7266_s2 + $0xb8] sm:$0xf0] }
0x10e6   : > { %v6908_v37 = vsub.f32 %v6885_v18, %v3399_v1 }
0x10e8   : > { %v3407_v56 = vmul.f32 %v6908_v37, %v6908_v37 }
0x10ea   : > { %v3413_v63 = vsel %vm426_vm5, %v3407_v56, 0.0  ;;  %v4595_v56 = vor.u32 %v4898_v23, %v4592_v38  ;;  %v4877_v23 = vld [vmem:[%s7265_s1 + $0x270] sm:$0xff]  ;;  %v4884_v38 = vld [vmem:[%s7265_s1 + $0x2a8] sm:$0xff] }
0x10eb   : > { %3414 = vadd.xlane.f32.xlu0 %v3413_v63  ;;  %v4599_v63 = vor.u32 %v4900_v25, %v4598_v30  ;;  %v4892_v30 = vld [vmem:[%s7265_s1 + $0x2e8] sm:$0xff]  ;;  %3813 = vmatpush.bf16.msrb.mxu2 %v4877_v23 }
0x10ec   : > { %3618 = vmatpush.bf16.msra.mxu0 %v4595_v56  ;;  %v4876_v25 = vld [vmem:[%s7265_s1 + $0x268] sm:$0xff] }
0x10ed   : > { %3637 = vmatpush.bf16.msra.mxu1 %v4599_v63  ;;  %v4883_v63 = vld [vmem:[%s7265_s1 + $0x2a0] sm:$0xff] }
0x10ef   : > { %3814 = vmatpush.bf16.msrb.mxu2 %v4876_v25 }
0x1111   : > { %v3394_v46 = vpop.xlane.xlu0 %3393 }
0x1112   : > { %v3400_v10 = vmul.f32 %v3394_v46, %v5532_v47 }
0x1114   : > { %v6915_v31 = vsub.f32 %v6890_v35, %v3400_v10  ;;  %v4578_v10 = vld [vmem:[%s7266_s2 + $0x90] sm:$0xf] }
0x1116   : > { %v3408_v15 = vmul.f32 %v6915_v31, %v6915_v31 }
0x1118   : > { %v3416_v12 = vsel %vm426_vm5, %v3408_v15, 0.0  ;;  %v4896_v15 = vld [vmem:[%s7266_s2 + $0x98] sm:$0xf0] }
0x1119   : > { %3417 = vadd.xlane.f32.xlu2 %v3416_v12  ;;  %v3397_v8 = vpop.xlane.xlu2 %3396  ;;  %v4579_v12 = vor.u32 %v4896_v15, %v4578_v10 }
0x111a   : > { %v3401_v55 = vmul.f32 %v3397_v8, %v5532_v47  ;;  %v4895_v8 = vld [vmem:[%s7266_s2 + $0x94] sm:$0xf] }
0x111b   : > { %3600 = vmatpush.bf16.msra.mxu3 %v4579_v12 }
0x111c   : > { %v6922_v21 = vsub.f32 %v6895_v16, %v3401_v55  ;;  %v4580_v55 = vld [vmem:[%s7266_s2 + $0x9c] sm:$0xf0] }
0x111e   : > { %v3409_v2 = vmul.f32 %v6922_v21, %v6922_v21 }
0x111f   : > { %3831 = vmatpush.bf16.msrb.mxu3 %v4886_v52 }
0x1120   : > { %v3419_v20 = vsel %vm426_vm5, %v3409_v2, 0.0  ;;  %v4586_v2 = vld [vmem:[%s7266_s2 + $0x98] sm:$0xf] }
0x1121   : > { %3420 = vadd.xlane.f32.xlu1 %v3419_v20  ;;  %v4583_v20 = vor.u32 %v4895_v8, %v4580_v55  ;;  %v4587_v44 = vor.u32 %v4897_v61, %v4586_v2 }
0x1123   : > { %3619 = vmatpush.bf16.msra.mxu0 %v4583_v20  ;;  %3638 = vmatpush.bf16.msra.mxu1 %v4587_v44 }
0x1124   : > { %3832 = vmatpush.bf16.msrb.mxu3 %v4885_v41 }
0x1127   : > { %3850 = vmatpush.bf16.msrb.mxu0 %v4894_v4 }
0x1128   : > { %3833 = vmatpush.bf16.msrb.mxu3 %v4884_v38 }
0x112b   : > { %3851 = vmatpush.bf16.msrb.mxu0 %v4893_v43 }
0x112c   : > { %3834 = vmatpush.bf16.msrb.mxu3 %v4883_v63 }
0x112f   : > { %3852 = vmatpush.bf16.msrb.mxu0 %v4892_v30 }
0x1156   : > { %v3412_v59 = vpop.xlane.xlu1 %3411 }
0x1157   : > { %v3422_v1 = vmul.f32 %v3412_v59, %v5532_v47 }
0x1159   : > { %v3426_v46 = vadd.f32 1e-05, %v3422_v1 }
0x115b   : > { %5296 = vrsqrt.f32 %v3426_v46  ;;  %vm3436_vm8 = vweird.f32 %v3426_v46 }
0x115e   : > { %v3415_v49 = vpop.xlane.xlu0 %3414 }
0x115f   : > { %v3423_v28 = vmul.f32 %v3415_v49, %v5532_v47 }
0x1161   : > { %v5297_v13 = vpop.eup %5296  ;;  %v3427_v53 = vadd.f32 1e-05, %v3423_v28 }
0x1162   : > { %v3431_v19 = vmul.f32 %v5297_v13, %v3426_v46  ;;  %vm3437_vm3 = vweird.f32 %v5297_v13  ;;  %v4891_v46 = vld [vmem:[%s7265_s1 + $0x2e0] sm:$0xff] }
0x1163   : > { %5298 = vrsqrt.f32 %v3427_v53  ;;  %vm3438_vm10 = vmor %vm3436_vm8, %vm3437_vm3  ;;  %vm3446_vm12 = vweird.f32 %v3427_v53  ;;  %3853 = vmatpush.bf16.msrb.mxu0 %v4891_v46 }
0x1164   : > { %v3432_v14 = vmul.f32 %v5297_v13, %v3431_v19 }
0x1166   : > { %v3433_v62 = vmul.f32 0.5, %v3432_v14 }
0x1168   : > { %v3434_v5 = vsub.f32 1.5, %v3433_v62 }
0x1169   : > { %v5299_v32 = vpop.eup %5298 }
0x116a   : > { %v3435_v45 = vmul.f32 %v5297_v13, %v3434_v5  ;;  %v3441_v9 = vmul.f32 %v5299_v32, %v3427_v53  ;;  %vm3447_vm11 = vweird.f32 %v5299_v32  ;;  %v4875_v5 = vld [vmem:[%s7265_s1 + $0x260] sm:$0xff] }
0x116b   : > { %vm3448_vm1 = vmor %vm3446_vm12, %vm3447_vm11  ;;  %3815 = vmatpush.bf16.msrb.mxu2 %v4875_v5 }
0x116c   : > { %v3442_v54 = vmul.f32 %v5299_v32, %v3441_v9  ;;  %v3439_v57 = vsel %vm3438_vm10, %v5297_v13, %v3435_v45  ;;  %v4889_v45 = vld [vmem:[%s7265_s1 + $0x2d0] sm:$0xff]  ;;  %v4874_v9 = vld [vmem:[%s7265_s1 + $0x258] sm:$0xff] }
0x116d   : > { %v3470_v24 = vmul.f32 %v3439_v57, %v6901_v39  ;;  %v4888_v57 = vld [vmem:[%s7265_s1 + $0x2c8] sm:$0xff] }
0x116e   : > { %v3443_v60 = vmul.f32 0.5, %v3442_v54  ;;  %v4880_v54 = vld [vmem:[%s7265_s1 + $0x288] sm:$0xff] }
0x116f   : > { %v3474_v40 = vmul.f32 %v3470_v24, %v7041_v33  ;;  %3816 = vmatpush.bf16.msrb.mxu2 %v4874_v9  ;;  %v4887_v24 = vld [vmem:[%s7265_s1 + $0x2c0] sm:$0xff] }
0x1170   : > { %v3444_v3 = vsub.f32 1.5, %v3443_v60  ;;  %v4873_v60 = vld [vmem:[%s7265_s1 + $0x250] sm:$0xff] }
0x1171   : > { %v3478_v42 = vadd.f32 %v3474_v40, %v7048_v29 }
0x1172   : > { %v3445_v58 = vmul.f32 %v5299_v32, %v3444_v3  ;;  %v4879_v3 = vld [vmem:[%s7265_s1 + $0x280] sm:$0xff] }
0x1173   : > { %3817 = vmatpush.bf16.msrb.mxu2 %v4873_v60 }
0x1174   : > { %v3449_v7 = vsel %vm3448_vm1, %v5299_v32, %v3445_v58  ;;  %v4881_v32 = vld [vmem:[%s7265_s1 + $0x290] sm:$0xff]  ;;  %v4871_v58 = vld [vmem:[%s7265_s1 + $0x240] sm:$0xff] }
0x1175   : > { %v3471_v50 = vmul.f32 %v3449_v7, %v6908_v37  ;;  %v4447_v7 = vld [vmem:[%s7267_s3 + $0x155] ss:$8 sm:$0x7] }
0x1177   : > { %v3475_v39 = vmul.f32 %v3471_v50, %v7041_v33 }
0x1179   : > { %v3479_v48 = vadd.f32 %v3475_v39, %v7048_v29  ;;  %v3487_v39 = vperm.slane %v4447_v7, 2 }
0x117b   : > { %v3482_v51 = vpack.c.bf16 %v3479_v48, %v3478_v42 }
0x117d   : > { %4648 = vmatmul.msk.bf16.vlgmr.msra.gmra.mxu3 %vm426_vm5, %v3482_v51  ;;  %4650 = vmatmul.msk.bf16.vlgmr.msra.gmra.mxu0 %vm426_vm5, %v3482_v51 }
0x117e   : > { %4652 = vmatmul.msk.bf16.vlgmr.msra.gmra.mxu1 %vm426_vm5, %v3482_v51 }
0x118c   : > { %v3418_v6 = vpop.xlane.xlu2 %3417 }
0x118d   : > { %v3424_v37 = vmul.f32 %v3418_v6, %v5532_v47 }
0x118f   : > { %v3428_v34 = vadd.f32 1e-05, %v3424_v37  ;;  %v3485_v37 = vperm.slane %v4447_v7, 0 }
0x1191   : > { %5300 = vrsqrt.f32 %v3428_v34  ;;  %vm3456_vm4 = vweird.f32 %v3428_v34 }
0x1194   : > { %v3421_v27 = vpop.xlane.xlu1 %3420 }
0x1195   : > { %v3425_v36 = vmul.f32 %v3421_v27, %v5532_v47 }
0x1197   : > { %v5301_v17 = vpop.eup %5300  ;;  %v3429_v0 = vadd.f32 1e-05, %v3425_v36 }
0x1198   : > { %v3451_v59 = vmul.f32 %v5301_v17, %v3428_v34  ;;  %vm3457_vm2 = vweird.f32 %v5301_v17 }
0x1199   : > { %5302 = vrsqrt.f32 %v3429_v0  ;;  %vm3458_vm6 = vmor %vm3456_vm4, %vm3457_vm2  ;;  %vm3466_vm9 = vweird.f32 %v3429_v0 }
0x119a   : > { %v3452_v22 = vmul.f32 %v5301_v17, %v3451_v59 }
0x119c   : > { %v3453_v1 = vmul.f32 0.5, %v3452_v22 }
0x119e   : > { %v3454_v56 = vsub.f32 1.5, %v3453_v1 }
0x119f   : > { %v5303_v10 = vpop.eup %5302 }
0x11a0   : > { %v3455_v15 = vmul.f32 %v5301_v17, %v3454_v56  ;;  %v3461_v12 = vmul.f32 %v5303_v10, %v3429_v0  ;;  %vm3467_vm7 = vweird.f32 %v5303_v10 }
0x11a1   : > { %vm3468_vm13 = vmor %vm3466_vm9, %vm3467_vm7 }
0x11a2   : > { %v3462_v8 = vmul.f32 %v5303_v10, %v3461_v12  ;;  %v3459_v55 = vsel %vm3458_vm6, %v5301_v17, %v3455_v15 }
0x11a3   : > { %v3472_v61 = vmul.f32 %v3459_v55, %v6915_v31  ;;  %v4882_v31 = vld [vmem:[%s7265_s1 + $0x298] sm:$0xff] }
0x11a4   : > { %v3463_v2 = vmul.f32 0.5, %v3462_v8  ;;  %3835 = vmatpush.bf16.msrb.mxu3 %v4882_v31  ;;  %v2219_v31 = vld [vmem:[%s7267_s3 + $0x156] ss:$0 sm:$0xff] }
0x11a5   : > { %v3476_v13 = vmul.f32 %v3472_v61, %v7041_v33 }
0x11a6   : > { %v3464_v20 = vsub.f32 1.5, %v3463_v2 }
0x11a7   : > { %v3480_v19 = vadd.f32 %v3476_v13, %v7048_v29 }
0x11a8   : > { %v3465_v44 = vmul.f32 %v5303_v10, %v3464_v20  ;;  %3836 = vmatpush.bf16.msrb.mxu3 %v4881_v32 }
0x11aa   : > { %v3469_v49 = vsel %vm3468_vm13, %v5303_v10, %v3465_v44 }
0x11ab   : > { %v3473_v28 = vmul.f32 %v3469_v49, %v6922_v21  ;;  %v4890_v21 = vld [vmem:[%s7265_s1 + $0x2d8] sm:$0xff] }
0x11ac   : > { %3854 = vmatpush.bf16.msrb.mxu0 %v4890_v21  ;;  %3837 = vmatpush.bf16.msrb.mxu3 %v4880_v54 }
0x11ad   : > { %v3477_v53 = vmul.f32 %v3473_v28, %v7041_v33  ;;  %v4872_v33 = vld [vmem:[%s7265_s1 + $0x248] sm:$0xff] }
0x11ae   : > { %3818 = vmatpush.bf16.msrb.mxu2 %v4872_v33 }
0x11af   : > { %v3481_v14 = vadd.f32 %v3477_v53, %v7048_v29  ;;  %v3486_v29 = vperm.slane %v4447_v7, 1 }
0x11b0   : > { %3855 = vmatpush.bf16.msrb.mxu0 %v4889_v45  ;;  %3838 = vmatpush.bf16.msrb.mxu3 %v4879_v3 }
0x11b1   : > { %v3483_v62 = vpack.c.bf16 %v3481_v14, %v3480_v19 }
0x11b2   : > { %3819 = vmatpush.bf16.msrb.mxu2 %v4871_v58 }
0x11b3   : > { %4649 = vmatmul.msk.bf16.gmra.mxu3 %vm426_vm5, %v3483_v62  ;;  %4651 = vmatmul.msk.bf16.gmra.mxu0 %vm426_vm5, %v3483_v62 }
0x11b4   : > { %4653 = vmatmul.msk.bf16.gmra.mxu1 %vm426_vm5, %v3483_v62  ;;  %3856 = vmatpush.bf16.msrb.mxu0 %v4888_v57 }
0x11b8   : > { %3857 = vmatpush.bf16.msrb.mxu0 %v4887_v24 }
0x11fa   : > { %v3621_v40 = vpop.f32.mrf.mxu0 }
0x11fb   : > { %v3640_v50 = vpop.f32.mrf.mxu1  ;;  %v3622_v48 = vadd.f32 %v3621_v40, %v3486_v29 }
0x11fc   : > { %v3641_v51 = vadd.f32 %v3640_v50, %v3487_v39 }
0x11fd   : > { %v3651_v4 = vmax.f32 %v3622_v48, 0.0 }
0x11fe   : > { %v3652_v11 = vmax.f32 %v3641_v51, 0.0 }
0x1200   : > { %v3602_v42 = vpop.f32.mrf.mxu3 }
0x1201   : > { %v3603_v43 = vadd.f32 %v3602_v42, %v3485_v37 }
0x1202   : > { %v3623_v6 = vpop.f32.mrf.mxu0 }
0x1203   : > { %v3624_v34 = vadd.f32 %v3623_v6, %v3486_v29  ;;  %v3642_v27 = vpop.f32.mrf.mxu1  ;;  %v3650_v22 = vmax.f32 %v3603_v43, 0.0 }
0x1204   : > { %v3643_v52 = vadd.f32 %v3642_v27, %v3487_v39 }
0x1205   : > { %v3654_v36 = vmax.f32 %v3624_v34, 0.0 }
0x1206   : > { %v3655_v41 = vmax.f32 %v3643_v52, 0.0 }
0x1207   : > { %v3663_v17 = vpack.c.bf16 %v3654_v36, %v3651_v4 }
0x1208   : > { %v3664_v0 = vpack.c.bf16 %v3655_v41, %v3652_v11  ;;  %v3604_v23 = vpop.f32.mrf.mxu3 }
0x1209   : > { %v3605_v59 = vadd.f32 %v3604_v23, %v3485_v37  ;;  %3839 = vmatmul.bf16.vlgmr.msrb.gmra.mxu3 %v3663_v17 }
0x120a   : > { %3858 = vmatmul.bf16.vlgmr.msrb.gmra.mxu0 %v3664_v0 }
0x120b   : > { %v3653_v38 = vmax.f32 %v3605_v59, 0.0 }
0x120d   : > { %v3662_v30 = vpack.c.bf16 %v3653_v38, %v3650_v22 }
0x120f   : > { %3820 = vmatmul.bf16.vlgmr.msrb.gmra.mxu2 %v3662_v30 }
0x1230   : > { %v3626_v25 = vpop.f32.mrf.mxu0 }
0x1231   : > { %v3645_v1 = vpop.f32.mrf.mxu1  ;;  %v3627_v63 = vadd.f32 %v3626_v25, %v3486_v29 }
0x1232   : > { %v3646_v46 = vadd.f32 %v3645_v1, %v3487_v39 }
0x1233   : > { %v3657_v55 = vmax.f32 %v3627_v63, 0.0 }
0x1234   : > { %v3658_v20 = vmax.f32 %v3646_v46, 0.0 }
0x1236   : > { %v3607_v56 = vpop.f32.mrf.mxu3 }
0x1237   : > { %v3608_v44 = vadd.f32 %v3607_v56, %v3485_v37 }
0x1238   : > { %v3628_v10 = vpop.f32.mrf.mxu0 }
0x1239   : > { %v3629_v15 = vadd.f32 %v3628_v10, %v3486_v29  ;;  %v3647_v12 = vpop.f32.mrf.mxu1  ;;  %v3656_v19 = vmax.f32 %v3608_v44, 0.0 }
0x123a   : > { %v3648_v8 = vadd.f32 %v3647_v12, %v3487_v39 }
0x123b   : > { %v3660_v2 = vmax.f32 %v3629_v15, 0.0 }
0x123c   : > { %v3661_v61 = vmax.f32 %v3648_v8, 0.0 }
0x123d   : > { %v3666_v49 = vpack.c.bf16 %v3660_v2, %v3657_v55 }
0x123e   : > { %v3667_v28 = vpack.c.bf16 %v3661_v61, %v3658_v20  ;;  %v3609_v13 = vpop.f32.mrf.mxu3  ;;  %v4772_v20 = vld [vmem:[%s7266_s2 + $0x198] sm:$0xf]  ;;  %v4918_v61 = vld [vmem:[%s7266_s2 + $0x1a0] sm:$0xf0] }
0x123f   : > { %v3610_v53 = vadd.f32 %v3609_v13, %v3485_v37  ;;  %3844 = vmatmul.bf16.gmra.mxu3 %v3666_v49  ;;  %v4773_v44 = vor.u32 %v4918_v61, %v4772_v20  ;;  %v4768_v49 = vld [vmem:[%s7266_s2 + $0x180] sm:$0xf] }
0x1240   : > { %3863 = vmatmul.bf16.gmra.mxu0 %v3667_v28  ;;  %v4917_v28 = vld [vmem:[%s7266_s2 + $0x188] sm:$0xf0] }
0x1241   : > { %v3659_v14 = vmax.f32 %v3610_v53, 0.0  ;;  %4030 = vmatpush.bf16.msrb.mxu1 %v4773_v44  ;;  %v4769_v13 = vor.u32 %v4917_v28, %v4768_v49  ;;  %v4764_v53 = vld [vmem:[%s7266_s2 + $0x168] sm:$0xf] }
0x1243   : > { %v3665_v62 = vpack.c.bf16 %v3659_v14, %v3656_v19  ;;  %v4916_v19 = vld [vmem:[%s7266_s2 + $0x170] sm:$0xf0] }
0x1244   : > { %v4765_v14 = vor.u32 %v4916_v19, %v4764_v53 }
0x1245   : > { %3825 = vmatmul.bf16.gmra.mxu2 %v3665_v62  ;;  %4031 = vmatpush.bf16.msrb.mxu1 %v4769_v13  ;;  %v4760_v62 = vld [vmem:[%s7266_s2 + $0x150] sm:$0xf] }
0x1249   : > { %4032 = vmatpush.bf16.msrb.mxu1 %v4765_v14 }
0x1287   : > { %v3859_v45 = vpop.f32.mrf.mxu0 }
0x128c   : > { %v3840_v21 = vpop.f32.mrf.mxu3 }
0x128f   : > { %v3861_v7 = vpop.f32.mrf.mxu0 }
0x1292   : > { %v3821_v5 = vpop.f32.mrf.mxu2 }
0x1293   : > { %v3822_v32 = vadd.f32 %v3821_v5, %v2219_v31  ;;  %v4756_v5 = vld [vmem:[%s7266_s2 + $0x138] sm:$0xf] }
0x1294   : > { %v3842_v33 = vpop.f32.mrf.mxu3 }
0x1295   : > { %v3841_v9 = vadd.f32 %v3840_v21, %v3822_v32  ;;  %v4914_v32 = vld [vmem:[%s7266_s2 + $0x140] sm:$0xf0] }
0x1297   : > { %v3860_v54 = vadd.f32 %v3859_v45, %v3841_v9  ;;  %v4757_v9 = vor.u32 %v4914_v32, %v4756_v5 }
0x1299   : > { %v3869_v57 = vadd.f32 %v3860_v54, %v6880_v26 }
0x129a   : > { %v3823_v60 = vpop.f32.mrf.mxu2 }
0x129b   : > { %v3824_v3 = vadd.f32 %v3823_v60, %v2219_v31  ;;  %v3888_v24 = vsel %vm426_vm5, %v3869_v57, 0.0  ;;  %v4752_v60 = vld [vmem:[%s7266_s2 + $0x120] sm:$0xf] }
0x129c   : > { %3889 = vadd.xlane.f32.xlu0 %v3888_v24 }
0x129d   : > { %v3843_v58 = vadd.f32 %v3842_v33, %v3824_v3  ;;  %v4913_v3 = vld [vmem:[%s7266_s2 + $0x128] sm:$0xf0] }
0x129e   : > { %v4753_v24 = vor.u32 %v4913_v3, %v4752_v60 }
0x129f   : > { %v3862_v40 = vadd.f32 %v3861_v7, %v3843_v58 }
0x12a1   : > { %v3870_v50 = vadd.f32 %v3862_v40, %v6885_v18 }
0x12a3   : > { %v3891_v29 = vsel %vm426_vm5, %v3870_v50, 0.0 }
0x12a4   : > { %3892 = vadd.xlane.f32.xlu2 %v3891_v29 }
0x12bd   : > { %v3864_v51 = vpop.f32.mrf.mxu0 }
0x12c2   : > { %v3845_v39 = vpop.f32.mrf.mxu3 }
0x12c5   : > { %v3866_v11 = vpop.f32.mrf.mxu0 }
0x12c8   : > { %v3826_v42 = vpop.f32.mrf.mxu2 }
0x12c9   : > { %v3827_v48 = vadd.f32 %v3826_v42, %v2219_v31 }
0x12ca   : > { %v3847_v4 = vpop.f32.mrf.mxu3 }
0x12cb   : > { %v3846_v6 = vadd.f32 %v3845_v39, %v3827_v48 }
0x12cd   : > { %v3865_v26 = vadd.f32 %v3864_v51, %v3846_v6 }
0x12cf   : > { %v3871_v37 = vadd.f32 %v3865_v26, %v6890_v35 }
0x12d0   : > { %v3828_v34 = vpop.f32.mrf.mxu2 }
0x12d1   : > { %v3829_v27 = vadd.f32 %v3828_v34, %v2219_v31  ;;  %v3894_v52 = vsel %vm426_vm5, %v3871_v37, 0.0  ;;  %v4915_v31 = vld [vmem:[%s7266_s2 + $0x158] sm:$0xf0] }
0x12d2   : > { %3895 = vadd.xlane.f32.xlu1 %v3894_v52  ;;  %v4761_v21 = vor.u32 %v4915_v31, %v4760_v62 }
0x12d3   : > { %v3848_v36 = vadd.f32 %v3847_v4, %v3829_v27  ;;  %v3873_v4 = vld [vmem:[%s7267_s3 + $0x168] ss:$0 sm:$0xff] }
0x12d4   : > { %4033 = vmatpush.bf16.msrb.mxu1 %v4761_v21 }
0x12d5   : > { %v3867_v18 = vadd.f32 %v3866_v11, %v3848_v36 }
0x12d7   : > { %v3872_v41 = vadd.f32 %v3867_v18, %v6895_v16 }
0x12d8   : > { %4034 = vmatpush.bf16.msrb.mxu1 %v4757_v9 }
0x12d9   : > { %v3897_v43 = vsel %vm426_vm5, %v3872_v41, 0.0 }
0x12da   : > { %3898 = vadd.xlane.f32.xlu0 %v3897_v43  ;;  %v3874_v43 = vld [vmem:[%s7267_s3 + $0x169] ss:$0 sm:$0xff] }
0x12dc   : > { %4035 = vmatpush.bf16.msrb.mxu1 %v4753_v24 }
0x130f   : > { %v3890_v17 = vpop.xlane.xlu0 %3889 }
0x1310   : > { %v3900_v0 = vmul.f32 %v3890_v17, %v5532_v47 }
0x1312   : > { %v7154_v23 = vsub.f32 %v3869_v57, %v3900_v0 }
0x1314   : > { %v3908_v35 = vmul.f32 %v7154_v23, %v7154_v23 }
0x1316   : > { %v3912_v59 = vsel %vm426_vm5, %v3908_v35, 0.0 }
0x1317   : > { %v3893_v22 = vpop.xlane.xlu2 %3892  ;;  %3913 = vadd.xlane.f32.xlu2 %v3912_v59 }
0x1318   : > { %v3901_v38 = vmul.f32 %v3893_v22, %v5532_v47 }
0x131a   : > { %v7160_v30 = vsub.f32 %v3870_v50, %v3901_v38 }
0x131c   : > { %v3909_v16 = vmul.f32 %v7160_v30, %v7160_v30 }
0x131e   : > { %v3915_v25 = vsel %vm426_vm5, %v3909_v16, 0.0 }
0x131f   : > { %3916 = vadd.xlane.f32.xlu1 %v3915_v25 }
0x1345   : > { %v3896_v1 = vpop.xlane.xlu1 %3895 }
0x1346   : > { %v3902_v56 = vmul.f32 %v3896_v1, %v5532_v47 }
0x1348   : > { %v7166_v63 = vsub.f32 %v3871_v37, %v3902_v56 }
0x134a   : > { %v3910_v46 = vmul.f32 %v7166_v63, %v7166_v63 }
0x134c   : > { %v3918_v10 = vsel %vm426_vm5, %v3910_v46, 0.0 }
0x134d   : > { %v3899_v15 = vpop.xlane.xlu0 %3898  ;;  %3919 = vadd.xlane.f32.xlu0 %v3918_v10 }
0x134e   : > { %v3903_v12 = vmul.f32 %v3899_v15, %v5532_v47 }
0x1350   : > { %v7172_v8 = vsub.f32 %v3872_v41, %v3903_v12 }
0x1352   : > { %v3911_v55 = vmul.f32 %v7172_v8, %v7172_v8 }
0x1354   : > { %v3921_v2 = vsel %vm426_vm5, %v3911_v55, 0.0 }
0x1355   : > { %3922 = vadd.xlane.f32.xlu2 %v3921_v2 }
0x138a   : > { %v3914_v45 = vpop.xlane.xlu2 %3913 }
0x138b   : > { %v3924_v54 = vmul.f32 %v3914_v45, %v5532_v47 }
0x138d   : > { %v3928_v57 = vadd.f32 1e-05, %v3924_v54 }
0x138f   : > { %5304 = vrsqrt.f32 %v3928_v57  ;;  %vm3938_vm15 = vweird.f32 %v3928_v57 }
0x1392   : > { %v3917_v33 = vpop.xlane.xlu1 %3916 }
0x1393   : > { %v3925_v58 = vmul.f32 %v3917_v33, %v5532_v47 }
0x1395   : > { %v5305_v7 = vpop.eup %5304  ;;  %v3929_v40 = vadd.f32 1e-05, %v3925_v58 }
0x1396   : > { %v3933_v50 = vmul.f32 %v5305_v7, %v3928_v57  ;;  %vm3939_vm14 = vweird.f32 %v5305_v7 }
0x1397   : > { %5306 = vrsqrt.f32 %v3929_v40  ;;  %vm3940_vm0 = vmor %vm3938_vm15, %vm3939_vm14  ;;  %vm3948_vm8 = vweird.f32 %v3929_v40 }
0x1398   : > { %v3934_v29 = vmul.f32 %v5305_v7, %v3933_v50 }
0x139a   : > { %v3935_v39 = vmul.f32 0.5, %v3934_v29 }
0x139c   : > { %v3936_v42 = vsub.f32 1.5, %v3935_v39 }
0x139d   : > { %v5307_v48 = vpop.eup %5306 }
0x139e   : > { %v3937_v51 = vmul.f32 %v5305_v7, %v3936_v42  ;;  %v3943_v6 = vmul.f32 %v5307_v48, %v3929_v40  ;;  %vm3949_vm3 = vweird.f32 %v5307_v48 }
0x139f   : > { %vm3950_vm10 = vmor %vm3948_vm8, %vm3949_vm3 }
0x13a0   : > { %v3944_v26 = vmul.f32 %v5307_v48, %v3943_v6  ;;  %v3941_v37 = vsel %vm3940_vm0, %v5305_v7, %v3937_v51 }
0x13a1   : > { %v3972_v52 = vmul.f32 %v3941_v37, %v7154_v23 }
0x13a2   : > { %v3945_v34 = vmul.f32 0.5, %v3944_v26 }
0x13a3   : > { %v3976_v18 = vmul.f32 %v3972_v52, %v3873_v4 }
0x13a4   : > { %v3946_v27 = vsub.f32 1.5, %v3945_v34 }
0x13a5   : > { %v3980_v0 = vadd.f32 %v3976_v18, %v3874_v43 }
0x13a6   : > { %v3947_v36 = vmul.f32 %v5307_v48, %v3946_v27 }
0x13a8   : > { %v3951_v11 = vsel %vm3950_vm10, %v5307_v48, %v3947_v36 }
0x13a9   : > { %v3973_v41 = vmul.f32 %v3951_v11, %v7160_v30 }
0x13ab   : > { %v3977_v17 = vmul.f32 %v3973_v41, %v3873_v4 }
0x13ad   : > { %v3981_v35 = vadd.f32 %v3977_v17, %v3874_v43 }
0x13af   : > { %v3984_v59 = vpack.c.bf16 %v3981_v35, %v3980_v0 }
0x13b1   : > { %4774 = vmatmul.msk.bf16.vlgmr.msrb.gmra.mxu1 %vm426_vm5, %v3984_v59 }
0x13c0   : > { %v3920_v23 = vpop.xlane.xlu0 %3919 }
0x13c1   : > { %v3926_v22 = vmul.f32 %v3920_v23, %v5532_v47 }
0x13c3   : > { %v3930_v38 = vadd.f32 1e-05, %v3926_v22 }
0x13c5   : > { %5308 = vrsqrt.f32 %v3930_v38  ;;  %vm3958_vm12 = vweird.f32 %v3930_v38 }
0x13c8   : > { %v3923_v16 = vpop.xlane.xlu2 %3922 }
0x13c9   : > { %v3927_v25 = vmul.f32 %v3923_v16, %v5532_v47 }
0x13cb   : > { %v5309_v1 = vpop.eup %5308  ;;  %v3931_v30 = vadd.f32 1e-05, %v3927_v25 }
0x13cc   : > { %v3953_v56 = vmul.f32 %v5309_v1, %v3930_v38  ;;  %vm3959_vm11 = vweird.f32 %v5309_v1 }
0x13cd   : > { %5310 = vrsqrt.f32 %v3931_v30  ;;  %vm3960_vm1 = vmor %vm3958_vm12, %vm3959_vm11  ;;  %vm3968_vm4 = vweird.f32 %v3931_v30 }
0x13ce   : > { %v3954_v46 = vmul.f32 %v5309_v1, %v3953_v56 }
0x13d0   : > { %v3955_v10 = vmul.f32 0.5, %v3954_v46 }
0x13d2   : > { %v3956_v15 = vsub.f32 1.5, %v3955_v10 }
0x13d3   : > { %v5311_v12 = vpop.eup %5310 }
0x13d4   : > { %v3957_v55 = vmul.f32 %v5309_v1, %v3956_v15  ;;  %v3963_v2 = vmul.f32 %v5311_v12, %v3931_v30  ;;  %vm3969_vm2 = vweird.f32 %v5311_v12 }
0x13d5   : > { %vm3970_vm6 = vmor %vm3968_vm4, %vm3969_vm2 }
0x13d6   : > { %v3964_v20 = vmul.f32 %v5311_v12, %v3963_v2  ;;  %v3961_v61 = vsel %vm3960_vm1, %v5309_v1, %v3957_v55 }
0x13d7   : > { %v3974_v47 = vmul.f32 %v3961_v61, %v7166_v63  ;;  %v3875_v63 = vld [vmem:[%s7267_s3 + $0x16a] ss:$0 sm:$0xff] }
0x13d8   : > { %v3965_v44 = vmul.f32 0.5, %v3964_v20 }
0x13d9   : > { %v3978_v19 = vmul.f32 %v3974_v47, %v3873_v4 }
0x13da   : > { %v3966_v49 = vsub.f32 1.5, %v3965_v44 }
0x13db   : > { %v3982_v62 = vadd.f32 %v3978_v19, %v3874_v43 }
0x13dc   : > { %v3967_v28 = vmul.f32 %v5311_v12, %v3966_v49 }
0x13de   : > { %v3971_v13 = vsel %vm3970_vm6, %v5311_v12, %v3967_v28 }
0x13df   : > { %v3975_v53 = vmul.f32 %v3971_v13, %v7172_v8 }
0x13e1   : > { %v3979_v14 = vmul.f32 %v3975_v53, %v3873_v4 }
0x13e3   : > { %v3983_v31 = vadd.f32 %v3979_v14, %v3874_v43 }
0x13e5   : > { %v3985_v21 = vpack.c.bf16 %v3983_v31, %v3982_v62 }
0x13e7   : > { %4775 = vmatmul.msk.bf16.gmra.mxu1 %vm426_vm5, %v3985_v21 }
0x142e   : > { %v4037_v5 = vpop.f32.mrf.mxu1 }
0x142f   : > { %v4038_v32 = vadd.f32 %v4037_v5, %v3875_v63 }
0x1431   : > { %4047 = vst [vmem:[%s191_s28] sm:$0xff] %v4038_v32 }
0x1436   : > { %v4039_v45 = vpop.f32.mrf.mxu1 }
0x1437   : > { %v4040_v8 = vadd.f32 %v4039_v45, %v3875_v63 }
0x1439   : > { %4048 = vst [vmem:[%s191_s28 + $0x8] sm:$0xff] %v4040_v8 }
0x1464   : > { %v4042_v9 = vpop.f32.mrf.mxu1 }
0x1465   : > { %v4043_v54 = vadd.f32 %v4042_v9, %v3875_v63 }
0x1467   : > { %4049 = vst [vmem:[%s191_s28 + $0x10] sm:$0xff] %v4043_v54 }
0x146c   : > { %v4044_v57 = vpop.f32.mrf.mxu1 }
0x146d   : > { %v4045_v60 = vadd.f32 %v4044_v57, %v3875_v63 }
0x146f   : > { %4050 = vst [vmem:[%s191_s28 + $0x18] sm:$0xff] %v4045_v60 }
0x1470   : > { %5339 = shalt.err (!%p5336_p3)
}
0x1471   : > { %s5387_s6 = smov 128   ;;  %s5388_s8 = smov 8  }
0x1472   : > { %4924 = dma.vmem_to_hbm [thread:$0]  (%p5452_p5), %s4065_s9, 512, %s4067_s12, %s4052_s13, %s5387_s6, %s5387_s6, %s5388_s8  }
0x1473 PF: > { %p4930_p4 = scmp.ge.s32.totalorder %s5374_s18, 2  ;;  %s4081_s27 = sand.u32 1, %s5362_s15  }
0x1474   : > { %s4082_s28 = scalar_lea.sflag [#allocation3], %s4081_s27 }
0x1475   : > { %p4927_p7 = pnand %p4930_p4, %p5456_p6 }
0x1477   : > { %p4928_p8 = pneg %p4927_p7 }
0x1479   : > { %5357 = dma.done.wait (%p4928_p8), %s4082_s28, 512  }
0x147a   : > { %5359 = vsyncadd (%p4928_p8), %s4082_s28, 4294966784  ;;  %p14_p9 = scmp.ge.s32.totalorder %s5439_s21, 4   ;;  %s7274_s15 = smov %s5366_s16 }
0x147b   : > { %s7275_s16 = smov %s5370_s17  ;;  %s7276_s17 = smov %s5450_s24 }
0x147c   : > { %s7277_s18 = smov %s5439_s21  ;;  %16 = sbr.rel (!%p14_p9) target bundleno = 3 (0x3), region = 73 }
0x1481   :  { %4088 = vsyncpa [#allocation3], 1 }
0x1482   :  { %4090 = vsyncpa [#allocation3 + $0x1], 1 }

</bundles_post_ra>
